<compile_context>
chip_gen: v5e
topology: v5e:2x2
jax: 0.10.0
libtpu: 0.0.40
codegen_flags: <defaults>
</compile_context>

<pallas_src>
import jax
import jax.numpy as jnp
from jax.experimental import pallas as pl
from jax.experimental.pallas import tpu as pltpu

F_IN = 7          # MUTAG num_node_features
F_PAD = 8         # feature dim padded to a full sublane step
HID = 64
N_CLS = 2         # MUTAG num_classes
OUT_PAD = 128     # lane-dense output width
RATIO = 0.8
NEG = -1.0e30     # "minus infinity" for masked scores / padded logits


# ------------------------------ fused kernel --------------------------------

def _fused_kernel(adj_ref, x_ref, mc_ref, st_ref, pm_ref,
                  wc_ref, vc_ref, w2_ref, out_ref):
    f32 = jnp.float32

    A = adj_ref[0]                       # (M, M) block-diagonal adjacency (G graphs)
    x0 = x_ref[0]                        # (M, F_PAD), padded feature col is zero
    mc = mc_ref[0]                       # (M, 1)   1.0 = real node
    same = st_ref[0]                     # (M, M)   1.0 iff same graph
    same_lt = st_ref[1]                  # (M, M)   same-graph AND (lane idx < sublane idx)
    eye = st_ref[2]                      # (M, M)   identity (only used for exact to_row)
    pmat = pm_ref[...]                   # (G, M)   graph-membership selection matrix

    # packed parameter slabs (all slice offsets are multiples of 8 sublanes)
    w1 = wc_ref[0:F_PAD, :]                              # (8, HID)  conv1 (row 7 = 0)
    w2 = wc_ref[F_PAD:F_PAD + HID, :]                    # (HID, HID) conv2
    l1wa = wc_ref[F_PAD + HID:F_PAD + 2 * HID, :]        # lin1 rows acting on x1
    l1wb = wc_ref[F_PAD + 2 * HID:F_PAD + 3 * HID, :]    # lin1 rows acting on x2
    b1 = vc_ref[0:1, :]
    p1 = vc_ref[1:2, :]
    b2 = vc_ref[2:3, :]
    p2 = vc_ref[3:4, :]
    l1b = vc_ref[4:5, :]
    l2w = w2_ref[0:HID, :]               # (HID, 128) zero-padded beyond class 1
    l2b = w2_ref[HID:HID + 1, :]         # (1, 128)   bias, NEG beyond class 1

    def to_row(v_col):
        # Bit-exact (M,1) -> (1,M): element j is v[j]*1 plus zeros, so the value is
        # reproduced exactly (required so row/col score comparisons are consistent).
        return jnp.sum(eye * v_col, axis=0, keepdims=True)

    def gcn_relu(keep_col, xg, w, b):
        # GCNConv on the kept subgraph, without materializing filter_adj:
        #   A_hat = A_kept + I_kept;  deg = A_hat @ keep  (MXU mat-vec)
        #   h = (dinv * (A_hat @ (dinv * x))) @ W + b
        # Rows of dropped/padded nodes come out as garbage/relu(b); they are excluded
        # downstream by keep masks, and never leak into kept rows because xg has zero
        # rows for dropped nodes and deg only counts kept neighbours.
        deg = jnp.dot(A, keep_col, preferred_element_type=f32) + keep_col      # (M,1)
        dinv = jnp.where(deg > 0.0, jax.lax.rsqrt(deg), 0.0)                   # (M,1)
        xs = dinv * xg
        t = jnp.dot(A, xs, preferred_element_type=f32) + keep_col * xs         # (M,F)
        h = jnp.dot(dinv * t, w, preferred_element_type=f32) + b               # (M,HID)
        return jnp.maximum(h, 0.0)

    def topk_pool(h, p_row, keep_col, n_col):
        # PyG TopKPooling: score = tanh((h . p)/||p||); keep top ceil(ratio*n) nodes
        # PER GRAPH; gate kept features by their score.  Selection is a keep MASK from
        # a stable descending rank (ties broken by node index), restricted to
        # same-graph pairs via `same` / `same_lt`.
        inv_pn = jax.lax.rsqrt(jnp.sum(p_row * p_row))                         # EUP
        raw_col = jnp.sum(h * p_row, axis=-1, keepdims=True)                   # (M,1)
        gate = jnp.tanh(raw_col * inv_pn)                                      # (M,1)

        r_col = jnp.where(keep_col > 0.0, raw_col, NEG)                        # (M,1)
        r_row = to_row(r_col)                                                  # (1,M)

        # epsilon guard: exact multiples of 1/ratio don't round up from fp32 error
        k_col = jnp.ceil(RATIO * n_col - 1e-4)                                 # (M,1)

        beats = (jnp.where(r_row > r_col, same, 0.0)
                 + jnp.where(r_row == r_col, same_lt, 0.0))                    # (M,M)
        rank = jnp.sum(beats, axis=-1, keepdims=True)                          # (M,1)
        keep_new = jnp.where((rank < k_col) & (keep_col > 0.0), 1.0, 0.0)      # (M,1)
        return h * gate * keep_new, keep_new, k_col

    # ------------------------------- layer 1 --------------------------------
    n1 = jnp.dot(same, mc, preferred_element_type=f32)          # valid nodes per graph
    h1 = gcn_relu(mc, x0, w1, b1)
    g1, keep1, k1 = topk_pool(h1, p1, mc, n1)
    # mean over kept nodes: exactly k nodes survive per graph, so divide rows by k
    x1 = jnp.dot(pmat, g1 * (1.0 / jnp.maximum(k1, 1.0)),
                 preferred_element_type=f32)                    # (G, HID)

    # ------------------------------- layer 2 --------------------------------
    h2 = gcn_relu(keep1, g1, w2, b2)
    g2, keep2, k2 = topk_pool(h2, p2, keep1, k1)                # n for pool2 is k1
    x2 = jnp.dot(pmat, g2 * (1.0 / jnp.maximum(k2, 1.0)),
                 preferred_element_type=f32)                    # (G, HID)

    # ------------------------- MLP head + log_softmax ------------------------
    # concat([x1, x2]) @ W == x1 @ W[:HID] + x2 @ W[HID:]  (no lane concat needed)
    hh = (jnp.dot(x1, l1wa, preferred_element_type=f32)
          + jnp.dot(x2, l1wb, preferred_element_type=f32) + l1b)
    hh = jnp.maximum(hh, 0.0)
    logits = jnp.dot(hh, l2w, preferred_element_type=f32) + l2b  # (G, 128); cols>=2 ~ -inf
    mx = jnp.max(logits, axis=-1, keepdims=True)
    lse = jnp.log(jnp.sum(jnp.exp(logits - mx), axis=-1, keepdims=True)) + mx
    out_ref[0] = logits - lse                                    # lane-dense store


# ------------------------------ Pallas wrapper -------------------------------

def _pack_params(params):
    w1 = jnp.pad(params["conv1_w"], ((0, F_PAD - F_IN), (0, 0)))           # (8, HID)
    wcat = jnp.concatenate(
        [w1, params["conv2_w"], params["lin1_w"][:HID], params["lin1_w"][HID:]],
        axis=0).astype(jnp.float32)                                        # (200, HID)
    vcat = jnp.concatenate(
        [params["conv1_b"], params["pool1_p"], params["conv2_b"],
         params["pool2_p"], params["lin1_b"]], axis=0).astype(jnp.float32)  # (5, HID)
    l2w = jnp.pad(params["lin2_w"], ((0, 0), (0, OUT_PAD - N_CLS)))
    l2b = jnp.pad(params["lin2_b"], ((0, 0), (0, OUT_PAD - N_CLS)),
                  constant_values=NEG)
    w2cat = jnp.concatenate([l2w, l2b], axis=0).astype(jnp.float32)        # (HID+1, 128)
    return wcat, vcat, w2cat


def gcn_with_pooling_forward(x, adj, mask, params, *, graphs_per_step=8,
                             validate=False):
    """x: [B,N,F_IN] (padded rows zero), adj: symmetric dense 0/1 [B,N,N] (no self
    loops, padded rows/cols zeroed), mask: [B,N,1].  Returns [B, N_CLS] log-probs.
    graphs_per_step: graphs packed per grid step; pick it so ceil(B/G) >= 2 to keep
    both v7x TensorCores busy, and G*N <= ~1k to stay well inside scoped VMEM."""
    B, N, F = x.shape
    assert F == F_IN

    if validate:  # cheap host-side sanity checks (eager inputs only)
        sym = bool(jnp.all(adj == jnp.transpose(adj, (0, 2, 1))))
        diag0 = bool(jnp.all(jnp.diagonal(adj, axis1=1, axis2=2) == 0))
        padded = bool(jnp.all(adj * (1.0 - mask * jnp.transpose(mask, (0, 2, 1))) == 0))
        if not (sym and diag0 and padded):
            raise ValueError("adjacency must be symmetric, zero-diagonal, and zero on "
                             "padded rows/cols (undirected graphs only)")

    G = graphs_per_step
    S = -(-B // G)                       # grid steps
    Bp = S * G
    if Bp != B:                          # pad batch with empty graphs
        pad = Bp - B
        x = jnp.concatenate([x, jnp.zeros((pad, N, F), x.dtype)], axis=0)
        adj = jnp.concatenate([adj, jnp.zeros((pad, N, N), adj.dtype)], axis=0)
        mask = jnp.concatenate([mask, jnp.zeros((pad, N, 1), mask.dtype)], axis=0)
    M = G * N

    # --- per-step slabs -------------------------------------------------------
    xp = jnp.pad(x.astype(jnp.float32).reshape(S, M, F),
                 ((0, 0), (0, 0), (0, F_PAD - F)))                     # (S, M, 8)
    mc = mask.astype(jnp.float32).reshape(S, M, 1)                     # (S, M, 1)
    a4 = adj.astype(jnp.float32).reshape(S, G, N, N)
    adjp = jnp.zeros((S, M, M), jnp.float32)                           # block diagonal
    for g in range(G):
        adjp = adjp.at[:, g * N:(g + 1) * N, g * N:(g + 1) * N].set(a4[:, g])

    # --- static structure (hoisted out of the kernel body) --------------------
    eye_g = jnp.eye(G, dtype=jnp.float32)
    same = jnp.kron(eye_g, jnp.ones((N, N), jnp.float32))              # (M, M)
    struct = jnp.stack([same,
                        same * jnp.tril(jnp.ones((M, M), jnp.float32), -1),
                        jnp.eye(M, dtype=jnp.float32)])                # (3, M, M)
    pmat = jnp.kron(eye_g, jnp.ones((1, N), jnp.float32))              # (G, M)

    wcat, vcat, w2cat = _pack_params(params)

    out = pl.pallas_call(
        _fused_kernel,
        out_shape=jax.ShapeDtypeStruct((S, G, OUT_PAD), jnp.float32),
        grid=(S,),
        in_specs=[
            pl.BlockSpec((1, M, M), lambda s: (s, 0, 0)),        # adjacency slab
            pl.BlockSpec((1, M, F_PAD), lambda s: (s, 0, 0)),    # node features
            pl.BlockSpec((1, M, 1), lambda s: (s, 0, 0)),        # node mask (column)
            pl.BlockSpec((3, M, M), lambda s: (0, 0, 0)),        # same / same_lt / eye
            pl.BlockSpec((G, M), lambda s: (0, 0)),              # graph selection
            pl.BlockSpec(wcat.shape, lambda s: (0, 0)),          # packed weight slab
            pl.BlockSpec(vcat.shape, lambda s: (0, 0)),          # packed bias/p vectors
            pl.BlockSpec(w2cat.shape, lambda s: (0, 0)),         # packed lin2 (padded)
        ],
        out_specs=pl.BlockSpec((1, G, OUT_PAD), lambda s: (s, 0, 0)),
        # One slab of G graphs per grid step; steps are independent ("parallel"), so
        # v7x shards them across its two TensorCores; v5e/v6e run a short serial loop.
        compiler_params=pltpu.CompilerParams(dimension_semantics=("parallel",)),
    )(adjp, xp, mc, struct, pmat, wcat, vcat, w2cat)

    return out.reshape(S * G, OUT_PAD)[:B, :N_CLS]


# -------------------------------- parameters ---------------------------------

def _glorot(key, shape):
    lim = jnp.sqrt(6.0 / (shape[0] + shape[1]))
    return jax.random.uniform(key, shape, jnp.float32, -lim, lim)


def init_params(key):
    ks = jax.random.split(key, 10)
    return {
        "conv1_w": _glorot(ks[0], (F_IN, HID)),
        "conv1_b": 0.01 * jax.random.normal(ks[1], (1, HID), jnp.float32),
        "pool1_p": _glorot(ks[2], (1, HID)),
        "conv2_w": _glorot(ks[3], (HID, HID)),
        "conv2_b": 0.01 * jax.random.normal(ks[4], (1, HID), jnp.float32),
        "pool2_p": _glorot(ks[5], (1, HID)),
        "lin1_w": _glorot(ks[6], (2 * HID, HID)),
        "lin1_b": 0.01 * jax.random.normal(ks[7], (1, HID), jnp.float32),
        "lin2_w": _glorot(ks[8], (HID, N_CLS)),
        "lin2_b": 0.01 * jax.random.normal(ks[9], (1, N_CLS), jnp.float32),
    }


# ----------------------------------- main -------------------------------------

if __name__ == "__main__":
    key = jax.random.PRNGKey(0)
    k_par, k_x, k_a, k_s = jax.random.split(key, 4)
    params = init_params(k_par)

    B, N = 16, 16                                   # 16 small graphs, padded to 16 nodes
    sizes = jax.random.randint(k_s, (B,), 6, N + 1)
    mask = (jnp.arange(N)[None, :] < sizes[:, None]).astype(jnp.float32)[..., None]

    x = jax.random.normal(k_x, (B, N, F_IN), jnp.float32) * mask

    a = (jax.random.uniform(k_a, (B, N, N)) < 0.3).astype(jnp.float32)
    a = jnp.maximum(a, jnp.transpose(a, (0, 2, 1)))           # undirected (symmetric)
    a = a * (1.0 - jnp.eye(N, dtype=jnp.float32)[None])       # no raw self loops
    a = a * mask * jnp.transpose(mask, (0, 2, 1))             # zero padded rows/cols

    # G=8 graphs per step -> 128-node slabs, grid=(2,) so both v7x TCs get work.
    out = gcn_with_pooling_forward(x, a, mask, params, graphs_per_step=8,
                                   validate=True)             # [B, 2] log-probs
    jax.block_until_ready(out)

    assert out.shape == (B, N_CLS)
    assert bool(jnp.all(jnp.isfinite(out)))
    print("KERNEL_OK")
</pallas_src>

<mosaic_0001>
module attributes {stable_mosaic.version = 11 : i64} {
  func.func @_fused_kernel(%arg0: i32, %arg1: memref<1x128x128xf32, #tpu.memory_space<vmem>>, %arg2: memref<1x128x8xf32, #tpu.memory_space<vmem>>, %arg3: memref<1x128x1xf32, #tpu.memory_space<vmem>>, %arg4: memref<3x128x128xf32, #tpu.memory_space<vmem>>, %arg5: memref<8x128xf32, #tpu.memory_space<vmem>>, %arg6: memref<200x64xf32, #tpu.memory_space<vmem>>, %arg7: memref<5x64xf32, #tpu.memory_space<vmem>>, %arg8: memref<65x128xf32, #tpu.memory_space<vmem>>, %arg9: memref<1x8x128xf32, #tpu.memory_space<vmem>>) attributes {dimension_semantics = [#tpu.dimension_semantics<parallel>], iteration_bounds = array<i64: 2>, scalar_prefetch = 0 : i64, scratch_operands = 0 : i64, tpu.core_type = #tpu.core_type<tc>, window_params = [{transform_indices = @transform_0, window_bounds = array<i64: 1, 128, 128>}, {transform_indices = @transform_1, window_bounds = array<i64: 1, 128, 8>}, {transform_indices = @transform_2, window_bounds = array<i64: 1, 128, 1>}, {pipeline_mode = #tpu.pipeline_mode<synchronous>, transform_indices = @transform_3, window_bounds = array<i64: 3, 128, 128>}, {pipeline_mode = #tpu.pipeline_mode<synchronous>, transform_indices = @transform_4, window_bounds = array<i64: 8, 128>}, {pipeline_mode = #tpu.pipeline_mode<synchronous>, transform_indices = @transform_5, window_bounds = array<i64: 200, 64>}, {pipeline_mode = #tpu.pipeline_mode<synchronous>, transform_indices = @transform_6, window_bounds = array<i64: 5, 64>}, {pipeline_mode = #tpu.pipeline_mode<synchronous>, transform_indices = @transform_7, window_bounds = array<i64: 65, 128>}, {transform_indices = @transform_8, window_bounds = array<i64: 1, 8, 128>}]} {
    %c0 = arith.constant 0 : index
    %c0_0 = arith.constant 0 : index
    %c0_1 = arith.constant 0 : index
    %0 = vector.load %arg1[%c0, %c0_0, %c0_1] : memref<1x128x128xf32, #tpu.memory_space<vmem>>, vector<1x128x128xf32>
    %1 = vector.shape_cast %0 : vector<1x128x128xf32> to vector<128x128xf32>
    %c0_2 = arith.constant 0 : index
    %c0_3 = arith.constant 0 : index
    %c0_4 = arith.constant 0 : index
    %2 = vector.load %arg2[%c0_2, %c0_3, %c0_4] : memref<1x128x8xf32, #tpu.memory_space<vmem>>, vector<1x128x8xf32>
    %3 = vector.shape_cast %2 : vector<1x128x8xf32> to vector<128x8xf32>
    %c0_5 = arith.constant 0 : index
    %c0_6 = arith.constant 0 : index
    %c0_7 = arith.constant 0 : index
    %4 = vector.load %arg3[%c0_5, %c0_6, %c0_7] : memref<1x128x1xf32, #tpu.memory_space<vmem>>, vector<1x128x1xf32>
    %5 = vector.shape_cast %4 : vector<1x128x1xf32> to vector<128x1xf32>
    %c0_8 = arith.constant 0 : index
    %c0_9 = arith.constant 0 : index
    %c0_10 = arith.constant 0 : index
    %6 = vector.load %arg4[%c0_8, %c0_9, %c0_10] : memref<3x128x128xf32, #tpu.memory_space<vmem>>, vector<1x128x128xf32>
    %7 = vector.shape_cast %6 : vector<1x128x128xf32> to vector<128x128xf32>
    %c1 = arith.constant 1 : index
    %c0_11 = arith.constant 0 : index
    %c0_12 = arith.constant 0 : index
    %8 = vector.load %arg4[%c1, %c0_11, %c0_12] : memref<3x128x128xf32, #tpu.memory_space<vmem>>, vector<1x128x128xf32>
    %9 = vector.shape_cast %8 : vector<1x128x128xf32> to vector<128x128xf32>
    %c2 = arith.constant 2 : index
    %c0_13 = arith.constant 0 : index
    %c0_14 = arith.constant 0 : index
    %10 = vector.load %arg4[%c2, %c0_13, %c0_14] : memref<3x128x128xf32, #tpu.memory_space<vmem>>, vector<1x128x128xf32>
    %11 = vector.shape_cast %10 : vector<1x128x128xf32> to vector<128x128xf32>
    %c0_15 = arith.constant 0 : index
    %c0_16 = arith.constant 0 : index
    %12 = vector.load %arg5[%c0_15, %c0_16] : memref<8x128xf32, #tpu.memory_space<vmem>>, vector<8x128xf32>
    %c0_17 = arith.constant 0 : index
    %c0_18 = arith.constant 0 : index
    %13 = vector.load %arg6[%c0_17, %c0_18] : memref<200x64xf32, #tpu.memory_space<vmem>>, vector<8x64xf32>
    %c8 = arith.constant 8 : index
    %c0_19 = arith.constant 0 : index
    %14 = vector.load %arg6[%c8, %c0_19] : memref<200x64xf32, #tpu.memory_space<vmem>>, vector<64x64xf32>
    %c72 = arith.constant 72 : index
    %c0_20 = arith.constant 0 : index
    %15 = vector.load %arg6[%c72, %c0_20] : memref<200x64xf32, #tpu.memory_space<vmem>>, vector<64x64xf32>
    %c136 = arith.constant 136 : index
    %c0_21 = arith.constant 0 : index
    %16 = vector.load %arg6[%c136, %c0_21] : memref<200x64xf32, #tpu.memory_space<vmem>>, vector<64x64xf32>
    %c0_22 = arith.constant 0 : index
    %c0_23 = arith.constant 0 : index
    %17 = vector.load %arg7[%c0_22, %c0_23] : memref<5x64xf32, #tpu.memory_space<vmem>>, vector<1x64xf32>
    %c1_24 = arith.constant 1 : index
    %c0_25 = arith.constant 0 : index
    %18 = vector.load %arg7[%c1_24, %c0_25] : memref<5x64xf32, #tpu.memory_space<vmem>>, vector<1x64xf32>
    %c2_26 = arith.constant 2 : index
    %c0_27 = arith.constant 0 : index
    %19 = vector.load %arg7[%c2_26, %c0_27] : memref<5x64xf32, #tpu.memory_space<vmem>>, vector<1x64xf32>
    %c3 = arith.constant 3 : index
    %c0_28 = arith.constant 0 : index
    %20 = vector.load %arg7[%c3, %c0_28] : memref<5x64xf32, #tpu.memory_space<vmem>>, vector<1x64xf32>
    %c4 = arith.constant 4 : index
    %c0_29 = arith.constant 0 : index
    %21 = vector.load %arg7[%c4, %c0_29] : memref<5x64xf32, #tpu.memory_space<vmem>>, vector<1x64xf32>
    %c0_30 = arith.constant 0 : index
    %c0_31 = arith.constant 0 : index
    %22 = vector.load %arg8[%c0_30, %c0_31] : memref<65x128xf32, #tpu.memory_space<vmem>>, vector<64x128xf32>
    %c64 = arith.constant 64 : index
    %c0_32 = arith.constant 0 : index
    %23 = vector.load %arg8[%c64, %c0_32] : memref<65x128xf32, #tpu.memory_space<vmem>>, vector<1x128xf32>
    %cst = arith.constant dense<0.000000e+00> : vector<128x1xf32>
    %24 = tpu.matmul %7, %5, %cst {dimension_numbers = #tpu.dot_dimension_numbers<[1], [0], [0], [1], [0, 0, 1, 1], [], []>} : vector<128x128xf32>, vector<128x1xf32>, vector<128x1xf32> -> vector<128x1xf32>
    %cst_33 = arith.constant dense<0.000000e+00> : vector<128x1xf32>
    %25 = tpu.matmul %1, %5, %cst_33 {dimension_numbers = #tpu.dot_dimension_numbers<[1], [0], [0], [1], [0, 0, 1, 1], [], []>} : vector<128x128xf32>, vector<128x1xf32>, vector<128x1xf32> -> vector<128x1xf32>
    %26 = arith.addf %25, %5 : vector<128x1xf32>
    %cst_34 = arith.constant 0.000000e+00 : f32
    %27 = vector.broadcast %cst_34 : f32 to vector<128x1xf32>
    %28 = arith.cmpf ogt, %26, %27 : vector<128x1xf32>
    %29 = math.rsqrt %26 : vector<128x1xf32>
    %cst_35 = arith.constant 0.000000e+00 : f32
    %30 = vector.broadcast %cst_35 : f32 to vector<128x1xf32>
    %31 = arith.select %28, %29, %30 : vector<128x1xi1>, vector<128x1xf32>
    %32 = vector.broadcast %31 : vector<128x1xf32> to vector<128x8xf32>
    %33 = arith.mulf %32, %3 : vector<128x8xf32>
    %cst_36 = arith.constant dense<0.000000e+00> : vector<128x8xf32>
    %34 = tpu.matmul %1, %33, %cst_36 {dimension_numbers = #tpu.dot_dimension_numbers<[1], [0], [0], [1], [0, 0, 1, 1], [], []>} : vector<128x128xf32>, vector<128x8xf32>, vector<128x8xf32> -> vector<128x8xf32>
    %35 = vector.broadcast %5 : vector<128x1xf32> to vector<128x8xf32>
    %36 = arith.mulf %35, %33 : vector<128x8xf32>
    %37 = arith.addf %34, %36 : vector<128x8xf32>
    %38 = vector.broadcast %31 : vector<128x1xf32> to vector<128x8xf32>
    %39 = arith.mulf %38, %37 : vector<128x8xf32>
    %cst_37 = arith.constant dense<0.000000e+00> : vector<128x64xf32>
    %40 = tpu.matmul %39, %13, %cst_37 {dimension_numbers = #tpu.dot_dimension_numbers<[1], [0], [0], [1], [0, 0, 1, 1], [], []>} : vector<128x8xf32>, vector<8x64xf32>, vector<128x64xf32> -> vector<128x64xf32>
    %41 = vector.broadcast %17 : vector<1x64xf32> to vector<128x64xf32>
    %42 = arith.addf %40, %41 : vector<128x64xf32>
    %cst_38 = arith.constant 0.000000e+00 : f32
    %43 = vector.broadcast %cst_38 : f32 to vector<128x64xf32>
    %44 = arith.maximumf %42, %43 : vector<128x64xf32>
    %45 = arith.mulf %18, %18 : vector<1x64xf32>
    %46 = vector.shape_cast %45 : vector<1x64xf32> to vector<1x1x64xf32>
    %cst_39 = arith.constant dense<0.000000e+00> : vector<1xf32>
    %47 = vector.multi_reduction <add>, %46, %cst_39 [1, 2] : vector<1x1x64xf32> to vector<1xf32>
    %48 = vector.shape_cast %47 : vector<1xf32> to vector<1x1x1xf32>
    %49 = vector.extract %48[0, 0, 0] : f32 from vector<1x1x1xf32>
    %50 = math.rsqrt %49 : f32
    %51 = vector.broadcast %18 : vector<1x64xf32> to vector<128x64xf32>
    %52 = arith.mulf %44, %51 : vector<128x64xf32>
    %cst_40 = arith.constant dense<0.000000e+00> : vector<128xf32>
    %53 = vector.multi_reduction <add>, %52, %cst_40 [1] : vector<128x64xf32> to vector<128xf32>
    %54 = vector.shape_cast %53 : vector<128xf32> to vector<128x1xf32>
    %55 = vector.broadcast %50 : f32 to vector<128x1xf32>
    %56 = arith.mulf %54, %55 : vector<128x1xf32>
    %57 = math.tanh %56 : vector<128x1xf32>
    %cst_41 = arith.constant 0.000000e+00 : f32
    %58 = vector.broadcast %cst_41 : f32 to vector<128x1xf32>
    %59 = arith.cmpf ogt, %5, %58 : vector<128x1xf32>
    %cst_42 = arith.constant -1.000000e+30 : f32
    %60 = vector.broadcast %cst_42 : f32 to vector<128x1xf32>
    %61 = arith.select %59, %54, %60 : vector<128x1xi1>, vector<128x1xf32>
    %62 = vector.broadcast %61 : vector<128x1xf32> to vector<128x128xf32>
    %63 = arith.mulf %11, %62 : vector<128x128xf32>
    %cst_43 = arith.constant dense<0.000000e+00> : vector<128xf32>
    %64 = vector.multi_reduction <add>, %63, %cst_43 [0] : vector<128x128xf32> to vector<128xf32>
    %65 = vector.shape_cast %64 : vector<128xf32> to vector<1x128xf32>
    %cst_44 = arith.constant 8.000000e-01 : f32
    %66 = vector.broadcast %cst_44 : f32 to vector<128x1xf32>
    %67 = arith.mulf %66, %24 : vector<128x1xf32>
    %cst_45 = arith.constant 9.99999974E-5 : f32
    %68 = vector.broadcast %cst_45 : f32 to vector<128x1xf32>
    %69 = arith.subf %67, %68 : vector<128x1xf32>
    %70 = math.ceil %69 : vector<128x1xf32>
    %71 = vector.broadcast %65 : vector<1x128xf32> to vector<128x128xf32>
    %72 = vector.broadcast %61 : vector<128x1xf32> to vector<128x128xf32>
    %73 = arith.cmpf ogt, %71, %72 : vector<128x128xf32>
    %cst_46 = arith.constant 0.000000e+00 : f32
    %74 = vector.broadcast %cst_46 : f32 to vector<128x128xf32>
    %75 = arith.select %73, %7, %74 : vector<128x128xi1>, vector<128x128xf32>
    %76 = vector.broadcast %65 : vector<1x128xf32> to vector<128x128xf32>
    %77 = vector.broadcast %61 : vector<128x1xf32> to vector<128x128xf32>
    %78 = arith.cmpf oeq, %76, %77 : vector<128x128xf32>
    %cst_47 = arith.constant 0.000000e+00 : f32
    %79 = vector.broadcast %cst_47 : f32 to vector<128x128xf32>
    %80 = arith.select %78, %9, %79 : vector<128x128xi1>, vector<128x128xf32>
    %81 = arith.addf %75, %80 : vector<128x128xf32>
    %cst_48 = arith.constant dense<0.000000e+00> : vector<128xf32>
    %82 = vector.multi_reduction <add>, %81, %cst_48 [1] : vector<128x128xf32> to vector<128xf32>
    %83 = vector.shape_cast %82 : vector<128xf32> to vector<128x1xf32>
    %84 = arith.cmpf olt, %83, %70 : vector<128x1xf32>
    %cst_49 = arith.constant 0.000000e+00 : f32
    %85 = vector.broadcast %cst_49 : f32 to vector<128x1xf32>
    %86 = arith.cmpf ogt, %5, %85 : vector<128x1xf32>
    %87 = arith.andi %84, %86 : vector<128x1xi1>
    %cst_50 = arith.constant 1.000000e+00 : f32
    %cst_51 = arith.constant 0.000000e+00 : f32
    %88 = vector.broadcast %cst_50 : f32 to vector<128x1xf32>
    %89 = vector.broadcast %cst_51 : f32 to vector<128x1xf32>
    %90 = arith.select %87, %88, %89 : vector<128x1xi1>, vector<128x1xf32>
    %91 = vector.broadcast %57 : vector<128x1xf32> to vector<128x64xf32>
    %92 = arith.mulf %44, %91 : vector<128x64xf32>
    %93 = vector.broadcast %90 : vector<128x1xf32> to vector<128x64xf32>
    %94 = arith.mulf %92, %93 : vector<128x64xf32>
    %cst_52 = arith.constant 1.000000e+00 : f32
    %95 = vector.broadcast %cst_52 : f32 to vector<128x1xf32>
    %96 = arith.maximumf %70, %95 : vector<128x1xf32>
    %cst_53 = arith.constant 1.000000e+00 : f32
    %97 = vector.broadcast %cst_53 : f32 to vector<128x1xf32>
    %98 = arith.divf %97, %96 : vector<128x1xf32>
    %99 = vector.broadcast %98 : vector<128x1xf32> to vector<128x64xf32>
    %100 = arith.mulf %94, %99 : vector<128x64xf32>
    %cst_54 = arith.constant dense<0.000000e+00> : vector<8x64xf32>
    %101 = tpu.matmul %12, %100, %cst_54 {dimension_numbers = #tpu.dot_dimension_numbers<[1], [0], [0], [1], [0, 0, 1, 1], [], []>} : vector<8x128xf32>, vector<128x64xf32>, vector<8x64xf32> -> vector<8x64xf32>
    %cst_55 = arith.constant dense<0.000000e+00> : vector<128x1xf32>
    %102 = tpu.matmul %1, %90, %cst_55 {dimension_numbers = #tpu.dot_dimension_numbers<[1], [0], [0], [1], [0, 0, 1, 1], [], []>} : vector<128x128xf32>, vector<128x1xf32>, vector<128x1xf32> -> vector<128x1xf32>
    %103 = arith.addf %102, %90 : vector<128x1xf32>
    %cst_56 = arith.constant 0.000000e+00 : f32
    %104 = vector.broadcast %cst_56 : f32 to vector<128x1xf32>
    %105 = arith.cmpf ogt, %103, %104 : vector<128x1xf32>
    %106 = math.rsqrt %103 : vector<128x1xf32>
    %cst_57 = arith.constant 0.000000e+00 : f32
    %107 = vector.broadcast %cst_57 : f32 to vector<128x1xf32>
    %108 = arith.select %105, %106, %107 : vector<128x1xi1>, vector<128x1xf32>
    %109 = vector.broadcast %108 : vector<128x1xf32> to vector<128x64xf32>
    %110 = arith.mulf %109, %94 : vector<128x64xf32>
    %cst_58 = arith.constant dense<0.000000e+00> : vector<128x64xf32>
    %111 = tpu.matmul %1, %110, %cst_58 {dimension_numbers = #tpu.dot_dimension_numbers<[1], [0], [0], [1], [0, 0, 1, 1], [], []>} : vector<128x128xf32>, vector<128x64xf32>, vector<128x64xf32> -> vector<128x64xf32>
    %112 = vector.broadcast %90 : vector<128x1xf32> to vector<128x64xf32>
    %113 = arith.mulf %112, %110 : vector<128x64xf32>
    %114 = arith.addf %111, %113 : vector<128x64xf32>
    %115 = vector.broadcast %108 : vector<128x1xf32> to vector<128x64xf32>
    %116 = arith.mulf %115, %114 : vector<128x64xf32>
    %cst_59 = arith.constant dense<0.000000e+00> : vector<128x64xf32>
    %117 = tpu.matmul %116, %14, %cst_59 {dimension_numbers = #tpu.dot_dimension_numbers<[1], [0], [0], [1], [0, 0, 1, 1], [], []>} : vector<128x64xf32>, vector<64x64xf32>, vector<128x64xf32> -> vector<128x64xf32>
    %118 = vector.broadcast %19 : vector<1x64xf32> to vector<128x64xf32>
    %119 = arith.addf %117, %118 : vector<128x64xf32>
    %cst_60 = arith.constant 0.000000e+00 : f32
    %120 = vector.broadcast %cst_60 : f32 to vector<128x64xf32>
    %121 = arith.maximumf %119, %120 : vector<128x64xf32>
    %122 = arith.mulf %20, %20 : vector<1x64xf32>
    %123 = vector.shape_cast %122 : vector<1x64xf32> to vector<1x1x64xf32>
    %cst_61 = arith.constant dense<0.000000e+00> : vector<1xf32>
    %124 = vector.multi_reduction <add>, %123, %cst_61 [1, 2] : vector<1x1x64xf32> to vector<1xf32>
    %125 = vector.shape_cast %124 : vector<1xf32> to vector<1x1x1xf32>
    %126 = vector.extract %125[0, 0, 0] : f32 from vector<1x1x1xf32>
    %127 = math.rsqrt %126 : f32
    %128 = vector.broadcast %20 : vector<1x64xf32> to vector<128x64xf32>
    %129 = arith.mulf %121, %128 : vector<128x64xf32>
    %cst_62 = arith.constant dense<0.000000e+00> : vector<128xf32>
    %130 = vector.multi_reduction <add>, %129, %cst_62 [1] : vector<128x64xf32> to vector<128xf32>
    %131 = vector.shape_cast %130 : vector<128xf32> to vector<128x1xf32>
    %132 = vector.broadcast %127 : f32 to vector<128x1xf32>
    %133 = arith.mulf %131, %132 : vector<128x1xf32>
    %134 = math.tanh %133 : vector<128x1xf32>
    %cst_63 = arith.constant 0.000000e+00 : f32
    %135 = vector.broadcast %cst_63 : f32 to vector<128x1xf32>
    %136 = arith.cmpf ogt, %90, %135 : vector<128x1xf32>
    %cst_64 = arith.constant -1.000000e+30 : f32
    %137 = vector.broadcast %cst_64 : f32 to vector<128x1xf32>
    %138 = arith.select %136, %131, %137 : vector<128x1xi1>, vector<128x1xf32>
    %139 = vector.broadcast %138 : vector<128x1xf32> to vector<128x128xf32>
    %140 = arith.mulf %11, %139 : vector<128x128xf32>
    %cst_65 = arith.constant dense<0.000000e+00> : vector<128xf32>
    %141 = vector.multi_reduction <add>, %140, %cst_65 [0] : vector<128x128xf32> to vector<128xf32>
    %142 = vector.shape_cast %141 : vector<128xf32> to vector<1x128xf32>
    %cst_66 = arith.constant 8.000000e-01 : f32
    %143 = vector.broadcast %cst_66 : f32 to vector<128x1xf32>
    %144 = arith.mulf %143, %70 : vector<128x1xf32>
    %cst_67 = arith.constant 9.99999974E-5 : f32
    %145 = vector.broadcast %cst_67 : f32 to vector<128x1xf32>
    %146 = arith.subf %144, %145 : vector<128x1xf32>
    %147 = math.ceil %146 : vector<128x1xf32>
    %148 = vector.broadcast %142 : vector<1x128xf32> to vector<128x128xf32>
    %149 = vector.broadcast %138 : vector<128x1xf32> to vector<128x128xf32>
    %150 = arith.cmpf ogt, %148, %149 : vector<128x128xf32>
    %cst_68 = arith.constant 0.000000e+00 : f32
    %151 = vector.broadcast %cst_68 : f32 to vector<128x128xf32>
    %152 = arith.select %150, %7, %151 : vector<128x128xi1>, vector<128x128xf32>
    %153 = vector.broadcast %142 : vector<1x128xf32> to vector<128x128xf32>
    %154 = vector.broadcast %138 : vector<128x1xf32> to vector<128x128xf32>
    %155 = arith.cmpf oeq, %153, %154 : vector<128x128xf32>
    %cst_69 = arith.constant 0.000000e+00 : f32
    %156 = vector.broadcast %cst_69 : f32 to vector<128x128xf32>
    %157 = arith.select %155, %9, %156 : vector<128x128xi1>, vector<128x128xf32>
    %158 = arith.addf %152, %157 : vector<128x128xf32>
    %cst_70 = arith.constant dense<0.000000e+00> : vector<128xf32>
    %159 = vector.multi_reduction <add>, %158, %cst_70 [1] : vector<128x128xf32> to vector<128xf32>
    %160 = vector.shape_cast %159 : vector<128xf32> to vector<128x1xf32>
    %161 = arith.cmpf olt, %160, %147 : vector<128x1xf32>
    %cst_71 = arith.constant 0.000000e+00 : f32
    %162 = vector.broadcast %cst_71 : f32 to vector<128x1xf32>
    %163 = arith.cmpf ogt, %90, %162 : vector<128x1xf32>
    %164 = arith.andi %161, %163 : vector<128x1xi1>
    %cst_72 = arith.constant 1.000000e+00 : f32
    %cst_73 = arith.constant 0.000000e+00 : f32
    %165 = vector.broadcast %cst_72 : f32 to vector<128x1xf32>
    %166 = vector.broadcast %cst_73 : f32 to vector<128x1xf32>
    %167 = arith.select %164, %165, %166 : vector<128x1xi1>, vector<128x1xf32>
    %168 = vector.broadcast %134 : vector<128x1xf32> to vector<128x64xf32>
    %169 = arith.mulf %121, %168 : vector<128x64xf32>
    %170 = vector.broadcast %167 : vector<128x1xf32> to vector<128x64xf32>
    %171 = arith.mulf %169, %170 : vector<128x64xf32>
    %cst_74 = arith.constant 1.000000e+00 : f32
    %172 = vector.broadcast %cst_74 : f32 to vector<128x1xf32>
    %173 = arith.maximumf %147, %172 : vector<128x1xf32>
    %cst_75 = arith.constant 1.000000e+00 : f32
    %174 = vector.broadcast %cst_75 : f32 to vector<128x1xf32>
    %175 = arith.divf %174, %173 : vector<128x1xf32>
    %176 = vector.broadcast %175 : vector<128x1xf32> to vector<128x64xf32>
    %177 = arith.mulf %171, %176 : vector<128x64xf32>
    %cst_76 = arith.constant dense<0.000000e+00> : vector<8x64xf32>
    %178 = tpu.matmul %12, %177, %cst_76 {dimension_numbers = #tpu.dot_dimension_numbers<[1], [0], [0], [1], [0, 0, 1, 1], [], []>} : vector<8x128xf32>, vector<128x64xf32>, vector<8x64xf32> -> vector<8x64xf32>
    %cst_77 = arith.constant dense<0.000000e+00> : vector<8x64xf32>
    %179 = tpu.matmul %101, %15, %cst_77 {dimension_numbers = #tpu.dot_dimension_numbers<[1], [0], [0], [1], [0, 0, 1, 1], [], []>} : vector<8x64xf32>, vector<64x64xf32>, vector<8x64xf32> -> vector<8x64xf32>
    %cst_78 = arith.constant dense<0.000000e+00> : vector<8x64xf32>
    %180 = tpu.matmul %178, %16, %cst_78 {dimension_numbers = #tpu.dot_dimension_numbers<[1], [0], [0], [1], [0, 0, 1, 1], [], []>} : vector<8x64xf32>, vector<64x64xf32>, vector<8x64xf32> -> vector<8x64xf32>
    %181 = arith.addf %179, %180 : vector<8x64xf32>
    %182 = vector.broadcast %21 : vector<1x64xf32> to vector<8x64xf32>
    %183 = arith.addf %181, %182 : vector<8x64xf32>
    %cst_79 = arith.constant 0.000000e+00 : f32
    %184 = vector.broadcast %cst_79 : f32 to vector<8x64xf32>
    %185 = arith.maximumf %183, %184 : vector<8x64xf32>
    %cst_80 = arith.constant dense<0.000000e+00> : vector<8x128xf32>
    %186 = tpu.matmul %185, %22, %cst_80 {dimension_numbers = #tpu.dot_dimension_numbers<[1], [0], [0], [1], [0, 0, 1, 1], [], []>} : vector<8x64xf32>, vector<64x128xf32>, vector<8x128xf32> -> vector<8x128xf32>
    %187 = vector.broadcast %23 : vector<1x128xf32> to vector<8x128xf32>
    %188 = arith.addf %186, %187 : vector<8x128xf32>
    %cst_81 = arith.constant dense<0xFF800000> : vector<8xf32>
    %189 = vector.multi_reduction <maximumf>, %188, %cst_81 [1] : vector<8x128xf32> to vector<8xf32>
    %190 = vector.shape_cast %189 : vector<8xf32> to vector<8x1xf32>
    %191 = vector.broadcast %190 : vector<8x1xf32> to vector<8x128xf32>
    %192 = arith.subf %188, %191 : vector<8x128xf32>
    %193 = math.exp %192 : vector<8x128xf32>
    %cst_82 = arith.constant dense<0.000000e+00> : vector<8xf32>
    %194 = vector.multi_reduction <add>, %193, %cst_82 [1] : vector<8x128xf32> to vector<8xf32>
    %195 = vector.shape_cast %194 : vector<8xf32> to vector<8x1xf32>
    %196 = math.log %195 : vector<8x1xf32>
    %197 = arith.addf %196, %190 : vector<8x1xf32>
    %198 = vector.broadcast %197 : vector<8x1xf32> to vector<8x128xf32>
    %199 = arith.subf %188, %198 : vector<8x128xf32>
    %c0_83 = arith.constant 0 : index
    %c0_84 = arith.constant 0 : index
    %c0_85 = arith.constant 0 : index
    %200 = vector.load %arg9[%c0_83, %c0_84, %c0_85] : memref<1x8x128xf32, #tpu.memory_space<vmem>>, vector<1x8x128xf32>
    %201 = vector.shape_cast %200 : vector<1x8x128xf32> to vector<8x128xf32>
    %202 = vector.shape_cast %199 : vector<8x128xf32> to vector<1x8x128xf32>
    tpu.vector_store %arg9[%c0_83, %c0_84, %c0_85], %202 {strides = array<i32>} : memref<1x8x128xf32, #tpu.memory_space<vmem>>, vector<1x8x128xf32>,
    return
  }
  func.func @transform_0(%arg0: i32) -> (i32, i32, i32) {
    %c0_i32 = arith.constant 0 : i32
    %c0_i32_0 = arith.constant 0 : i32
    %c0_i32_1 = arith.constant 0 : i32
    return %arg0, %c0_i32, %c0_i32_0 : i32, i32, i32
  }
  func.func @transform_1(%arg0: i32) -> (i32, i32, i32) {
    %c0_i32 = arith.constant 0 : i32
    %c0_i32_0 = arith.constant 0 : i32
    %c0_i32_1 = arith.constant 0 : i32
    return %arg0, %c0_i32, %c0_i32_0 : i32, i32, i32
  }
  func.func @transform_2(%arg0: i32) -> (i32, i32, i32) {
    %c0_i32 = arith.constant 0 : i32
    %c0_i32_0 = arith.constant 0 : i32
    %c0_i32_1 = arith.constant 0 : i32
    return %arg0, %c0_i32, %c0_i32_0 : i32, i32, i32
  }
  func.func @transform_3(%arg0: i32) -> (i32, i32, i32) {
    %c0_i32 = arith.constant 0 : i32
    %c0_i32_0 = arith.constant 0 : i32
    %c0_i32_1 = arith.constant 0 : i32
    %c0_i32_2 = arith.constant 0 : i32
    return %c0_i32, %c0_i32_0, %c0_i32_1 : i32, i32, i32
  }
  func.func @transform_4(%arg0: i32) -> (i32, i32) {
    %c0_i32 = arith.constant 0 : i32
    %c0_i32_0 = arith.constant 0 : i32
    %c0_i32_1 = arith.constant 0 : i32
    return %c0_i32, %c0_i32_0 : i32, i32
  }
  func.func @transform_5(%arg0: i32) -> (i32, i32) {
    %c0_i32 = arith.constant 0 : i32
    %c0_i32_0 = arith.constant 0 : i32
    %c0_i32_1 = arith.constant 0 : i32
    return %c0_i32, %c0_i32_0 : i32, i32
  }
  func.func @transform_6(%arg0: i32) -> (i32, i32) {
    %c0_i32 = arith.constant 0 : i32
    %c0_i32_0 = arith.constant 0 : i32
    %c0_i32_1 = arith.constant 0 : i32
    return %c0_i32, %c0_i32_0 : i32, i32
  }
  func.func @transform_7(%arg0: i32) -> (i32, i32) {
    %c0_i32 = arith.constant 0 : i32
    %c0_i32_0 = arith.constant 0 : i32
    %c0_i32_1 = arith.constant 0 : i32
    return %c0_i32, %c0_i32_0 : i32, i32
  }
  func.func @transform_8(%arg0: i32) -> (i32, i32, i32) {
    %c0_i32 = arith.constant 0 : i32
    %c0_i32_0 = arith.constant 0 : i32
    %c0_i32_1 = arith.constant 0 : i32
    return %arg0, %c0_i32, %c0_i32_0 : i32, i32, i32
  }
}

</mosaic_0001>

<bundles_post_ra>
// kernel: tpu_custom_call.1
= control target key start
LH: loop header
LB: loop body
LE: loop exit
PB: predicated region body
PF: predicated region fallthrough
CT: control target
= control target key end

     0   :  { %13 = vsyncpa [#allocation3], 0  ;;  %s8290_s0 = inlined_call_operand.vmem [shape: f32[2,128,128], index: 0, kind: input, shape index: {}]   ;;  %s8291_s1 = inlined_call_operand.vmem [shape: f32[2,128,8], index: 1, kind: input, shape index: {}]   ;;  %s8292_s2 = inlined_call_operand.vmem [shape: f32[2,128,1], index: 2, kind: input, shape index: {}]   ;;  %s8293_s3 = inlined_call_operand.vmem [shape: f32[3,128,128], index: 3, kind: input, shape index: {}]   ;;  %s8294_s4 = inlined_call_operand.vmem [shape: f32[8,128], index: 4, kind: input, shape index: {}]   ;;  %s8295_s5 = inlined_call_operand.vmem [shape: f32[200,64], index: 5, kind: input, shape index: {}]   ;;  %s8296_s6 = inlined_call_operand.vmem [shape: f32[5,64], index: 6, kind: input, shape index: {}]   ;;  %s8297_s7 = inlined_call_operand.vmem [shape: f32[65,128], index: 7, kind: input, shape index: {}]   ;;  %s8298_s8 = inlined_call_operand.hbm [shape: f32[2,8,128], index: 8, kind: output, shape index: {}]  }
   0x1   :  { %15 = vsyncpa [#allocation3 + $0x1], 0  ;;  %s4579_s27 = smov 0   ;;  %s4581_s28 = smov 0  }
   0x2   :  { %s4583_s29 = smov 0   ;;  %s4585_s30 = smov 0  }
   0x3 LB: > { %s4600_s9 = sadd.s32 4294967295, %s4529_s30   ;;  %s3898_s10 = sadd.s32 4294967294, %s4529_s30   ;;  %s4529_s30 = sphi %s4585_s30, %s8976_s30   ;;  %s4525_s29 = sphi %s4583_s29, %s8975_s29   ;;  %s4521_s28 = sphi %s4581_s28, %s8974_s28   ;;  %s4517_s27 = sphi %s4579_s27, %s8973_s27  }
   0x4   : > { %s4604_s11 = sadd.s32 1, %s4529_s30   ;;  %s211_s12 = sadd.s32 1, %s4525_s29 }
   0x5   : > { %s208_s13 = ssub.s32 %s4529_s30, %s4604_s11  ;;  %p221_p0 = scmp.ne.s32.totalorder %s4525_s29, %s4521_s28 }
   0x6   : > { %p209_p1 = scmp.eq.s32.totalorder %s208_s13, 0  ;;  %p222_p2 = scmp.eq.s32.totalorder %s4600_s9, 1 }
   0x7   : > { %p227_p3 = scmp.ne.s32.totalorder %s4521_s28, %s4517_s27  ;;  %p228_p4 = scmp.eq.s32.totalorder %s3898_s10, 1 }
   0x8   : > { %s4615_s14 = scalar_select %p209_p1, %s4525_s29, %s211_s12  }
   0x9   : > { %p4617_p5 = por %p222_p2, %p221_p0  ;;  %p4621_p6 = por %p228_p4, %p227_p3 }
   0xa   : > { %p3901_p7 = scmp.ge.s32.totalorder %s4529_s30, 1  ;;  %p285_p8 = scmp.lt.s32.totalorder %s4529_s30, 3 }
   0xc   : > { %p286_p9 = pnand %p3901_p7, %p285_p8 }
   0xe   : > { %289 = sbr.rel (%p286_p9) target bundleno = 3301 (0xce5), region = 52 }
  0x13   : > { %p329_p10 = scmp.lt.s32.totalorder %s4600_s9, 1  ;;  %v4531_v41 = vmov 0   ;;  %s4025_s25 = sshll.u32 %s4600_s9, 3 }
  0x14   : > { %4081 = vset.pattern.permute.xlu2 %v4531_v41  ;;  %4082 = vset.pattern.permute.xlu1 %v4531_v41 }
  0x15   : > { %s330_s17 = scalar_select %p329_p10, %s4600_s9, 1  ;;  %4083 = vset.pattern.permute.xlu0 %v4531_v41 }
  0x17   : > { %s4629_s18 = sshll.u32 %s330_s17, 7 }
  0x18   : > { %s4635_s21 = scalar_lea.vmem %s8292_s2, %s4629_s18  ;;  %s4712_s24 = scalar_lea.vmem %s8290_s0, %s4629_s18 }
  0x19   : > { %v4638_v0 = vld [vmem:[%s4635_s21 + $0x78] sm:$0xff]  ;;  %v4641_v1 = vld [vmem:[%s4635_s21 + $0x70] sm:$0xff]  ;;  %v4646_v2 = vld [vmem:[%s4635_s21 + $0x68] sm:$0xff]  ;;  %s5022_s10 = scalar_lea.vmem %s8291_s1, %s4629_s18 }
  0x1a   : > { %547 = vmatpush.msra.mxu1 %v4638_v0  ;;  %482 = vmatpush.msra.mxu0 %v4638_v0  ;;  %v4651_v3 = vld [vmem:[%s4635_s21 + $0x60] sm:$0xff]  ;;  %v4656_v4 = vld [vmem:[%s4635_s21 + $0x58] sm:$0xff]  ;;  %v4661_v5 = vld [vmem:[%s4635_s21 + $0x50] sm:$0xff] }
  0x1b   : > { %v4666_v6 = vld [vmem:[%s4635_s21 + $0x48] sm:$0xff]  ;;  %v4671_v7 = vld [vmem:[%s4635_s21 + $0x40] sm:$0xff]  ;;  %v4676_v8 = vld [vmem:[%s4635_s21 + $0x38] sm:$0xff] }
  0x1c   : > { %548 = vmatpush.msra.mxu1 %v4641_v1  ;;  %483 = vmatpush.msra.mxu0 %v4641_v1  ;;  %v4681_v9 = vld [vmem:[%s4635_s21 + $0x30] sm:$0xff]  ;;  %v4686_v10 = vld [vmem:[%s4635_s21 + $0x28] sm:$0xff]  ;;  %v4691_v11 = vld [vmem:[%s4635_s21 + $0x20] sm:$0xff] }
  0x1d   : > { %v4696_v12 = vld [vmem:[%s4635_s21 + $0x18] sm:$0xff]  ;;  %v4701_v13 = vld [vmem:[%s4635_s21 + $0x10] sm:$0xff]  ;;  %v4706_v14 = vld [vmem:[%s4635_s21 + $0x8] sm:$0xff] }
  0x1e   : > { %549 = vmatpush.msra.mxu1 %v4646_v2  ;;  %484 = vmatpush.msra.mxu0 %v4646_v2  ;;  %v4717_v15 = vld [vmem:[%s4635_s21] sm:$0xff]  ;;  %v4728_v17 = vld [vmem:[%s4712_s24 + $0x8] sm:$0xff]  ;;  %v4732_v18 = vld [vmem:[%s4712_s24 + $0x10] sm:$0xff] }
  0x1f   : > { %v4721_v16 = vld [vmem:[%s4712_s24] sm:$0xff]  ;;  %v4736_v19 = vld [vmem:[%s4712_s24 + $0x18] sm:$0xff]  ;;  %v4744_v21 = vld [vmem:[%s4712_s24 + $0x28] sm:$0xff] }
  0x20   : > { %550 = vmatpush.msra.mxu1 %v4651_v3  ;;  %485 = vmatpush.msra.mxu0 %v4651_v3  ;;  %v4740_v20 = vld [vmem:[%s4712_s24 + $0x20] sm:$0xff]  ;;  %v4748_v22 = vld [vmem:[%s4712_s24 + $0x30] sm:$0xff]  ;;  %v4752_v23 = vld [vmem:[%s4712_s24 + $0x38] sm:$0xff] }
  0x21   : > { %v4756_v24 = vld [vmem:[%s4712_s24 + $0x40] sm:$0xff]  ;;  %v4760_v25 = vld [vmem:[%s4712_s24 + $0x48] sm:$0xff]  ;;  %v4764_v26 = vld [vmem:[%s4712_s24 + $0x50] sm:$0xff] }
  0x22   : > { %551 = vmatpush.msra.mxu1 %v4656_v4  ;;  %486 = vmatpush.msra.mxu0 %v4656_v4  ;;  %v4768_v27 = vld [vmem:[%s4712_s24 + $0x58] sm:$0xff]  ;;  %v4772_v28 = vld [vmem:[%s4712_s24 + $0x60] sm:$0xff]  ;;  %v4776_v29 = vld [vmem:[%s4712_s24 + $0x68] sm:$0xff] }
  0x23   : > { %8500 = vst [vmem:[#allocation5_spill] sm:$0xff] %v4776_v29  ;;  %v4780_v30 = vld [vmem:[%s4712_s24 + $0x70] sm:$0xff]  ;;  %v4784_v31 = vld [vmem:[%s4712_s24 + $0x78] sm:$0xff] }
  0x24   : > { %552 = vmatpush.msra.mxu1 %v4661_v5  ;;  %487 = vmatpush.msra.mxu0 %v4661_v5  ;;  %8501 = vst [vmem:[#allocation6_spill] sm:$0xff] %v4780_v30 }
  0x25   : > { %8502 = vst [vmem:[#allocation7_spill] sm:$0xff] %v4784_v31 }
  0x26   : > { %553 = vmatpush.msra.mxu1 %v4666_v6  ;;  %488 = vmatpush.msra.mxu0 %v4666_v6 }
  0x28   : > { %554 = vmatpush.msra.mxu1 %v4671_v7  ;;  %489 = vmatpush.msra.mxu0 %v4671_v7 }
  0x2a   : > { %555 = vmatpush.msra.mxu1 %v4676_v8  ;;  %490 = vmatpush.msra.mxu0 %v4676_v8 }
  0x2c   : > { %556 = vmatpush.msra.mxu1 %v4681_v9  ;;  %491 = vmatpush.msra.mxu0 %v4681_v9 }
  0x2e   : > { %557 = vmatpush.msra.mxu1 %v4686_v10  ;;  %492 = vmatpush.msra.mxu0 %v4686_v10 }
  0x30   : > { %558 = vmatpush.msra.mxu1 %v4691_v11  ;;  %493 = vmatpush.msra.mxu0 %v4691_v11 }
  0x32   : > { %559 = vmatpush.msra.mxu1 %v4696_v12  ;;  %494 = vmatpush.msra.mxu0 %v4696_v12 }
  0x34   : > { %560 = vmatpush.msra.mxu1 %v4701_v13  ;;  %495 = vmatpush.msra.mxu0 %v4701_v13 }
  0x36   : > { %561 = vmatpush.msra.mxu1 %v4706_v14  ;;  %496 = vmatpush.msra.mxu0 %v4706_v14 }
  0x38   : > { %562 = vmatpush.msra.mxu1 %v4717_v15  ;;  %497 = vmatpush.msra.mxu0 %v4717_v15 }
  0x39   : > { %563 = vmatmul.f32.vlgmr.msra.gmra.mxu1 %v4721_v16 }
  0x41   : > { %566 = vmatmul.f32.gmra.mxu1 %v4728_v17 }
  0x49   : > { %569 = vmatmul.f32.gmra.mxu1 %v4732_v18 }
  0x51   : > { %572 = vmatmul.f32.gmra.mxu1 %v4736_v19 }
  0x59   : > { %575 = vmatmul.f32.gmra.mxu1 %v4740_v20 }
  0x61   : > { %578 = vmatmul.f32.gmra.mxu1 %v4744_v21 }
  0x69   : > { %581 = vmatmul.f32.gmra.mxu1 %v4748_v22 }
  0x71   : > { %584 = vmatmul.f32.gmra.mxu1 %v4752_v23 }
  0x79   : > { %587 = vmatmul.f32.gmra.mxu1 %v4756_v24 }
  0x81   : > { %590 = vmatmul.f32.gmra.mxu1 %v4760_v25 }
  0x89   : > { %593 = vmatmul.f32.gmra.mxu1 %v4764_v26 }
  0x91   : > { %596 = vmatmul.f32.gmra.mxu1 %v4768_v27 }
  0x99   : > { %599 = vmatmul.f32.gmra.mxu1 %v4772_v28 }
  0xa1   : > { %602 = vmatmul.f32.gmra.mxu1 %v4776_v29 }
  0xa9   : > { %605 = vmatmul.f32.gmra.mxu1 %v4780_v30 }
  0xb1   : > { %608 = vmatmul.f32.gmra.mxu1 %v4784_v31 }
  0xb6   : > { %v4787_v32 = vpop.f32.mrf.mxu1 }
  0xbe   : > { %v567_v33 = vpop.f32.mrf.mxu1 }
  0xbf   : > { %v4810_v53 = vadd.f32 %v567_v33, %v4706_v14 }
  0xc6   : > { %v4789_v34 = vpop.f32.mrf.mxu1 }
  0xce   : > { %v4791_v35 = vpop.f32.mrf.mxu1 }
  0xd6   : > { %v576_v36 = vpop.f32.mrf.mxu1 }
  0xd7   : > { %v4803_v46 = vadd.f32 %v576_v36, %v4691_v11 }
  0xde   : > { %v579_v37 = vpop.f32.mrf.mxu1 }
  0xdf   : > { %v4829_v41 = vadd.f32 %v579_v37, %v4686_v10 }
  0xe6   : > { %v4793_v38 = vpop.f32.mrf.mxu1 }
  0xe7   : > { %v4886_v30 = vadd.f32 %v4793_v38, %v4681_v9 }
  0xee   : > { %v585_v39 = vpop.f32.mrf.mxu1 }
  0xef   : > { %v4798_v44 = vadd.f32 %v585_v39, %v4676_v8 }
  0xf1   : > { %vm704_vm10 = vweird.f32 %v4798_v44 }
  0xf6   : > { %v588_v40 = vpop.f32.mrf.mxu1 }
  0xf7   : > { %v4817_v57 = vadd.f32 %v588_v40, %v4671_v7 }
  0xfe   : > { %v4795_v42 = vpop.f32.mrf.mxu1 }
 0x106   : > { %v594_v43 = vpop.f32.mrf.mxu1 }
 0x107   : > { %v595_v45 = vadd.f32 %v594_v43, %v4661_v5 }
 0x109   : > { %4170 = vrsqrt.f32 %v595_v45  ;;  %vm734_vm1 = vweird.f32 %v595_v45  ;;  %vm622_vm3 = vcmp.gt.f32.partialorder %v595_v45, 0.0 }
 0x10a   : > { %4172 = vrsqrt.f32 %v4798_v44 }
 0x10b   : > { %4174 = vrsqrt.f32 %v4803_v46 }
 0x10e   : > { %v597_v47 = vpop.f32.mrf.mxu1 }
 0x10f   : > { %v4171_v48 = vpop.eup %4170  ;;  %v598_v49 = vadd.f32 %v597_v47, %v4656_v4 }
 0x110   : > { %v729_v50 = vmul.f32 %v4171_v48, %v595_v45  ;;  %v4807_v51 = vpop.eup %4172  ;;  %vm735_vm0 = vweird.f32 %v4171_v48 }
 0x111   : > { %4176 = vrsqrt.f32 %v598_v49  ;;  %v699_v54 = vmul.f32 %v4807_v51, %v4798_v44  ;;  %v4814_v56 = vpop.eup %4174  ;;  %vm736_vm2 = vmor %vm734_vm1, %vm735_vm0  ;;  %vm744_vm5 = vweird.f32 %v598_v49  ;;  %vm623_vm7 = vcmp.gt.f32.partialorder %v598_v49, 0.0 }
 0x112   : > { %v730_v52 = vmul.f32 %v4171_v48, %v729_v50  ;;  %4178 = vrsqrt.f32 %v4810_v53  ;;  %v669_v36 = vmul.f32 %v4814_v56, %v4803_v46  ;;  %vm705_vm8 = vweird.f32 %v4807_v51 }
 0x113   : > { %v700_v33 = vmul.f32 %v4807_v51, %v699_v54  ;;  %vm4863_vm11 = vmor %vm704_vm10, %vm705_vm8  ;;  %vm675_vm14 = vweird.f32 %v4814_v56  ;;  %vm619_vm0 = vcmp.gt.f32.partialorder %v4798_v44, 0.0  ;;  %vm674_vm1 = vweird.f32 %v4803_v46 }
 0x114   : > { %v731_v55 = vmul.f32 0.5, %v730_v52  ;;  %v670_v54 = vmul.f32 %v4814_v56, %v669_v36  ;;  %v4844_v36 = vadd.f32 %v4789_v34, %v4701_v13  ;;  %vm714_vm10 = vweird.f32 %v4817_v57 }
 0x115   : > { %v701_v50 = vmul.f32 0.5, %v700_v33 }
 0x116   : > { %v600_v58 = vpop.f32.mrf.mxu1  ;;  %v732_v59 = vsub.f32 1.5, %v731_v55  ;;  %v671_v33 = vmul.f32 0.5, %v670_v54 }
 0x117   : > { %v4177_v60 = vpop.eup %4176  ;;  %v4821_v61 = vadd.f32 %v600_v58, %v4651_v3 }
 0x118   : > { %v739_v62 = vmul.f32 %v4177_v60, %v598_v49  ;;  %v733_v63 = vmul.f32 %v4171_v48, %v732_v59  ;;  %v4831_v52 = vpop.eup %4178  ;;  %vm745_vm4 = vweird.f32 %v4177_v60  ;;  %v672_v34 = vsub.f32 1.5, %v671_v33 }
 0x119   : > { %4180 = vrsqrt.f32 %v4821_v61  ;;  %vm746_vm6 = vmor %vm744_vm5, %vm745_vm4  ;;  %vm754_vm12 = vweird.f32 %v4821_v61  ;;  %vm624_vm15 = vcmp.gt.f32.partialorder %v4821_v61, 0.0 }
 0x11a   : > { %4182 = vrsqrt.f32 %v4817_v57  ;;  %v737_v39 = vsel %vm736_vm2, %v4171_v48, %v733_v63  ;;  %v740_v40 = vmul.f32 %v4177_v60, %v739_v62  ;;  %v702_v63 = vsub.f32 1.5, %v701_v50 }
 0x11b   : > { %v798_v43 = vsel %vm622_vm3, %v737_v39, 0.0  ;;  %4184 = vrsqrt.f32 %v4829_v41  ;;  %v673_v31 = vmul.f32 %v4814_v56, %v672_v34  ;;  %vm4891_vm3 = vmor %vm674_vm1, %vm675_vm14  ;;  %vm613_vm1 = vcmp.gt.f32.partialorder %v4810_v53, 0.0 }
 0x11c   : > { %856 = vperm.xlu2 %4081, %v798_v43   ;;  %v741_v47 = vmul.f32 0.5, %v740_v40  ;;  %v639_v43 = vmul.f32 %v4831_v52, %v4810_v53 }
 0x11d   : > { %v677_v38 = vsel %vm4891_vm3, %v4814_v56, %v673_v31  ;;  %vm620_vm3 = vcmp.gt.f32.partialorder %v4817_v57, 0.0 }
 0x11e   : > { %v603_v55 = vpop.f32.mrf.mxu1  ;;  %v742_v58 = vsub.f32 1.5, %v741_v47 }
 0x11f   : > { %v4181_v59 = vpop.eup %4180  ;;  %v4836_v45 = vadd.f32 %v603_v55, %v4646_v2 }
 0x120   : > { %v4838_v48 = vpop.eup %4182  ;;  %v749_v37 = vmul.f32 %v4181_v59, %v4821_v61  ;;  %v743_v62 = vmul.f32 %v4177_v60, %v742_v58  ;;  %v703_v58 = vmul.f32 %v4807_v51, %v702_v63  ;;  %vm755_vm9 = vweird.f32 %v4181_v59 }
 0x121   : > { %4186 = vrsqrt.f32 %v4836_v45  ;;  %v709_v47 = vmul.f32 %v4838_v48, %v4817_v57  ;;  %v4852_v54 = vpop.eup %4184  ;;  %vm756_vm13 = vmor %vm754_vm12, %vm755_vm9  ;;  %vm764_vm4 = vweird.f32 %v4836_v45  ;;  %vm715_vm8 = vweird.f32 %v4838_v48 }
 0x122   : > { %v747_v39 = vsel %vm746_vm6, %v4177_v60, %v743_v62  ;;  %v750_v40 = vmul.f32 %v4181_v59, %v749_v37  ;;  %4188 = vrsqrt.f32 %v4844_v36  ;;  %v4858_v62 = vadd.f32 %v4795_v42, %v4666_v6  ;;  %vm4926_vm12 = vmor %vm714_vm10, %vm715_vm8 }
 0x123   : > { %v799_v55 = vsel %vm623_vm7, %v747_v39, 0.0  ;;  %v710_v33 = vmul.f32 %v4838_v48, %v709_v47  ;;  %v707_v42 = vsel %vm4863_vm11, %v4807_v51, %v703_v58  ;;  %vm616_vm6 = vcmp.gt.f32.partialorder %v4803_v46, 0.0 }
 0x124   : > { %861 = vperm.xlu2 %4081, %v799_v55   ;;  %v751_v50 = vmul.f32 0.5, %v750_v40  ;;  %v640_v40 = vmul.f32 %v4831_v52, %v639_v43  ;;  %v795_v51 = vsel %vm619_vm0, %v707_v42, 0.0  ;;  %vm625_vm7 = vcmp.gt.f32.partialorder %v4836_v45, 0.0 }
 0x125   : > { %v711_v58 = vmul.f32 0.5, %v710_v33  ;;  %vm645_vm9 = vweird.f32 %v4831_v52  ;;  %v4919_v46 = vadd.f32 %v4791_v35, %v4696_v12  ;;  %v4957_v57 = vadd.f32 %v4787_v32, %v4717_v15 }
 0x126   : > { %v606_v49 = vpop.f32.mrf.mxu1  ;;  %v752_v60 = vsub.f32 1.5, %v751_v50  ;;  %v641_v61 = vmul.f32 0.5, %v640_v40 }
 0x127   : > { %v4187_v37 = vpop.eup %4186  ;;  %v4861_v39 = vadd.f32 %v606_v49, %v4641_v1  ;;  %v679_v49 = vmul.f32 %v4852_v54, %v4829_v41  ;;  %v712_v42 = vsub.f32 1.5, %v711_v58 }
 0x128   : > { %v759_v55 = vmul.f32 %v4187_v37, %v4836_v45  ;;  %v753_v50 = vmul.f32 %v4181_v59, %v752_v60  ;;  %v4882_v63 = vpop.eup %4188  ;;  %vm765_vm2 = vweird.f32 %v4187_v37  ;;  %v642_v31 = vsub.f32 1.5, %v641_v61 }
 0x129   : > { %4190 = vrsqrt.f32 %v4861_v39  ;;  %v680_v40 = vmul.f32 %v4852_v54, %v679_v49  ;;  %vm766_vm5 = vmor %vm764_vm4, %vm765_vm2  ;;  %v792_v49 = vsel %vm616_vm6, %v677_v38, 0.0  ;;  %vm774_vm14 = vweird.f32 %v4861_v39 }
 0x12a   : > { %v757_v43 = vsel %vm756_vm13, %v4181_v59, %v753_v50  ;;  %v760_v47 = vmul.f32 %v4187_v37, %v759_v55  ;;  %4192 = vrsqrt.f32 %v4858_v62  ;;  %v643_v45 = vmul.f32 %v4831_v52, %v642_v31 }
 0x12b   : > { %v800_v60 = vsel %vm624_vm15, %v757_v43, 0.0  ;;  %4194 = vrsqrt.f32 %v4886_v30  ;;  %vm644_vm13 = vweird.f32 %v4810_v53  ;;  %vm626_vm2 = vcmp.gt.f32.partialorder %v4861_v39, 0.0 }
 0x12c   : > { %866 = vperm.xlu1 %4082, %v800_v60   ;;  %841 = vperm.xlu2 %4081, %v795_v51   ;;  %v761_v34 = vmul.f32 0.5, %v760_v47  ;;  %v649_v51 = vmul.f32 %v4882_v63, %v4844_v36  ;;  %vm4938_vm15 = vmor %vm644_vm13, %vm645_vm9  ;;  %vm685_vm4 = vweird.f32 %v4852_v54 }
 0x12e   : > { %v609_v59 = vpop.f32.mrf.mxu1  ;;  %v762_v44 = vsub.f32 1.5, %v761_v34 }
 0x12f   : > { %v4191_v33 = vpop.eup %4190  ;;  %v4896_v50 = vadd.f32 %v609_v59, %v4638_v0  ;;  %v713_v59 = vmul.f32 %v4838_v48, %v712_v42 }
 0x130   : > { %v769_v43 = vmul.f32 %v4191_v33, %v4861_v39  ;;  %v763_v47 = vmul.f32 %v4187_v37, %v762_v44  ;;  %v4905_v60 = vpop.eup %4192  ;;  %v681_v44 = vmul.f32 0.5, %v680_v40  ;;  %vm775_vm11 = vweird.f32 %v4191_v33 }
 0x131   : > { %4196 = vrsqrt.f32 %v4896_v50  ;;  %v719_v55 = vmul.f32 %v4905_v60, %v4858_v62  ;;  %v4924_v61 = vpop.eup %4194  ;;  %v717_v35 = vsel %vm4926_vm12, %v4838_v48, %v713_v59  ;;  %vm776_vm0 = vmor %vm774_vm14, %vm775_vm11  ;;  %v647_v48 = vsel %vm4938_vm15, %v4831_v52, %v643_v45 }
 0x132   : > { %v767_v56 = vsel %vm766_vm5, %v4187_v37, %v763_v47  ;;  %v770_v58 = vmul.f32 %v4191_v33, %v769_v43  ;;  %v650_v37 = vmul.f32 %v4882_v63, %v649_v51  ;;  %v682_v43 = vsub.f32 1.5, %v681_v44 }
 0x133   : > { %v801_v34 = vsel %vm625_vm7, %v767_v56, 0.0  ;;  %v720_v51 = vmul.f32 %v4905_v60, %v719_v55  ;;  %4198 = vrsqrt.f32 %v4919_v46  ;;  %v796_v59 = vsel %vm620_vm3, %v717_v35, 0.0 }
 0x134   : > { %871 = vperm.xlu1 %4082, %v801_v34   ;;  %826 = vperm.xlu2 %4081, %v792_v49   ;;  %v771_v29 = vmul.f32 0.5, %v770_v58  ;;  %v651_v56 = vmul.f32 0.5, %v650_v37  ;;  %v683_v44 = vmul.f32 %v4852_v54, %v682_v43  ;;  %v689_v53 = vmul.f32 %v4924_v61, %v4886_v30 }
 0x135   : > { %v789_v55 = vsel %vm613_vm1, %v647_v48, 0.0  ;;  %v721_v45 = vmul.f32 0.5, %v720_v51  ;;  %vm684_vm5 = vweird.f32 %v4829_v41  ;;  %vm784_vm8 = vweird.f32 %v4896_v50 }
 0x136   : > { %v772_v38 = vsub.f32 1.5, %v771_v29  ;;  %vm4959_vm7 = vmor %vm684_vm5, %vm685_vm4  ;;  %v652_v42 = vsub.f32 1.5, %v651_v56  ;;  %4200 = vrsqrt.f32 %v4957_v57  ;;  %vm627_vm10 = vcmp.gt.f32.partialorder %v4896_v50, 0.0 }
 0x137   : > { %v4197_v40 = vpop.eup %4196  ;;  %v722_v43 = vsub.f32 1.5, %v721_v45  ;;  %vm617_vm11 = vcmp.gt.f32.partialorder %v4829_v41, 0.0  ;;  %vm655_vm12 = vweird.f32 %v4882_v63  ;;  %vm725_vm13 = vweird.f32 %v4905_v60 }
 0x138   : > { %v779_v47 = vmul.f32 %v4197_v40, %v4896_v50  ;;  %v773_v31 = vmul.f32 %v4191_v33, %v772_v38  ;;  %vm785_vm6 = vweird.f32 %v4197_v40  ;;  %v687_v38 = vsel %vm4959_vm7, %v4852_v54, %v683_v44 }
 0x139   : > { %v4199_v37 = vpop.eup %4198  ;;  %vm786_vm9 = vmor %vm784_vm8, %vm785_vm6  ;;  %v793_v51 = vsel %vm617_vm11, %v687_v38, 0.0  ;;  %v723_v54 = vmul.f32 %v4905_v60, %v722_v43  ;;  %v653_v48 = vmul.f32 %v4882_v63, %v652_v42  ;;  %vm654_vm14 = vweird.f32 %v4844_v36  ;;  %v370_v42 = vld [vmem:[%s5022_s10 + $0x50] sm:$0xff]  ;;  %v369_v43 = vld [vmem:[%s5022_s10 + $0x48] sm:$0xff] }
 0x13a   : > { %v777_v49 = vsel %vm776_vm0, %v4191_v33, %v773_v31  ;;  %v780_v58 = vmul.f32 %v4197_v40, %v779_v47  ;;  %v690_v47 = vmul.f32 %v4924_v61, %v689_v53  ;;  %v659_v31 = vmul.f32 %v4199_v37, %v4919_v46  ;;  %vm656_vm0 = vmor %vm654_vm14, %vm655_vm12  ;;  %v371_v33 = vld [vmem:[%s5022_s10 + $0x58] sm:$0xff] }
 0x13b   : > { %v802_v34 = vsel %vm626_vm2, %v777_v49, 0.0  ;;  %vm724_vm15 = vweird.f32 %v4858_v62  ;;  %vm621_vm2 = vcmp.gt.f32.partialorder %v4858_v62, 0.0  ;;  %vm614_vm3 = vcmp.gt.f32.partialorder %v4844_v36, 0.0 }
 0x13c   : > { %876 = vperm.xlu0 %4083, %v802_v34   ;;  %846 = vperm.xlu1 %4082, %v796_v59   ;;  %v781_v52 = vmul.f32 0.5, %v780_v58  ;;  %v691_v56 = vmul.f32 0.5, %v690_v47  ;;  %vm726_vm1 = vmor %vm724_vm15, %vm725_vm13  ;;  %v4201_v41 = vpop.eup %4200  ;;  %v660_v58 = vmul.f32 %v4199_v37, %v659_v31  ;;  %vm695_vm4 = vweird.f32 %v4924_v61 }
 0x13d   : > { %811 = vperm.xlu2 %4081, %v789_v55   ;;  %v727_v50 = vsel %vm726_vm1, %v4905_v60, %v723_v54  ;;  %vm694_vm5 = vweird.f32 %v4886_v30  ;;  %vm618_vm7 = vcmp.gt.f32.partialorder %v4886_v30, 0.0  ;;  %vm665_vm8 = vweird.f32 %v4199_v37 }
 0x13e   : > { %v782_v39 = vsub.f32 1.5, %v781_v52  ;;  %v692_v49 = vsub.f32 1.5, %v691_v56  ;;  %v797_v34 = vsel %vm621_vm2, %v727_v50, 0.0  ;;  %v661_v53 = vmul.f32 0.5, %v660_v58  ;;  %vm696_vm6 = vmor %vm694_vm5, %vm695_vm4  ;;  %v364_v58 = vld [vmem:[%s5022_s10 + $0x20] sm:$0xff] }
 0x13f   : > { %vm615_vm11 = vcmp.gt.f32.partialorder %v4919_v46, 0.0  ;;  %vm635_vm12 = vweird.f32 %v4201_v41  ;;  %vm634_vm13 = vweird.f32 %v4957_v57  ;;  %vm612_vm15 = vcmp.gt.f32.partialorder %v4957_v57, 0.0 }
 0x140   : > { %v783_v35 = vmul.f32 %v4197_v40, %v782_v39  ;;  %v693_v44 = vmul.f32 %v4924_v61, %v692_v49  ;;  %vm636_vm14 = vmor %vm634_vm13, %vm635_vm12  ;;  %vm8308_vm1 = vcmask 523264  }
 0x142   : > { %v787_v32 = vsel %vm786_vm9, %v4197_v40, %v783_v35  ;;  %v657_v40 = vsel %vm656_vm0, %v4882_v63, %v653_v48  ;;  %v697_v62 = vsel %vm696_vm6, %v4924_v61, %v693_v44  ;;  %v662_v63 = vsub.f32 1.5, %v661_v53 }
 0x143   : > { %v803_v29 = vsel %vm627_vm10, %v787_v32, 0.0  ;;  %v790_v59 = vsel %vm614_vm3, %v657_v40, 0.0  ;;  %v794_v60 = vsel %vm618_vm7, %v697_v62, 0.0  ;;  %vm664_vm9 = vweird.f32 %v4919_v46  ;;  %v372_v46 = vld [vmem:[%s5022_s10 + $0x60] sm:$0xff]  ;;  %v365_v40 = vld [vmem:[%s5022_s10 + $0x28] sm:$0xff]  ;;  %v362_v62 = vld [vmem:[%s5022_s10 + $0x10] sm:$0xff] }
 0x144   : > { %881 = vperm.xlu0 %4083, %v803_v29   ;;  %831 = vperm.xlu1 %4082, %v793_v51   ;;  %v663_v55 = vmul.f32 %v4199_v37, %v662_v63  ;;  %vm666_vm10 = vmor %vm664_vm9, %vm665_vm8  ;;  %v368_v32 = vld [vmem:[%s5022_s10 + $0x40] sm:$0xff]  ;;  %v367_v51 = vld [vmem:[%s5022_s10 + $0x38] sm:$0xff]  ;;  %vm1078_vm0 = vcmask 64512  }
 0x145   : > { %907 = vperm.xlu2 %4081, %v4706_v14   ;;  %v629_v14 = vmul.f32 %v4201_v41, %v4957_v57 }
 0x147   : > { %v630_v36 = vmul.f32 %v4201_v41, %v629_v14 }
 0x149   : > { %v631_v52 = vmul.f32 0.5, %v630_v36 }
 0x14b   : > { %v632_v45 = vsub.f32 1.5, %v631_v52 }
 0x14c   : > { %851 = vperm.xlu0 %4083, %v797_v34   ;;  %816 = vperm.xlu1 %4082, %v790_v59   ;;  %v363_v59 = vld [vmem:[%s5022_s10 + $0x18] sm:$0xff] }
 0x14d   : > { %922 = vperm.xlu2 %4081, %v4691_v11   ;;  %v667_v11 = vsel %vm666_vm10, %v4199_v37, %v663_v55  ;;  %v633_v30 = vmul.f32 %v4201_v41, %v632_v45 }
 0x14e   : > { %v791_v61 = vsel %vm615_vm11, %v667_v11, 0.0  ;;  %v360_v11 = vld [vmem:[%s5022_s10] sm:$0xff] }
 0x154   : > { %836 = vperm.xlu0 %4083, %v794_v60   ;;  %902 = vperm.xlu1 %4082, %v4717_v15   ;;  %v637_v15 = vsel %vm636_vm14, %v4201_v41, %v633_v30  ;;  %v366_v41 = vld [vmem:[%s5022_s10 + $0x30] sm:$0xff]  ;;  %v361_v60 = vld [vmem:[%s5022_s10 + $0x8] sm:$0xff] }
 0x155   : > { %937 = vperm.xlu2 %4081, %v4676_v8   ;;  %v788_v8 = vsel %vm612_vm15, %v637_v15, 0.0 }
 0x15c   : > { %821 = vperm.xlu0 %4083, %v791_v61   ;;  %917 = vperm.xlu1 %4082, %v4696_v12  }
 0x15d   : > { %952 = vperm.xlu2 %4081, %v4661_v5  }
 0x164   : > { %932 = vperm.xlu1 %4082, %v4681_v9   ;;  %806 = vperm.xlu0 %4083, %v788_v8  }
 0x165   : > { %967 = vperm.xlu2 %4081, %v4646_v2  }
 0x16c   : > { %947 = vperm.xlu1 %4082, %v4666_v6   ;;  %912 = vperm.xlu0 %4083, %v4701_v13  }
 0x174   : > { %962 = vperm.xlu1 %4082, %v4651_v3   ;;  %927 = vperm.xlu0 %4083, %v4686_v10   ;;  %v374_v3 = vld [vmem:[%s5022_s10 + $0x70] sm:$0xff] }
 0x176   : > { %v5010_v9 = vpop.permute.xlu2 %856 }
 0x177   : > { %v5060_v47 = vmul.f32 %v5010_v9, %v370_v42 }
 0x17c   : > { %977 = vperm.xlu1 %4082, %v4638_v0   ;;  %942 = vperm.xlu0 %4083, %v4671_v7   ;;  %v375_v0 = vld [vmem:[%s5022_s10 + $0x78] sm:$0xff]  ;;  %v373_v7 = vld [vmem:[%s5022_s10 + $0x68] sm:$0xff]  ;;  %s3810_s10 = scalar_lea.hbm %s8298_s8, %s4025_s25  ;;  %s4487_s25 = scalar_lea.hbm %s8298_s8, 16 }
 0x17d   : > { %s3814_s17 = sshll.u32 %s3810_s10, 4  ;;  %s3815_s17 = int_to_ptr.hbm [resolvable:$true] %s3814_s17 }
 0x17e   : > { %v5016_v12 = vpop.permute.xlu2 %861 }
 0x17f   : > { %v5055_v35 = vmul.f32 %v5016_v12, %v371_v33 }
 0x184   : > { %957 = vperm.xlu0 %4083, %v4656_v4  }
 0x186   : > { %v5043_v39 = vpop.permute.xlu2 %841 }
 0x187   : > { %v5081_v50 = vmul.f32 %v5043_v39, %v367_v51 }
 0x18c   : > { %972 = vperm.xlu0 %4083, %v4641_v1  }
 0x18e   : > { %v5074_v48 = vpop.permute.xlu2 %826 }
 0x18f   : > { %v888_v14 = vmul.f32 %v5074_v48, %v364_v58 }
 0x197   : > { %v812_v36 = vpop.permute.xlu2 %811 }
 0x198   : > { %v885_v52 = vmul.f32 %v812_v36, %v361_v60 }
 0x19e   : > { %v5008_v5 = vpop.permute.xlu1 %866 }
 0x19f   : > { %v5048_v37 = vmul.f32 %v5008_v5, %v372_v46 }
 0x1a6   : > { %v5014_v6 = vpop.permute.xlu1 %871 }
 0x1a7   : > { %v5041_v57 = vmul.f32 %v5014_v6, %v373_v7 }
 0x1ae   : > { %v5012_v2 = vpop.permute.xlu0 %876  ;;  %v5036_v13 = vpop.permute.xlu1 %846 }
 0x1af   : > { %v5034_v10 = vmul.f32 %v5012_v2, %v374_v3  ;;  %v5072_v54 = vmul.f32 %v5036_v13, %v368_v32 }
 0x1b6   : > { %v5025_v1 = vpop.permute.xlu0 %881  ;;  %v5067_v29 = vpop.permute.xlu1 %831 }
 0x1b7   : > { %v5029_v4 = vmul.f32 %v5025_v1, %v375_v0  ;;  %v5091_v34 = vmul.f32 %v5067_v29, %v365_v40 }
 0x1b9   : > { %996 = vmatpush.msra.mxu2 %v5029_v4 }
 0x1bb   : > { %997 = vmatpush.msra.mxu2 %v5034_v10 }
 0x1bd   : > { %998 = vmatpush.msra.mxu2 %v5041_v57 }
 0x1be   : > { %v5050_v38 = vpop.permute.xlu0 %851  ;;  %v817_v44 = vpop.permute.xlu1 %816 }
 0x1bf   : > { %999 = vmatpush.msra.mxu2 %v5048_v37  ;;  %v5065_v31 = vmul.f32 %v5050_v38, %v369_v43  ;;  %v886_v55 = vmul.f32 %v817_v44, %v362_v62 }
 0x1c1   : > { %1000 = vmatpush.msra.mxu2 %v5055_v35 }
 0x1c3   : > { %1001 = vmatpush.msra.mxu2 %v5060_v47 }
 0x1c5   : > { %1002 = vmatpush.msra.mxu2 %v5065_v31 }
 0x1c6   : > { %v5076_v56 = vpop.permute.xlu0 %836 }
 0x1c7   : > { %1003 = vmatpush.msra.mxu2 %v5072_v54  ;;  %v5086_v49 = vmul.f32 %v5076_v56, %v366_v41 }
 0x1c9   : > { %1004 = vmatpush.msra.mxu2 %v5081_v50 }
 0x1cb   : > { %1005 = vmatpush.msra.mxu2 %v5086_v49 }
 0x1cd   : > { %1006 = vmatpush.msra.mxu2 %v5091_v34 }
 0x1ce   : > { %v822_v53 = vpop.permute.xlu0 %821 }
 0x1cf   : > { %1007 = vmatpush.msra.mxu2 %v888_v14  ;;  %v887_v63 = vmul.f32 %v822_v53, %v363_v59 }
 0x1d1   : > { %1008 = vmatpush.msra.mxu2 %v887_v63 }
 0x1d3   : > { %1009 = vmatpush.msra.mxu2 %v886_v55 }
 0x1d5   : > { %1010 = vmatpush.msra.mxu2 %v885_v52 }
 0x1d6   : > { %v807_v45 = vpop.permute.xlu0 %806 }
 0x1d7   : > { %v884_v61 = vmul.f32 %v807_v45, %v360_v11 }
 0x1d9   : > { %1011 = vmatpush.msra.mxu2 %v884_v61 }
 0x1da   : > { %1012 = vmatmul.f32.vlgmr.msra.gmra.mxu2 %v4721_v16  ;;  %v443_v16 = vld [vmem:[%s8295_s5] sm:$0xff] }
 0x1db   : > { %1142 = vmatpush.msra.mxu3 %v443_v16 }
 0x1de   : > { %v913_v15 = vpop.permute.xlu0 %912 }
 0x1df   : > { %v982_v8 = vmul.f32 %v913_v15, %v886_v55 }
 0x1e2   : > { %1015 = vmatmul.f32.gmra.mxu2 %v4728_v17  ;;  %v8513_v17 = vld [vmem:[#allocation5_spill] sm:$0xff] }
 0x1e6   : > { %v928_v62 = vpop.permute.xlu0 %927 }
 0x1ea   : > { %1018 = vmatmul.f32.gmra.mxu2 %v4732_v18  ;;  %v8514_v18 = vld [vmem:[#allocation6_spill] sm:$0xff] }
 0x1f2   : > { %1021 = vmatmul.f32.gmra.mxu2 %v4736_v19  ;;  %v8515_v19 = vld [vmem:[#allocation7_spill] sm:$0xff] }
 0x1fa   : > { %1024 = vmatmul.f32.gmra.mxu2 %v4740_v20  ;;  %v903_v20 = vpop.permute.xlu1 %902 }
 0x202   : > { %1027 = vmatmul.f32.gmra.mxu2 %v4744_v21  ;;  %v980_v21 = vmul.f32 %v903_v20, %v884_v61  ;;  %v918_v46 = vpop.permute.xlu1 %917 }
 0x203   : > { %v983_v33 = vmul.f32 %v918_v46, %v887_v63 }
 0x20a   : > { %1030 = vmatmul.f32.gmra.mxu2 %v4748_v22  ;;  %v933_v55 = vpop.permute.xlu1 %932 }
 0x212   : > { %1033 = vmatmul.f32.gmra.mxu2 %v4752_v23  ;;  %v948_v20 = vpop.permute.xlu1 %947 }
 0x21a   : > { %1036 = vmatmul.f32.gmra.mxu2 %v4756_v24 }
 0x222   : > { %1039 = vmatmul.f32.gmra.mxu2 %v4760_v25  ;;  %v908_v25 = vpop.permute.xlu2 %907 }
 0x22a   : > { %1042 = vmatmul.f32.gmra.mxu2 %v4764_v26  ;;  %v981_v26 = vmul.f32 %v908_v25, %v885_v52  ;;  %v923_v51 = vpop.permute.xlu2 %922 }
 0x22b   : > { %v984_v41 = vmul.f32 %v923_v51, %v888_v14 }
 0x232   : > { %1045 = vmatmul.f32.gmra.mxu2 %v4768_v27 }
 0x23a   : > { %1048 = vmatmul.f32.gmra.mxu2 %v4772_v28 }
 0x242   : > { %1051 = vmatmul.f32.gmra.mxu2 %v8513_v17  ;;  %v943_v17 = vpop.permute.xlu0 %942 }
 0x24a   : > { %1054 = vmatmul.f32.gmra.mxu2 %v8514_v18 }
 0x252   : > { %1057 = vmatmul.f32.gmra.mxu2 %v8515_v19 }
 0x25d   : > { %v1013_v22 = vpop.f32.mrf.mxu2 }
 0x25e   : > { %v1014_v23 = vadd.f32 %v1013_v22, %v980_v21 }
 0x260   : > { %v1061_v24 = vmul.f32 %v1014_v23, %v807_v45  ;;  %v938_v45 = vpop.permute.xlu2 %937 }
 0x262   : > { %3941 = vmatmul.msk.f32.vlgmr.msra.gmra.mxu3 %vm1078_vm0, %v1061_v24 }
 0x265   : > { %v1016_v27 = vpop.f32.mrf.mxu2 }
 0x266   : > { %v1017_v28 = vadd.f32 %v1016_v27, %v981_v26  ;;  %v958_v26 = vpop.permute.xlu0 %957 }
 0x268   : > { %v1062_v30 = vmul.f32 %v1017_v28, %v812_v36  ;;  %v953_v23 = vpop.permute.xlu2 %952 }
 0x26a   : > { %3942 = vmatmul.msk.f32.gmra.mxu3 %vm1078_vm0, %v1062_v30  ;;  %v963_v30 = vpop.permute.xlu1 %962 }
 0x26d   : > { %v1019_v0 = vpop.f32.mrf.mxu2 }
 0x26e   : > { %v1020_v3 = vadd.f32 %v1019_v0, %v982_v8  ;;  %v973_v46 = vpop.permute.xlu0 %972 }
 0x270   : > { %v1063_v7 = vmul.f32 %v1020_v3, %v817_v44  ;;  %v985_v44 = vmul.f32 %v928_v62, %v5091_v34  ;;  %v968_v0 = vpop.permute.xlu2 %967 }
 0x272   : > { %3943 = vmatmul.msk.f32.gmra.mxu3 %vm1078_vm0, %v1063_v7 }
 0x275   : > { %v1022_v42 = vpop.f32.mrf.mxu2 }
 0x276   : > { %v1023_v43 = vadd.f32 %v1022_v42, %v983_v33 }
 0x278   : > { %v1064_v32 = vmul.f32 %v1023_v43, %v822_v53  ;;  %v986_v53 = vmul.f32 %v933_v55, %v5086_v49  ;;  %v978_v43 = vpop.permute.xlu1 %977 }
 0x27a   : > { %3944 = vmatmul.msk.f32.gmra.mxu3 %vm1078_vm0, %v1064_v32 }
 0x27d   : > { %v1025_v40 = vpop.f32.mrf.mxu2 }
 0x27e   : > { %v1026_v58 = vadd.f32 %v1025_v40, %v984_v41 }
 0x280   : > { %v1065_v59 = vmul.f32 %v1026_v58, %v5074_v48  ;;  %v987_v48 = vmul.f32 %v938_v45, %v5081_v50 }
 0x282   : > { %3945 = vmatmul.msk.f32.gmra.mxu3 %vm1078_vm0, %v1065_v59 }
 0x285   : > { %v1028_v36 = vpop.f32.mrf.mxu2 }
 0x286   : > { %v1029_v60 = vadd.f32 %v1028_v36, %v985_v44 }
 0x288   : > { %v1066_v63 = vmul.f32 %v1029_v60, %v5067_v29  ;;  %v988_v29 = vmul.f32 %v943_v17, %v5072_v54 }
 0x28a   : > { %3946 = vmatmul.msk.f32.gmra.mxu3 %vm1078_vm0, %v1066_v63 }
 0x28d   : > { %v1031_v52 = vpop.f32.mrf.mxu2 }
 0x28e   : > { %v1032_v14 = vadd.f32 %v1031_v52, %v986_v53 }
 0x290   : > { %v1067_v11 = vmul.f32 %v1032_v14, %v5076_v56  ;;  %v989_v56 = vmul.f32 %v948_v20, %v5065_v31 }
 0x292   : > { %3947 = vmatmul.msk.f32.gmra.mxu3 %vm1078_vm0, %v1067_v11 }
 0x295   : > { %v1034_v61 = vpop.f32.mrf.mxu2 }
 0x296   : > { %v1035_v34 = vadd.f32 %v1034_v61, %v987_v48 }
 0x298   : > { %v1068_v16 = vmul.f32 %v1035_v34, %v5043_v39  ;;  %v990_v39 = vmul.f32 %v953_v23, %v5060_v47 }
 0x29a   : > { %3948 = vmatmul.msk.f32.gmra.mxu3 %vm1078_vm0, %v1068_v16 }
 0x29d   : > { %v1037_v18 = vpop.f32.mrf.mxu2 }
 0x29e   : > { %v1038_v49 = vadd.f32 %v1037_v18, %v988_v29 }
 0x2a0   : > { %v1069_v19 = vmul.f32 %v1038_v49, %v5036_v13  ;;  %v991_v13 = vmul.f32 %v958_v26, %v5055_v35 }
 0x2a2   : > { %3949 = vmatmul.msk.f32.gmra.mxu3 %vm1078_vm0, %v1069_v19 }
 0x2a5   : > { %v1040_v21 = vpop.f32.mrf.mxu2 }
 0x2a6   : > { %v1041_v50 = vadd.f32 %v1040_v21, %v989_v56 }
 0x2a8   : > { %v1070_v22 = vmul.f32 %v1041_v50, %v5050_v38  ;;  %v992_v38 = vmul.f32 %v963_v30, %v5048_v37 }
 0x2aa   : > { %3950 = vmatmul.msk.f32.gmra.mxu3 %vm1078_vm0, %v1070_v22 }
 0x2ad   : > { %v1043_v24 = vpop.f32.mrf.mxu2 }
 0x2ae   : > { %v1044_v54 = vadd.f32 %v1043_v24, %v990_v39 }
 0x2b0   : > { %v1071_v25 = vmul.f32 %v1044_v54, %v5010_v9  ;;  %v993_v9 = vmul.f32 %v968_v0, %v5041_v57 }
 0x2b2   : > { %3951 = vmatmul.msk.f32.gmra.mxu3 %vm1078_vm0, %v1071_v25 }
 0x2b5   : > { %v1046_v27 = vpop.f32.mrf.mxu2 }
 0x2b6   : > { %v1047_v31 = vadd.f32 %v1046_v27, %v991_v13 }
 0x2b8   : > { %v1072_v28 = vmul.f32 %v1047_v31, %v5016_v12  ;;  %v994_v12 = vmul.f32 %v973_v46, %v5034_v10 }
 0x2ba   : > { %3952 = vmatmul.msk.f32.gmra.mxu3 %vm1078_vm0, %v1072_v28 }
 0x2bd   : > { %v1049_v15 = vpop.f32.mrf.mxu2 }
 0x2be   : > { %v1050_v47 = vadd.f32 %v1049_v15, %v992_v38 }
 0x2c0   : > { %v1073_v8 = vmul.f32 %v1050_v47, %v5008_v5  ;;  %v995_v5 = vmul.f32 %v978_v43, %v5029_v4 }
 0x2c2   : > { %3953 = vmatmul.msk.f32.gmra.mxu3 %vm1078_vm0, %v1073_v8 }
 0x2c5   : > { %v1052_v3 = vpop.f32.mrf.mxu2 }
 0x2c6   : > { %v1053_v35 = vadd.f32 %v1052_v3, %v993_v9 }
 0x2c8   : > { %v1074_v7 = vmul.f32 %v1053_v35, %v5014_v6  ;;  %v5160_v6 = vld [vmem:[%s8296_s6] ss:$0 sm:$0xff] }
 0x2ca   : > { %3954 = vmatmul.msk.f32.gmra.mxu3 %vm1078_vm0, %v1074_v7 }
 0x2cd   : > { %v1055_v33 = vpop.f32.mrf.mxu2 }
 0x2ce   : > { %v1056_v37 = vadd.f32 %v1055_v33, %v994_v12 }
 0x2d0   : > { %v1075_v42 = vmul.f32 %v1056_v37, %v5012_v2  ;;  %v5168_v2 = vld [vmem:[%s8296_s6 + $0x1] ss:$0 sm:$0xff] }
 0x2d2   : > { %3955 = vmatmul.msk.f32.gmra.mxu3 %vm1078_vm0, %v1075_v42 }
 0x2d5   : > { %v1058_v32 = vpop.f32.mrf.mxu2 }
 0x2d6   : > { %v1059_v57 = vadd.f32 %v1058_v32, %v995_v5 }
 0x2d8   : > { %v1076_v51 = vmul.f32 %v1059_v57, %v5025_v1 }
 0x2da   : > { %3956 = vmatmul.msk.f32.gmra.mxu3 %vm1078_vm0, %v1076_v51 }
 0x2e5   : > { %v1144_v10 = vpop.f32.mrf.mxu3 }
 0x2e6   : > { %v5163_v41 = vadd.f32 %v5160_v6, %v1144_v10 }
 0x2e8   : > { %8516 = vst [vmem:[#allocation5_spill] sm:$0xff] %v5163_v41  ;;  %v8302_v4 = vmax.f32 %v5163_v41, 0.0  ;;  %v3926_v41 = vld [vmem:[%s8293_s3 + $0x108] sm:$0xff] }
 0x2ea   : > { %v1233_v1 = vmul.f32 %v5168_v2, %v8302_v4 }
 0x2ec   : > { %v1250_v40 = vsel %vm8308_vm1, %v1233_v1, 0.0 }
 0x2ed   : > { %v1147_v58 = vpop.f32.mrf.mxu3  ;;  %1251 = vadd.xlane.f32.xlu2 %v1250_v40 }
 0x2ee   : > { %v5176_v59 = vadd.f32 %v5160_v6, %v1147_v58 }
 0x2f0   : > { %8517 = vst [vmem:[#allocation6_spill] sm:$0xff] %v5176_v59  ;;  %v8303_v62 = vmax.f32 %v5176_v59, 0.0  ;;  %v5537_v59 = vld [vmem:[%s8293_s3 + $0x78] sm:$0xff] }
 0x2f2   : > { %v1234_v44 = vmul.f32 %v5168_v2, %v8303_v62 }
 0x2f4   : > { %v1253_v36 = vsel %vm8308_vm1, %v1234_v44, 0.0 }
 0x2f5   : > { %1254 = vadd.xlane.f32.xlu0 %v1253_v36  ;;  %v1150_v60 = vpop.f32.mrf.mxu3 }
 0x2f6   : > { %v5184_v63 = vadd.f32 %v5160_v6, %v1150_v60 }
 0x2f8   : > { %8518 = vst [vmem:[#allocation7_spill] sm:$0xff] %v5184_v63  ;;  %v8304_v55 = vmax.f32 %v5184_v63, 0.0  ;;  %v3925_v63 = vld [vmem:[%s8293_s3 + $0x100] sm:$0xff] }
 0x2fa   : > { %v1235_v53 = vmul.f32 %v5168_v2, %v8304_v55  ;;  %v5452_v55 = vld [vmem:[%s4635_s21 + $0x70] sm:$0xff] }
 0x2fb   : > { %vm1345_vm0 = vcmp.gt.f32.partialorder %v5452_v55, 0.0 }
 0x2fc   : > { %v1256_v52 = vsel %vm8308_vm1, %v1235_v53, 0.0 }
 0x2fd   : > { %v1153_v14 = vpop.f32.mrf.mxu3  ;;  %1257 = vadd.xlane.f32.xlu1 %v1256_v52 }
 0x2fe   : > { %v5192_v11 = vadd.f32 %v5160_v6, %v1153_v14 }
 0x300   : > { %8519 = vst [vmem:[#allocation8_spill] sm:$0xff] %v5192_v11  ;;  %v8305_v45 = vmax.f32 %v5192_v11, 0.0  ;;  %v3927_v11 = vld [vmem:[%s8293_s3 + $0x110] sm:$0xff] }
 0x302   : > { %v1236_v48 = vmul.f32 %v5168_v2, %v8305_v45 }
 0x304   : > { %v1259_v61 = vsel %vm8308_vm1, %v1236_v48, 0.0 }
 0x305   : > { %v1156_v34 = vpop.f32.mrf.mxu3  ;;  %1260 = vadd.xlane.f32.xlu2 %v1259_v61 }
 0x306   : > { %v5200_v16 = vadd.f32 %v5160_v6, %v1156_v34 }
 0x308   : > { %8520 = vst [vmem:[#allocation9_spill] sm:$0xff] %v5200_v16  ;;  %v8307_v17 = vmax.f32 %v5200_v16, 0.0 }
 0x30a   : > { %v1237_v29 = vmul.f32 %v5168_v2, %v8307_v17  ;;  %v5466_v17 = vld [vmem:[%s4635_s21 + $0x78] sm:$0xff] }
 0x30c   : > { %v1262_v18 = vsel %vm8308_vm1, %v1237_v29, 0.0 }
 0x30d   : > { %1263 = vadd.xlane.f32.xlu2 %v1262_v18  ;;  %v1159_v49 = vpop.f32.mrf.mxu3 }
 0x30e   : > { %v5208_v19 = vadd.f32 %v5160_v6, %v1159_v49 }
 0x310   : > { %8521 = vst [vmem:[#allocation10_spill] sm:$0xff] %v5208_v19  ;;  %v8309_v20 = vmax.f32 %v5208_v19, 0.0 }
 0x312   : > { %v1238_v56 = vmul.f32 %v5168_v2, %v8309_v20 }
 0x314   : > { %v1265_v21 = vsel %vm8308_vm1, %v1238_v56, 0.0 }
 0x315   : > { %v1162_v50 = vpop.f32.mrf.mxu3  ;;  %1266 = vadd.xlane.f32.xlu0 %v1265_v21 }
 0x316   : > { %v5216_v22 = vadd.f32 %v5160_v6, %v1162_v50 }
 0x318   : > { %8522 = vst [vmem:[#allocation11_spill] sm:$0xff] %v5216_v22  ;;  %v8306_v23 = vmax.f32 %v5216_v22, 0.0 }
 0x31a   : > { %v1239_v39 = vmul.f32 %v5168_v2, %v8306_v23 }
 0x31c   : > { %v1268_v24 = vsel %vm8308_vm1, %v1239_v39, 0.0  ;;  %v5298_v39 = vld [vmem:[%s4635_s21] sm:$0xff] }
 0x31d   : > { %v1165_v54 = vpop.f32.mrf.mxu3  ;;  %1269 = vadd.xlane.f32.xlu1 %v1268_v24  ;;  %8533 = vst [vmem:[#allocation22_spill] sm:$0xff] %v5298_v39  ;;  %vm8356_vm2 = vcmp.gt.f32.partialorder %v5298_v39, 0.0 }
 0x31e   : > { %v5224_v25 = vadd.f32 %v5160_v6, %v1165_v54  ;;  %v5307_v54 = vld [vmem:[%s4635_s21 + $0x8] sm:$0xff] }
 0x31f   : > { %8535 = vst [vmem:[#allocation24_spill] sm:$0xff] %v5307_v54  ;;  %vm8357_vm3 = vcmp.gt.f32.partialorder %v5307_v54, 0.0 }
 0x320   : > { %8523 = vst [vmem:[#allocation12_spill] sm:$0xff] %v5224_v25  ;;  %v8310_v26 = vmax.f32 %v5224_v25, 0.0 }
 0x322   : > { %v1240_v13 = vmul.f32 %v5168_v2, %v8310_v26 }
 0x324   : > { %v1271_v27 = vsel %vm8308_vm1, %v1240_v13, 0.0  ;;  %v5314_v13 = vld [vmem:[%s4635_s21 + $0x18] sm:$0xff] }
 0x325   : > { %1272 = vadd.xlane.f32.xlu2 %v1271_v27  ;;  %v1168_v31 = vpop.f32.mrf.mxu3  ;;  %8536 = vst [vmem:[#allocation25_spill] sm:$0xff] %v5314_v13  ;;  %vm8359_vm4 = vcmp.gt.f32.partialorder %v5314_v13, 0.0 }
 0x326   : > { %v5232_v28 = vadd.f32 %v5160_v6, %v1168_v31 }
 0x328   : > { %8524 = vst [vmem:[#allocation13_spill] sm:$0xff] %v5232_v28  ;;  %v8311_v30 = vmax.f32 %v5232_v28, 0.0 }
 0x32a   : > { %v1241_v38 = vmul.f32 %v5168_v2, %v8311_v30  ;;  %v5484_v30 = vld [vmem:[%s8293_s3 + $0x38] sm:$0xff] }
 0x32c   : > { %v1274_v15 = vsel %vm8308_vm1, %v1241_v38, 0.0 }
 0x32d   : > { %v1171_v47 = vpop.f32.mrf.mxu3  ;;  %1275 = vadd.xlane.f32.xlu0 %v1274_v15  ;;  %v5325_v15 = vld [vmem:[%s4635_s21 + $0x10] sm:$0xff] }
 0x32e   : > { %v5240_v8 = vadd.f32 %v5160_v6, %v1171_v47  ;;  %8539 = vst [vmem:[#allocation28_spill] sm:$0xff] %v5325_v15  ;;  %vm8358_vm5 = vcmp.gt.f32.partialorder %v5325_v15, 0.0 }
 0x330   : > { %8525 = vst [vmem:[#allocation14_spill] sm:$0xff] %v5240_v8  ;;  %v8312_v0 = vmax.f32 %v5240_v8, 0.0 }
 0x332   : > { %v1242_v9 = vmul.f32 %v5168_v2, %v8312_v0  ;;  %v5490_v0 = vld [vmem:[%s8293_s3 + $0x40] sm:$0xff] }
 0x334   : > { %v1277_v3 = vsel %vm8308_vm1, %v1242_v9, 0.0  ;;  %v5332_v9 = vld [vmem:[%s4635_s21 + $0x20] sm:$0xff] }
 0x335   : > { %v1174_v35 = vpop.f32.mrf.mxu3  ;;  %1278 = vadd.xlane.f32.xlu1 %v1277_v3  ;;  %8540 = vst [vmem:[#allocation29_spill] sm:$0xff] %v5332_v9  ;;  %vm8360_vm6 = vcmp.gt.f32.partialorder %v5332_v9, 0.0 }
 0x336   : > { %v5248_v7 = vadd.f32 %v5160_v6, %v1174_v35 }
 0x338   : > { %8526 = vst [vmem:[#allocation15_spill] sm:$0xff] %v5248_v7  ;;  %v8313_v46 = vmax.f32 %v5248_v7, 0.0 }
 0x33a   : > { %v1243_v12 = vmul.f32 %v5168_v2, %v8313_v46  ;;  %v5502_v46 = vld [vmem:[%s8293_s3 + $0x50] sm:$0xff] }
 0x33c   : > { %v1280_v33 = vsel %vm8308_vm1, %v1243_v12, 0.0  ;;  %v5341_v12 = vld [vmem:[%s4635_s21 + $0x28] sm:$0xff] }
 0x33d   : > { %1281 = vadd.xlane.f32.xlu2 %v1280_v33  ;;  %v1177_v37 = vpop.f32.mrf.mxu3  ;;  %vm8361_vm7 = vcmp.gt.f32.partialorder %v5341_v12, 0.0 }
 0x33e   : > { %v5256_v42 = vadd.f32 %v5160_v6, %v1177_v37 }
 0x340   : > { %8527 = vst [vmem:[#allocation16_spill] sm:$0xff] %v5256_v42  ;;  %v8314_v43 = vmax.f32 %v5256_v42, 0.0 }
 0x342   : > { %v1244_v5 = vmul.f32 %v5168_v2, %v8314_v43  ;;  %v5508_v43 = vld [vmem:[%s8293_s3 + $0x58] sm:$0xff] }
 0x344   : > { %v1283_v32 = vsel %vm8308_vm1, %v1244_v5, 0.0  ;;  %v5350_v5 = vld [vmem:[%s4635_s21 + $0x30] sm:$0xff] }
 0x345   : > { %v1180_v57 = vpop.f32.mrf.mxu3  ;;  %1284 = vadd.xlane.f32.xlu0 %v1283_v32  ;;  %vm8362_vm8 = vcmp.gt.f32.partialorder %v5350_v5, 0.0 }
 0x346   : > { %v5264_v51 = vadd.f32 %v5160_v6, %v1180_v57 }
 0x348   : > { %8528 = vst [vmem:[#allocation17_spill] sm:$0xff] %v5264_v51  ;;  %v8315_v10 = vmax.f32 %v5264_v51, 0.0 }
 0x34a   : > { %v1245_v1 = vmul.f32 %v5168_v2, %v8315_v10  ;;  %v5514_v10 = vld [vmem:[%s8293_s3 + $0x60] sm:$0xff] }
 0x34c   : > { %v1286_v40 = vsel %vm8308_vm1, %v1245_v1, 0.0  ;;  %v5359_v1 = vld [vmem:[%s4635_s21 + $0x38] sm:$0xff] }
 0x34d   : > { %v1183_v58 = vpop.f32.mrf.mxu3  ;;  %1287 = vadd.xlane.f32.xlu1 %v1286_v40  ;;  %vm8363_vm9 = vcmp.gt.f32.partialorder %v5359_v1, 0.0 }
 0x34e   : > { %v5272_v44 = vadd.f32 %v5160_v6, %v1183_v58 }
 0x350   : > { %8529 = vst [vmem:[#allocation18_spill] sm:$0xff] %v5272_v44  ;;  %v8316_v36 = vmax.f32 %v5272_v44, 0.0 }
 0x352   : > { %v1246_v60 = vmul.f32 %v5168_v2, %v8316_v36  ;;  %v5520_v36 = vld [vmem:[%s8293_s3 + $0x68] sm:$0xff] }
 0x354   : > { %v1289_v53 = vsel %vm8308_vm1, %v1246_v60, 0.0  ;;  %v5368_v60 = vld [vmem:[%s4635_s21 + $0x40] sm:$0xff] }
 0x355   : > { %1290 = vadd.xlane.f32.xlu2 %v1289_v53  ;;  %v1186_v52 = vpop.f32.mrf.mxu3  ;;  %vm1339_vm10 = vcmp.gt.f32.partialorder %v5368_v60, 0.0  ;;  %v4387_v60 = vld [vmem:[%s4712_s24 + $0x8] sm:$0xff] }
 0x356   : > { %v5280_v14 = vadd.f32 %v5160_v6, %v1186_v52 }
 0x358   : > { %8530 = vst [vmem:[#allocation19_spill] sm:$0xff] %v5280_v14  ;;  %v8317_v48 = vmax.f32 %v5280_v14, 0.0 }
 0x35a   : > { %v1247_v61 = vmul.f32 %v5168_v2, %v8317_v48  ;;  %v5526_v48 = vld [vmem:[%s8293_s3 + $0x70] sm:$0xff] }
 0x35c   : > { %v1292_v34 = vsel %vm8308_vm1, %v1247_v61, 0.0  ;;  %v5377_v61 = vld [vmem:[%s4635_s21 + $0x48] sm:$0xff] }
 0x35d   : > { %v1189_v29 = vpop.f32.mrf.mxu3  ;;  %1293 = vadd.xlane.f32.xlu0 %v1292_v34  ;;  %vm1340_vm11 = vcmp.gt.f32.partialorder %v5377_v61, 0.0 }
 0x35e   : > { %v5288_v18 = vadd.f32 %v5160_v6, %v1189_v29 }
 0x360   : > { %8531 = vst [vmem:[#allocation20_spill] sm:$0xff] %v5288_v18  ;;  %v8318_v49 = vmax.f32 %v5288_v18, 0.0  ;;  %v5295_v50 = vpop.xlane.xlu2 %1251 }
 0x361   : > { %8532 = vst [vmem:[#allocation21_spill] sm:$0xff] %v5295_v50  ;;  %v1347_v6 = vsel %vm8356_vm2, %v5295_v50, -1e+30 }
 0x362   : > { %v1248_v56 = vmul.f32 %v5168_v2, %v8318_v49 }
 0x364   : > { %v1295_v21 = vsel %vm8308_vm1, %v1248_v56, 0.0  ;;  %v5388_v56 = vld [vmem:[%s8293_s3] sm:$0xff]  ;;  %vm1346_vm1 = vcmp.gt.f32.partialorder %v5466_v17, 0.0 }
 0x365   : > { %1296 = vadd.xlane.f32.xlu1 %v1295_v21  ;;  %498 = vmatmul.f32.vlgmr.msra.gmra.mxu0 %v5388_v56  ;;  %v5392_v21 = vld [vmem:[%s4635_s21 + $0x50] sm:$0xff] }
 0x366   : > { %vm1341_vm12 = vcmp.gt.f32.partialorder %v5392_v21, 0.0 }
 0x368   : > { %v5304_v24 = vpop.xlane.xlu0 %1254 }
 0x369   : > { %8534 = vst [vmem:[#allocation23_spill] sm:$0xff] %v5304_v24  ;;  %v1348_v2 = vsel %vm8357_vm3, %v5304_v24, -1e+30 }
 0x36d   : > { %1365 = vperm.xlu2 %4081, %v1347_v6  }
 0x370   : > { %v5322_v38 = vpop.xlane.xlu1 %1257 }
 0x371   : > { %1370 = vperm.xlu0 %4083, %v1348_v2   ;;  %8538 = vst [vmem:[#allocation27_spill] sm:$0xff] %v5322_v38  ;;  %v1349_v47 = vsel %vm8358_vm5, %v5322_v38, -1e+30  ;;  %v3928_v38 = vld [vmem:[%s8293_s3 + $0x118] sm:$0xff] }
 0x378   : > { %v5317_v27 = vpop.xlane.xlu2 %1260 }
 0x379   : > { %8537 = vst [vmem:[#allocation26_spill] sm:$0xff] %v5317_v27  ;;  %v1350_v31 = vsel %vm8359_vm4, %v5317_v27, -1e+30 }
 0x37a   : > { %1380 = vperm.xlu0 %4083, %v1350_v31   ;;  %v5403_v31 = vld [vmem:[%s8293_s3 + $0x8] sm:$0xff] }
 0x37b   : > { %501 = vmatmul.f32.gmra.mxu0 %v5403_v31 }
 0x37e   : > { %1375 = vperm.xlu1 %4082, %v1349_v47   ;;  %v5407_v47 = vld [vmem:[%s4635_s21 + $0x58] sm:$0xff] }
 0x37f   : > { %vm1342_vm13 = vcmp.gt.f32.partialorder %v5407_v47, 0.0 }
 0x380   : > { %v5335_v3 = vpop.xlane.xlu2 %1263 }
 0x381   : > { %8541 = vst [vmem:[#allocation30_spill] sm:$0xff] %v5335_v3  ;;  %v1351_v35 = vsel %vm8360_vm6, %v5335_v3, -1e+30 }
 0x382   : > { %1385 = vperm.xlu2 %4081, %v1351_v35  }
 0x388   : > { %v5344_v33 = vpop.xlane.xlu0 %1266 }
 0x389   : > { %8542 = vst [vmem:[#allocation31_spill] sm:$0xff] %v5344_v33  ;;  %v1352_v37 = vsel %vm8361_vm7, %v5344_v33, -1e+30 }
 0x38a   : > { %1390 = vperm.xlu1 %4082, %v1352_v37  }
 0x390   : > { %v5353_v32 = vpop.xlane.xlu1 %1269 }
 0x391   : > { %8543 = vst [vmem:[#allocation32_spill] sm:$0xff] %v5353_v32  ;;  %v1353_v57 = vsel %vm8362_vm8, %v5353_v32, -1e+30 }
 0x392   : > { %1395 = vperm.xlu0 %4083, %v1353_v57   ;;  %v5418_v57 = vld [vmem:[%s8293_s3 + $0x10] sm:$0xff] }
 0x393   : > { %504 = vmatmul.f32.gmra.mxu0 %v5418_v57 }
 0x398   : > { %v5362_v40 = vpop.xlane.xlu2 %1272 }
 0x399   : > { %8544 = vst [vmem:[#allocation33_spill] sm:$0xff] %v5362_v40  ;;  %v1354_v58 = vsel %vm8363_vm9, %v5362_v40, -1e+30 }
 0x39a   : > { %1400 = vperm.xlu2 %4081, %v1354_v58   ;;  %v5422_v58 = vld [vmem:[%s4635_s21 + $0x60] sm:$0xff] }
 0x39b   : > { %vm1343_vm14 = vcmp.gt.f32.partialorder %v5422_v58, 0.0 }
 0x3a0   : > { %v5371_v53 = vpop.xlane.xlu0 %1275 }
 0x3a1   : > { %8545 = vst [vmem:[#allocation34_spill] sm:$0xff] %v5371_v53  ;;  %v1355_v52 = vsel %vm1339_vm10, %v5371_v53, -1e+30 }
 0x3a2   : > { %1405 = vperm.xlu1 %4082, %v1355_v52  }
 0x3a8   : > { %v5380_v34 = vpop.xlane.xlu1 %1278 }
 0x3a9   : > { %8546 = vst [vmem:[#allocation35_spill] sm:$0xff] %v5380_v34  ;;  %v1356_v29 = vsel %vm1340_vm11, %v5380_v34, -1e+30 }
 0x3aa   : > { %1410 = vperm.xlu0 %4083, %v1356_v29  }
 0x3b0   : > { %v5395_v6 = vpop.xlane.xlu2 %1281 }
 0x3b1   : > { %8547 = vst [vmem:[#allocation36_spill] sm:$0xff] %v5395_v6  ;;  %v1357_v2 = vsel %vm1341_vm12, %v5395_v6, -1e+30 }
 0x3b2   : > { %1415 = vperm.xlu2 %4081, %v1357_v2   ;;  %v5433_v2 = vld [vmem:[%s8293_s3 + $0x18] sm:$0xff] }
 0x3b3   : > { %507 = vmatmul.f32.gmra.mxu0 %v5433_v2 }
 0x3b8   : > { %v5410_v35 = vpop.xlane.xlu0 %1284 }
 0x3b9   : > { %8548 = vst [vmem:[#allocation37_spill] sm:$0xff] %v5410_v35  ;;  %v1358_v37 = vsel %vm1342_vm13, %v5410_v35, -1e+30 }
 0x3ba   : > { %1420 = vperm.xlu1 %4082, %v1358_v37   ;;  %v5437_v37 = vld [vmem:[%s4635_s21 + $0x68] sm:$0xff] }
 0x3bb   : > { %vm1344_vm15 = vcmp.gt.f32.partialorder %v5437_v37, 0.0 }
 0x3c0   : > { %v5425_v52 = vpop.xlane.xlu1 %1287 }
 0x3c1   : > { %8549 = vst [vmem:[#allocation38_spill] sm:$0xff] %v5425_v52  ;;  %v1359_v29 = vsel %vm1343_vm14, %v5425_v52, -1e+30  ;;  %v3938_v52 = vld [vmem:[%s8293_s3 + $0x168] sm:$0xff] }
 0x3c2   : > { %1425 = vperm.xlu0 %4083, %v1359_v29   ;;  %v5448_v29 = vld [vmem:[%s8293_s3 + $0x20] sm:$0xff] }
 0x3c3   : > { %510 = vmatmul.f32.gmra.mxu0 %v5448_v29 }
 0x3c8   : > { %v5440_v4 = vpop.xlane.xlu2 %1290 }
 0x3c9   : > { %8550 = vst [vmem:[#allocation39_spill] sm:$0xff] %v5440_v4  ;;  %v1360_v62 = vsel %vm1344_vm15, %v5440_v4, -1e+30 }
 0x3ca   : > { %1430 = vperm.xlu2 %4081, %v1360_v62   ;;  %v5463_v62 = vld [vmem:[%s8293_s3 + $0x28] sm:$0xff] }
 0x3cb   : > { %513 = vmatmul.f32.gmra.mxu0 %v5463_v62 }
 0x3d0   : > { %v5455_v45 = vpop.xlane.xlu0 %1293  ;;  %v5542_v50 = vpop.permute.xlu2 %1365 }
 0x3d1   : > { %8551 = vst [vmem:[#allocation40_spill] sm:$0xff] %v5455_v45  ;;  %v1361_v23 = vsel %vm1345_vm0, %v5455_v45, -1e+30  ;;  %v1443_v16 = vmul.f32 %v3925_v63, %v5542_v50  ;;  %v3930_v63 = vld [vmem:[%s8293_s3 + $0x128] sm:$0xff] }
 0x3d2   : > { %1435 = vperm.xlu1 %4082, %v1361_v23   ;;  %v5478_v23 = vld [vmem:[%s8293_s3 + $0x30] sm:$0xff] }
 0x3d3   : > { %516 = vmatmul.f32.gmra.mxu0 %v5478_v23 }
 0x3d8   : > { %v5470_v20 = vpop.xlane.xlu1 %1296 }
 0x3d9   : > { %8552 = vst [vmem:[#allocation41_spill] sm:$0xff] %v5470_v20  ;;  %v1362_v26 = vsel %vm1346_vm1, %v5470_v20, -1e+30 }
 0x3da   : > { %1440 = vperm.xlu0 %4083, %v1362_v26   ;;  %v5496_v26 = vld [vmem:[%s8293_s3 + $0x48] sm:$0xff] }
 0x3db   : > { %519 = vmatmul.f32.gmra.mxu0 %v5484_v30 }
 0x3dc   : > { %v5558_v27 = vpop.permute.xlu2 %1385 }
 0x3e2   : > { %v5576_v42 = vpop.f32.mrf.mxu0 }
 0x3e3   : > { %522 = vmatmul.f32.gmra.mxu0 %v5490_v0  ;;  %v5528_v49 = vpop.permute.xlu0 %1370  ;;  %8553 = vst [vmem:[#allocation42_spill] sm:$0xff] %v5576_v42 }
 0x3e4   : > { %v1444_v22 = vmul.f32 %v3926_v41, %v5528_v49  ;;  %v3929_v41 = vld [vmem:[%s8293_s3 + $0x120] sm:$0xff] }
 0x3e6   : > { %v1459_v28 = vadd.f32 %v1444_v22, %v1443_v16  ;;  %v3931_v22 = vld [vmem:[%s8293_s3 + $0x130] sm:$0xff] }
 0x3eb   : > { %525 = vmatmul.f32.gmra.mxu0 %v5496_v26 }
 0x3ec   : > { %v5553_v25 = vpop.permute.xlu0 %1380 }
 0x3ed   : > { %v1446_v7 = vmul.f32 %v3928_v38, %v5553_v25 }
 0x3f0   : > { %v5547_v24 = vpop.permute.xlu1 %1375 }
 0x3f1   : > { %v1445_v19 = vmul.f32 %v3927_v11, %v5547_v24 }
 0x3f3   : > { %528 = vmatmul.f32.gmra.mxu0 %v5502_v46  ;;  %v1460_v8 = vadd.f32 %v1459_v28, %v1445_v19  ;;  %v1447_v28 = vmul.f32 %v3929_v41, %v5558_v27 }
 0x3f4   : > { %v5579_v44 = vpop.permute.xlu2 %1400 }
 0x3f5   : > { %v1461_v16 = vadd.f32 %v1460_v8, %v1446_v7  ;;  %v3932_v8 = vld [vmem:[%s8293_s3 + $0x138] sm:$0xff]  ;;  %v3933_v7 = vld [vmem:[%s8293_s3 + $0x140] sm:$0xff] }
 0x3f7   : > { %v1462_v51 = vadd.f32 %v1461_v16, %v1447_v28 }
 0x3f8   : > { %v5597_v14 = vpop.f32.mrf.mxu0 }
 0x3fb   : > { %531 = vmatmul.f32.gmra.mxu0 %v5508_v43 }
 0x3fc   : > { %v5567_v11 = vpop.permute.xlu1 %1390 }
 0x3fd   : > { %v1448_v38 = vmul.f32 %v3930_v63, %v5567_v11  ;;  %v3934_v63 = vld [vmem:[%s8293_s3 + $0x148] sm:$0xff] }
 0x3ff   : > { %v1463_v3 = vadd.f32 %v1462_v51, %v1448_v38 }
 0x403   : > { %534 = vmatmul.f32.gmra.mxu0 %v5514_v10 }
 0x404   : > { %v5572_v19 = vpop.permute.xlu0 %1395 }
 0x405   : > { %v1449_v32 = vmul.f32 %v3931_v22, %v5572_v19  ;;  %v1450_v22 = vmul.f32 %v3932_v8, %v5579_v44 }
 0x407   : > { %v1464_v41 = vadd.f32 %v1463_v3, %v1449_v32  ;;  %v3935_v3 = vld [vmem:[%s8293_s3 + $0x150] sm:$0xff]  ;;  %v3936_v32 = vld [vmem:[%s8293_s3 + $0x158] sm:$0xff] }
 0x409   : > { %v1465_v28 = vadd.f32 %v1464_v41, %v1450_v22 }
 0x40b   : > { %537 = vmatmul.f32.gmra.mxu0 %v5520_v36 }
 0x40c   : > { %v5599_v40 = vpop.permute.xlu2 %1415 }
 0x410   : > { %v5620_v4 = vpop.f32.mrf.mxu0 }
 0x413   : > { %540 = vmatmul.f32.gmra.mxu0 %v5526_v48 }
 0x414   : > { %v5587_v33 = vpop.permute.xlu1 %1405 }
 0x415   : > { %v1451_v51 = vmul.f32 %v3933_v7, %v5587_v33  ;;  %v3937_v7 = vld [vmem:[%s8293_s3 + $0x160] sm:$0xff] }
 0x417   : > { %v1466_v53 = vadd.f32 %v1465_v28, %v1451_v51 }
 0x41b   : > { %543 = vmatmul.f32.gmra.mxu0 %v5537_v59 }
 0x41c   : > { %v5592_v16 = vpop.permute.xlu0 %1410 }
 0x41d   : > { %v1452_v38 = vmul.f32 %v3934_v63, %v5592_v16  ;;  %v1453_v63 = vmul.f32 %v3935_v3, %v5599_v40 }
 0x41f   : > { %v1467_v8 = vadd.f32 %v1466_v53, %v1452_v38  ;;  %v3939_v53 = vld [vmem:[%s8293_s3 + $0x170] sm:$0xff] }
 0x421   : > { %v1468_v51 = vadd.f32 %v1467_v8, %v1453_v63 }
 0x424   : > { %v1431_v6 = vpop.permute.xlu2 %1430 }
 0x425   : > { %v1456_v18 = vmul.f32 %v3938_v52, %v1431_v6  ;;  %v3924_v52 = vld [vmem:[%s8293_s3 + $0xf8] sm:$0xff] }
 0x42c   : > { %v5607_v34 = vpop.permute.xlu1 %1420 }
 0x42d   : > { %v1454_v22 = vmul.f32 %v3936_v32, %v5607_v34  ;;  %v3940_v32 = vld [vmem:[%s8293_s3 + $0x178] sm:$0xff] }
 0x42f   : > { %v1469_v35 = vadd.f32 %v1468_v51, %v1454_v22 }
 0x430   : > { %v5625_v20 = vpop.f32.mrf.mxu0 }
 0x434   : > { %v1426_v41 = vpop.permute.xlu0 %1425 }
 0x435   : > { %v1455_v28 = vmul.f32 %v3937_v7, %v1426_v41 }
 0x437   : > { %v1470_v45 = vadd.f32 %v1469_v35, %v1455_v28 }
 0x439   : > { %v1471_v8 = vadd.f32 %v1470_v45, %v1456_v18  ;;  %v3923_v45 = vld [vmem:[%s8293_s3 + $0xf0] sm:$0xff] }
 0x440   : > { %v5627_v9 = vpop.f32.mrf.mxu0 }
 0x444   : > { %v1436_v38 = vpop.permute.xlu1 %1435 }
 0x445   : > { %v1457_v3 = vmul.f32 %v3939_v53, %v1436_v38 }
 0x447   : > { %v1472_v63 = vadd.f32 %v1471_v8, %v1457_v3 }
 0x44c   : > { %v1441_v7 = vpop.permute.xlu0 %1440 }
 0x44d   : > { %v1458_v22 = vmul.f32 %v3940_v32, %v1441_v7 }
 0x44f   : > { %v1473_v51 = vadd.f32 %v1472_v63, %v1458_v22 }
 0x451   : > { %v1474_v39 = vrot.slane %v1473_v51, 4 }
 0x453   : > { %v1475_v54 = vadd.f32 %v1474_v39, %v1473_v51 }
 0x455   : > { %v1476_v15 = vrot.slane %v1475_v54, 2 }
 0x457   : > { %v1477_v13 = vadd.f32 %v1476_v15, %v1475_v54 }
 0x459   : > { %v1478_v42 = vrot.slane %v1477_v13, 1 }
 0x45b   : > { %v5629_v35 = vadd.f32 %v1478_v42, %v1477_v13  ;;  %v3922_v42 = vld [vmem:[%s8293_s3 + $0xe8] sm:$0xff] }
 0x45d   : > { %vm1543_vm2 = vcmp.gt.f32.partialorder %v5629_v35, %v1441_v7  ;;  %vm1575_vm3 = vcmp.eq.f32.partialorder %v5629_v35, %v1441_v7  ;;  %vm1542_vm5 = vcmp.gt.f32.partialorder %v5629_v35, %v1436_v38  ;;  %vm1574_vm4 = vcmp.eq.f32.partialorder %v5629_v35, %v1436_v38  ;;  %v5670_v7 = vpop.f32.mrf.mxu0 }
 0x45e   : > { %v1559_v18 = vsel %vm1543_vm2, %v5537_v59, 0.0  ;;  %v1591_v39 = vsel %vm1575_vm3, %v3924_v52, 0.0  ;;  %v1558_v54 = vsel %vm1542_vm5, %v5526_v48, 0.0  ;;  %v1590_v13 = vsel %vm1574_vm4, %v3923_v45, 0.0  ;;  %v3921_v59 = vld [vmem:[%s8293_s3 + $0xe0] sm:$0xff]  ;;  %v3920_v48 = vld [vmem:[%s8293_s3 + $0xd8] sm:$0xff] }
 0x45f   : > { %v1607_v15 = vadd.f32 %v1591_v39, %v1559_v18  ;;  %v1606_v28 = vadd.f32 %v1590_v13, %v1558_v54  ;;  %vm1541_vm6 = vcmp.gt.f32.partialorder %v5629_v35, %v1431_v6  ;;  %vm1573_vm7 = vcmp.eq.f32.partialorder %v5629_v35, %v1431_v6 }
 0x460   : > { %v1557_v53 = vsel %vm1541_vm6, %v5520_v36, 0.0  ;;  %v1589_v3 = vsel %vm1573_vm7, %v3922_v42, 0.0  ;;  %vm1540_vm8 = vcmp.gt.f32.partialorder %v5629_v35, %v1426_v41  ;;  %vm1572_vm2 = vcmp.eq.f32.partialorder %v5629_v35, %v1426_v41  ;;  %v3919_v36 = vld [vmem:[%s8293_s3 + $0xd0] sm:$0xff] }
 0x461   : > { %1638 = vadd.xlane.f32.xlu2 %v1607_v15  ;;  %1636 = vadd.xlane.f32.xlu1 %v1606_v28  ;;  %v1605_v38 = vadd.f32 %v1589_v3, %v1557_v53  ;;  %vm1539_vm3 = vcmp.gt.f32.partialorder %v5629_v35, %v5607_v34  ;;  %vm1571_vm4 = vcmp.eq.f32.partialorder %v5629_v35, %v5607_v34  ;;  %v1556_v6 = vsel %vm1540_vm8, %v5514_v10, 0.0 }
 0x462   : > { %vm1538_vm5 = vcmp.gt.f32.partialorder %v5629_v35, %v5599_v40  ;;  %vm1570_vm6 = vcmp.eq.f32.partialorder %v5629_v35, %v5599_v40  ;;  %v1588_v41 = vsel %vm1572_vm2, %v3921_v59, 0.0  ;;  %v1555_v32 = vsel %vm1539_vm3, %v5508_v43, 0.0  ;;  %v3918_v43 = vld [vmem:[%s8293_s3 + $0xc8] sm:$0xff]  ;;  %v3916_v40 = vld [vmem:[%s8293_s3 + $0xb8] sm:$0xff] }
 0x463   : > { %1634 = vadd.xlane.f32.xlu0 %v1605_v38  ;;  %v1587_v8 = vsel %vm1571_vm4, %v3920_v48, 0.0  ;;  %v1554_v34 = vsel %vm1538_vm5, %v5502_v46, 0.0  ;;  %v1586_v63 = vsel %vm1570_vm6, %v3919_v36, 0.0  ;;  %v1604_v22 = vadd.f32 %v1588_v41, %v1556_v6  ;;  %v3917_v46 = vld [vmem:[%s8293_s3 + $0xc0] sm:$0xff] }
 0x464   : > { %v1603_v51 = vadd.f32 %v1587_v8, %v1555_v32  ;;  %vm1537_vm7 = vcmp.gt.f32.partialorder %v5629_v35, %v5592_v16  ;;  %vm1569_vm9 = vcmp.eq.f32.partialorder %v5629_v35, %v5592_v16  ;;  %v1602_v10 = vadd.f32 %v1586_v63, %v1554_v34  ;;  %v469_v8 = vld [vmem:[%s8296_s6 + $0x1] sm:$0x1] }
 0x465   : > { %vm1536_vm8 = vcmp.gt.f32.partialorder %v5629_v35, %v5587_v33  ;;  %vm1568_vm2 = vcmp.eq.f32.partialorder %v5629_v35, %v5587_v33  ;;  %vm1535_vm3 = vcmp.gt.f32.partialorder %v5629_v35, %v5579_v44  ;;  %vm1567_vm4 = vcmp.eq.f32.partialorder %v5629_v35, %v5579_v44  ;;  %v5697_v39 = vpop.f32.mrf.mxu0 }
 0x466   : > { %v1553_v16 = vsel %vm1537_vm7, %v5496_v26, 0.0  ;;  %v1585_v52 = vsel %vm1569_vm9, %v3918_v43, 0.0  ;;  %v1552_v45 = vsel %vm1536_vm8, %v5490_v0, 0.0  ;;  %v1584_v42 = vsel %vm1568_vm2, %v3917_v46, 0.0  ;;  %v3915_v0 = vld [vmem:[%s8293_s3 + $0xb0] sm:$0xff]  ;;  %v3913_v26 = vld [vmem:[%s8293_s3 + $0xa0] sm:$0xff] }
 0x467   : > { %v1551_v18 = vsel %vm1535_vm3, %v5484_v30, 0.0  ;;  %v1583_v33 = vsel %vm1567_vm4, %v3916_v40, 0.0  ;;  %v1601_v54 = vadd.f32 %v1585_v52, %v1553_v16  ;;  %v1600_v13 = vadd.f32 %v1584_v42, %v1552_v45  ;;  %v3914_v30 = vld [vmem:[%s8293_s3 + $0xa8] sm:$0xff] }
 0x468   : > { %vm1534_vm5 = vcmp.gt.f32.partialorder %v5629_v35, %v5572_v19  ;;  %vm1566_vm6 = vcmp.eq.f32.partialorder %v5629_v35, %v5572_v19  ;;  %v1599_v44 = vadd.f32 %v1583_v33, %v1551_v18  ;;  %vm1533_vm9 = vcmp.gt.f32.partialorder %v5629_v35, %v5567_v11 }
 0x469   : > { %1632 = vadd.xlane.f32.xlu2 %v1604_v22  ;;  %1630 = vadd.xlane.f32.xlu1 %v1603_v51  ;;  %vm1565_vm7 = vcmp.eq.f32.partialorder %v5629_v35, %v5567_v11  ;;  %vm1532_vm8 = vcmp.gt.f32.partialorder %v5629_v35, %v5558_v27  ;;  %vm1564_vm2 = vcmp.eq.f32.partialorder %v5629_v35, %v5558_v27  ;;  %v1550_v19 = vsel %vm1534_vm5, %v5478_v23, 0.0  ;;  %v3912_v27 = vld [vmem:[%s8293_s3 + $0x98] sm:$0xff] }
 0x46a   : > { %v1582_v15 = vsel %vm1566_vm6, %v3915_v0, 0.0  ;;  %v1549_v28 = vsel %vm1533_vm9, %v5463_v62, 0.0  ;;  %v1581_v53 = vsel %vm1565_vm7, %v3914_v30, 0.0  ;;  %v1548_v3 = vsel %vm1532_vm8, %v5448_v29, 0.0  ;;  %v3911_v29 = vld [vmem:[%s8293_s3 + $0x90] sm:$0xff]  ;;  %v3910_v62 = vld [vmem:[%s8293_s3 + $0x88] sm:$0xff] }
 0x46b   : > { %1628 = vadd.xlane.f32.xlu0 %v1602_v10  ;;  %v1580_v11 = vsel %vm1564_vm2, %v3913_v26, 0.0  ;;  %v1598_v38 = vadd.f32 %v1582_v15, %v1550_v19  ;;  %v1597_v59 = vadd.f32 %v1581_v53, %v1549_v28  ;;  %vm1531_vm3 = vcmp.gt.f32.partialorder %v5629_v35, %v5553_v25 }
 0x46c   : > { %v1596_v48 = vadd.f32 %v1580_v11, %v1548_v3  ;;  %vm1563_vm4 = vcmp.eq.f32.partialorder %v5629_v35, %v5553_v25  ;;  %vm1530_vm5 = vcmp.gt.f32.partialorder %v5629_v35, %v5547_v24  ;;  %vm1562_vm6 = vcmp.eq.f32.partialorder %v5629_v35, %v5547_v24 }
 0x46d   : > { %v5723_v36 = vpop.f32.mrf.mxu0  ;;  %vm1529_vm9 = vcmp.gt.f32.partialorder %v5629_v35, %v5528_v49  ;;  %vm1561_vm7 = vcmp.eq.f32.partialorder %v5629_v35, %v5528_v49  ;;  %v1547_v25 = vsel %vm1531_vm3, %v5433_v2, 0.0  ;;  %v1579_v23 = vsel %vm1563_vm4, %v3912_v27, 0.0  ;;  %v3909_v49 = vld [vmem:[%s8293_s3 + $0x80] sm:$0xff] }
 0x46e   : > { %v1546_v6 = vsel %vm1530_vm5, %v5418_v57, 0.0  ;;  %v1578_v41 = vsel %vm1562_vm6, %v3911_v29, 0.0  ;;  %v1545_v32 = vsel %vm1529_vm9, %v5403_v31, 0.0  ;;  %v1577_v24 = vsel %vm1561_vm7, %v3910_v62, 0.0 }
 0x46f   : > { %v1595_v34 = vadd.f32 %v1579_v23, %v1547_v25  ;;  %v1594_v63 = vadd.f32 %v1578_v41, %v1546_v6  ;;  %v1593_v22 = vadd.f32 %v1577_v24, %v1545_v32  ;;  %vm1528_vm8 = vcmp.gt.f32.partialorder %v5629_v35, %v5542_v50 }
 0x470   : > { %vm1560_vm2 = vcmp.eq.f32.partialorder %v5629_v35, %v5542_v50  ;;  %v1208_v57 = vmul.f32 %v469_v8, %v469_v8  ;;  %vm1209_vm3 = vcmask 516096   ;;  %v1544_v2 = vsel %vm1528_vm8, %v5388_v56, 0.0 }
 0x471   : > { %1626 = vadd.xlane.f32.xlu2 %v1601_v54  ;;  %1624 = vadd.xlane.f32.xlu1 %v1600_v13  ;;  %v1576_v51 = vsel %vm1560_vm2, %v3909_v49, 0.0  ;;  %v4533_v27 = vmov 1.0   ;;  %v1487_v8 = vmul.f32 0.8, %v5723_v36 }
 0x472   : > { %v1210_v10 = vsel %vm1209_vm3, %v1208_v57, 0.0  ;;  %v1592_v43 = vadd.f32 %v1576_v51, %v1544_v2  ;;  %v1485_v51 = vmul.f32 0.8, %v5670_v7 }
 0x473   : > { %1622 = vadd.xlane.f32.xlu0 %v1599_v44  ;;  %v3964_v57 = vadd.f32 -0.0001, %v1487_v8 }
 0x475   : > { %v523_v31 = vpop.f32.mrf.mxu0 }
 0x476   : > { %v1488_v25 = vmul.f32 0.8, %v523_v31 }
 0x478   : > { %v3965_v37 = vadd.f32 -0.0001, %v1488_v25 }
 0x479   : > { %1620 = vadd.xlane.f32.xlu2 %v1598_v38  ;;  %1618 = vadd.xlane.f32.xlu1 %v1597_v59  ;;  %v8364_v59 = vmov 0.0  }
 0x47b   : > { %1616 = vadd.xlane.f32.xlu0 %v1596_v48 }
 0x47d   : > { %v526_v46 = vpop.f32.mrf.mxu0 }
 0x47e   : > { %v1489_v23 = vmul.f32 0.8, %v526_v46 }
 0x481   : > { %1614 = vadd.xlane.f32.xlu2 %v1595_v34  ;;  %1612 = vadd.xlane.f32.xlu1 %v1594_v63 }
 0x483   : > { %1610 = vadd.xlane.f32.xlu0 %v1593_v22  ;;  %v3966_v22 = vadd.f32 -0.0001, %v1489_v23 }
 0x485   : > { %v529_v40 = vpop.f32.mrf.mxu0  ;;  %v5833_v21 = vceil.f32 %v3966_v22 }
 0x486   : > { %v1490_v28 = vmul.f32 0.8, %v529_v40 }
 0x487   : > { %8565 = vst [vmem:[#allocation52_spill] sm:$0xff] %v5833_v21 }
 0x488   : > { %v3967_v17 = vadd.f32 -0.0001, %v1490_v28 }
 0x489   : > { %1211 = vadd.xlane.f32.xlu1 %v1210_v10  ;;  %1608 = vadd.xlane.f32.xlu2 %v1592_v43  ;;  %v1486_v10 = vmul.f32 0.8, %v5697_v39  ;;  %v5831_v43 = vceil.f32 %v3965_v37  ;;  %v3962_v39 = vadd.f32 -0.0001, %v1485_v51 }
 0x48a   : > { %v5798_v34 = vceil.f32 %v3967_v17 }
 0x48b   : > { %8564 = vst [vmem:[#allocation51_spill] sm:$0xff] %v5831_v43 }
 0x48c   : > { %8559 = vst [vmem:[#allocation46_spill] sm:$0xff] %v5798_v34 }
 0x48d   : > { %v532_v16 = vpop.f32.mrf.mxu0 }
 0x48e   : > { %v1491_v56 = vmul.f32 0.8, %v532_v16  ;;  %v1484_v16 = vmul.f32 0.8, %v5627_v9 }
 0x490   : > { %v3968_v11 = vadd.f32 -0.0001, %v1491_v56 }
 0x492   : > { %v5790_v6 = vceil.f32 %v3968_v11 }
 0x495   : > { %v535_v52 = vpop.f32.mrf.mxu0 }
 0x496   : > { %v1492_v0 = vmul.f32 0.8, %v535_v52  ;;  %v5837_v52 = vceil.f32 %v3964_v57 }
 0x498   : > { %v3969_v38 = vadd.f32 -0.0001, %v1492_v0  ;;  %8566 = vst [vmem:[#allocation53_spill] sm:$0xff] %v5837_v52 }
 0x49a   : > { %v5792_v41 = vceil.f32 %v3969_v38  ;;  %v8585_v38 = vld [vmem:[#allocation42_spill] sm:$0xff] }
 0x49c   : > { %8558 = vst [vmem:[#allocation45_spill] sm:$0xff] %v5792_v41 }
 0x49d   : > { %v538_v45 = vpop.f32.mrf.mxu0 }
 0x49e   : > { %v1493_v33 = vmul.f32 0.8, %v538_v45  ;;  %v3963_v45 = vadd.f32 -0.0001, %v1486_v10 }
 0x4a0   : > { %v3970_v44 = vadd.f32 -0.0001, %v1493_v33  ;;  %v5864_v33 = vceil.f32 %v3962_v39  ;;  %v4386_v39 = vld [vmem:[%s4712_s24] sm:$0xff] }
 0x4a2   : > { %v5765_v53 = vceil.f32 %v3970_v44  ;;  %8572 = vst [vmem:[#allocation56_spill] sm:$0xff] %v5864_v33 }
 0x4a5   : > { %v541_v42 = vpop.f32.mrf.mxu0 }
 0x4a6   : > { %v1494_v50 = vmul.f32 0.8, %v541_v42 }
 0x4a8   : > { %v3971_v54 = vadd.f32 -0.0001, %v1494_v50  ;;  %v1482_v50 = vmul.f32 0.8, %v5620_v4  ;;  %v1481_v4 = vmul.f32 0.8, %v5597_v14 }
 0x4aa   : > { %v5761_v30 = vceil.f32 %v3971_v54  ;;  %v5866_v54 = vceil.f32 %v3963_v45  ;;  %v3958_v28 = vadd.f32 -0.0001, %v1481_v4  ;;  %v4392_v4 = vld [vmem:[%s4712_s24 + $0x30] sm:$0xff] }
 0x4ac   : > { %8573 = vst [vmem:[#allocation57_spill] sm:$0xff] %v5866_v54  ;;  %v5913_v23 = vceil.f32 %v3958_v28 }
 0x4ad   : > { %v544_v18 = vpop.f32.mrf.mxu0 }
 0x4ae   : > { %v1495_v35 = vmul.f32 0.8, %v544_v18  ;;  %v3961_v18 = vadd.f32 -0.0001, %v1484_v16  ;;  %8588 = vst [vmem:[#allocation61_spill] sm:$0xff] %v5913_v23 }
 0x4b0   : > { %v3972_v13 = vadd.f32 -0.0001, %v1495_v35  ;;  %v1483_v35 = vmul.f32 0.8, %v5625_v20  ;;  %v3959_v20 = vadd.f32 -0.0001, %v1482_v50 }
 0x4b2   : > { %v5763_v26 = vceil.f32 %v3972_v13  ;;  %v3960_v0 = vadd.f32 -0.0001, %v1483_v35  ;;  %v5906_v17 = vceil.f32 %v3959_v20  ;;  %v4388_v35 = vld [vmem:[%s4712_s24 + $0x10] sm:$0xff]  ;;  %v4393_v20 = vld [vmem:[%s4712_s24 + $0x38] sm:$0xff] }
 0x4d4   : > { %v1639_v19 = vpop.xlane.xlu2 %1638  ;;  %v1637_v15 = vpop.xlane.xlu1 %1636 }
 0x4d5   : > { %vm1655_vm4 = vcmp.lt.f32.partialorder %v1639_v19, %v5763_v26  ;;  %vm1654_vm5 = vcmp.lt.f32.partialorder %v1637_v15, %v5761_v30 }
 0x4d6   : > { %vm1671_vm6 = vmand %vm1655_vm4, %vm1346_vm1  ;;  %v1635_v3 = vpop.xlane.xlu0 %1634 }
 0x4d7   : > { %v5772_v48 = vsel %vm1671_vm6, 1.0, %v8364_v59  ;;  %vm1670_vm9 = vmand %vm1654_vm5, %vm1345_vm0  ;;  %vm1653_vm7 = vcmp.lt.f32.partialorder %v1635_v3, %v5765_v53  ;;  %3973 = vmatpush.msk.msrb.mxu0 %vm1671_vm6, %v4533_v27  ;;  %v8581_v3 = vld [vmem:[#allocation29_spill] sm:$0xff] }
 0x4d8   : > { %8554 = vst [vmem:[#allocation43_spill] sm:$0xff] %v5772_v48  ;;  %v5779_v29 = vsel %vm1670_vm9, 1.0, %v8364_v59  ;;  %vm5786_vm1 = vmand %vm1653_vm7, %vm1344_vm15 }
 0x4d9   : > { %8555 = vst [vmem:[#allocation44_spill] sm:$0xff] %v5779_v29  ;;  %3974 = vmatpush.msk.msrb.mxu0 %vm1670_vm9, %v4533_v27  ;;  %v4084_v62 = vpack.i.bf16 %v5779_v29, %v5772_v48  ;;  %v5807_v49 = vsel %vm5786_vm1, 1.0, %v8364_v59 }
 0x4da   : > { %8560 = vst [vmem:[#allocation47_spill] sm:$0xff] %v5807_v49 }
 0x4db   : > { %4085 = vperm.xlu0 %4083, %v4084_v62   ;;  %3975 = vmatpush.msk.msrb.mxu0 %vm5786_vm1, %v4533_v27  ;;  %8586 = vst [vmem:[#allocation29_spill] sm:$0xff] %v5906_v17  ;;  %v5908_v62 = vceil.f32 %v3960_v0  ;;  %v4394_v0 = vld [vmem:[%s4712_s24 + $0x40] sm:$0xff] }
 0x4dc   : > { %v1633_v32 = vpop.xlane.xlu2 %1632  ;;  %v1631_v24 = vpop.xlane.xlu1 %1630 }
 0x4dd   : > { %vm1652_vm15 = vcmp.lt.f32.partialorder %v1633_v32, %v5792_v41  ;;  %vm1651_vm0 = vcmp.lt.f32.partialorder %v1631_v24, %v5790_v6  ;;  %8587 = vst [vmem:[#allocation42_spill] sm:$0xff] %v5908_v62  ;;  %v8589_v32 = vld [vmem:[#allocation25_spill] sm:$0xff] }
 0x4de   : > { %vm1668_vm8 = vmand %vm1652_vm15, %vm1343_vm14  ;;  %v1629_v63 = vpop.xlane.xlu0 %1628  ;;  %vm8575_vm15 = vcmp.gt.f32.partialorder %v5350_v5, 0.0 }
 0x4df   : > { %v5810_v31 = vsel %vm1668_vm8, 1.0, %v8364_v59  ;;  %vm1667_vm2 = vmand %vm1651_vm0, %vm1342_vm13  ;;  %vm1650_vm4 = vcmp.lt.f32.partialorder %v1629_v63, %v5798_v34  ;;  %3976 = vmatpush.msk.msrb.mxu0 %vm1668_vm8, %v4533_v27  ;;  %v8593_v63 = vld [vmem:[#allocation28_spill] sm:$0xff] }
 0x4e0   : > { %8561 = vst [vmem:[#allocation48_spill] sm:$0xff] %v5810_v31  ;;  %v5817_v58 = vsel %vm1667_vm2, 1.0, %v8364_v59  ;;  %vm1666_vm14 = vmand %vm1650_vm4, %vm1341_vm12  ;;  %v4089_v36 = vpack.i.bf16 %v5810_v31, %v5807_v49 }
 0x4e1   : > { %8562 = vst [vmem:[#allocation49_spill] sm:$0xff] %v5817_v58  ;;  %v5824_v2 = vsel %vm1666_vm14, 1.0, %v8364_v59  ;;  %3977 = vmatpush.msk.msrb.mxu0 %vm1667_vm2, %v4533_v27  ;;  %vm8578_vm2 = vcmp.gt.f32.partialorder %v5341_v12, 0.0  ;;  %v1480_v12 = vmul.f32 0.8, %v8585_v38 }
 0x4e2   : > { %8563 = vst [vmem:[#allocation50_spill] sm:$0xff] %v5824_v2  ;;  %4090 = vperm.xlu1 %4082, %v4089_v36   ;;  %v4094_v47 = vpack.i.bf16 %v5824_v2, %v5817_v58  ;;  %v8597_v36 = vld [vmem:[#allocation24_spill] sm:$0xff] }
 0x4e3   : > { %3978 = vmatpush.msk.msrb.mxu0 %vm1666_vm14, %v4533_v27  ;;  %vm8582_vm14 = vcmp.gt.f32.partialorder %v8581_v3, 0.0  ;;  %v3957_v37 = vadd.f32 -0.0001, %v1480_v12  ;;  %v4395_v12 = vld [vmem:[%s4712_s24 + $0x48] sm:$0xff] }
 0x4e4   : > { %4095 = vperm.xlu0 %4083, %v4094_v47   ;;  %v1627_v46 = vpop.xlane.xlu2 %1626  ;;  %v1625_v40 = vpop.xlane.xlu1 %1624 }
 0x4e5   : > { %vm1649_vm12 = vcmp.lt.f32.partialorder %v1627_v46, %v5833_v21  ;;  %vm1648_vm13 = vcmp.lt.f32.partialorder %v1625_v40, %v5831_v43  ;;  %v5942_v47 = vceil.f32 %v3957_v37  ;;  %v8602_v40 = vld [vmem:[#allocation22_spill] sm:$0xff] }
 0x4e6   : > { %vm1665_vm5 = vmand %vm1649_vm12, %vm1340_vm11  ;;  %v1623_v7 = vpop.xlane.xlu0 %1622  ;;  %vm8569_vm11 = vcmp.gt.f32.partialorder %v5359_v1, 0.0  ;;  %v5872_v1 = vceil.f32 %v3961_v18  ;;  %v4397_v37 = vld [vmem:[%s4712_s24 + $0x58] sm:$0xff] }
 0x4e7   : > { %v5844_v42 = vsel %vm1665_vm5, 1.0, %v8364_v59  ;;  %vm1664_vm6 = vmand %vm1648_vm13, %vm1339_vm10  ;;  %vm1647_vm9 = vcmp.lt.f32.partialorder %v1623_v7, %v5837_v52  ;;  %3979 = vmatpush.msk.msrb.mxu0 %vm1665_vm5, %v4533_v27  ;;  %8601 = vst [vmem:[#allocation25_spill] sm:$0xff] %v5942_v47 }
 0x4e8   : > { %8567 = vst [vmem:[#allocation54_spill] sm:$0xff] %v5844_v42  ;;  %v5851_v9 = vsel %vm1664_vm6, 1.0, %v8364_v59  ;;  %vm5859_vm7 = vmand %vm1647_vm9, %vm8569_vm11 }
 0x4e9   : > { %8568 = vst [vmem:[#allocation55_spill] sm:$0xff] %v5851_v9  ;;  %3980 = vmatpush.msk.msrb.mxu0 %vm1664_vm6, %v4533_v27  ;;  %v4099_v61 = vpack.i.bf16 %v5851_v9, %v5844_v42  ;;  %v5881_v19 = vsel %vm5859_vm7, 1.0, %v8364_v59  ;;  %vm8590_vm6 = vcmp.gt.f32.partialorder %v8589_v32, 0.0 }
 0x4ea   : > { %8574 = vst [vmem:[#allocation58_spill] sm:$0xff] %v5872_v1 }
 0x4eb   : > { %3981 = vmatpush.msk.msrb.mxu0 %vm5859_vm7, %v4533_v27  ;;  %8576 = vst [vmem:[#allocation59_spill] sm:$0xff] %v5881_v19  ;;  %vm8594_vm7 = vcmp.gt.f32.partialorder %v8593_v63, 0.0  ;;  %v4398_v63 = vld [vmem:[%s4712_s24 + $0x60] sm:$0xff] }
 0x4ec   : > { %4100 = vperm.xlu0 %4083, %v4099_v61   ;;  %v1621_v13 = vpop.xlane.xlu2 %1620  ;;  %v1619_v44 = vpop.xlane.xlu1 %1618 }
 0x4ed   : > { %vm1646_vm10 = vcmp.lt.f32.partialorder %v1621_v13, %v5866_v54  ;;  %vm1645_vm1 = vcmp.lt.f32.partialorder %v1619_v44, %v5864_v33  ;;  %v4389_v13 = vld [vmem:[%s4712_s24 + $0x18] sm:$0xff]  ;;  %v4390_v44 = vld [vmem:[%s4712_s24 + $0x20] sm:$0xff] }
 0x4ee   : > { %vm1662_vm0 = vmand %vm1646_vm10, %vm8575_vm15  ;;  %v1617_v56 = vpop.xlane.xlu0 %1616 }
 0x4ef   : > { %v5884_v15 = vsel %vm1662_vm0, 1.0, %v8364_v59  ;;  %vm1644_vm8 = vcmp.lt.f32.partialorder %v1617_v56, %v5872_v1  ;;  %3982 = vmatpush.msk.msrb.mxu0 %vm1662_vm0, %v4533_v27  ;;  %vm5890_vm4 = vmand %vm1645_vm1, %vm8578_vm2  ;;  %vm8598_vm1 = vcmp.gt.f32.partialorder %v8597_v36, 0.0  ;;  %v4399_v36 = vld [vmem:[%s4712_s24 + $0x68] sm:$0xff] }
 0x4f0   : > { %8577 = vst [vmem:[#allocation60_spill] sm:$0xff] %v5884_v15  ;;  %v4104_v5 = vpack.i.bf16 %v5884_v15, %v5881_v19  ;;  %vm5901_vm12 = vmand %vm1644_vm8, %vm8582_vm14  ;;  %vm8603_vm8 = vcmp.gt.f32.partialorder %v8602_v40, 0.0 }
 0x4f1   : > { %3983 = vmatpush.msk.msrb.mxu0 %vm5890_vm4, %v4533_v27 }
 0x4f3   : > { %3984 = vmatpush.msk.msrb.mxu0 %vm5901_vm12, %v4533_v27 }
 0x4f4   : > { %4105 = vperm.xlu0 %4083, %v4104_v5   ;;  %v1615_v25 = vpop.xlane.xlu2 %1614  ;;  %v1613_v55 = vpop.xlane.xlu1 %1612 }
 0x4f5   : > { %vm1643_vm13 = vcmp.lt.f32.partialorder %v1615_v25, %v5908_v62  ;;  %vm1642_vm5 = vcmp.lt.f32.partialorder %v1613_v55, %v5906_v17 }
 0x4f6   : > { %vm5919_vm9 = vmand %vm1643_vm13, %vm8590_vm6  ;;  %v1611_v8 = vpop.xlane.xlu0 %1610 }
 0x4f7   : > { %vm1641_vm11 = vcmp.lt.f32.partialorder %v1611_v8, %v5913_v23  ;;  %3985 = vmatpush.msk.msrb.mxu0 %vm5919_vm9, %v4533_v27  ;;  %vm5929_vm10 = vmand %vm1642_vm5, %vm8594_vm7  ;;  %v4396_v8 = vld [vmem:[%s4712_s24 + $0x50] sm:$0xff] }
 0x4f8   : > { %vm5938_vm15 = vmand %vm1641_vm11, %vm8598_vm1 }
 0x4f9   : > { %3986 = vmatpush.msk.msrb.mxu0 %vm5929_vm10, %v4533_v27 }
 0x4fb   : > { %3987 = vmatpush.msk.msrb.mxu0 %vm5938_vm15, %v4533_v27 }
 0x4fc   : > { %v1212_v51 = vpop.xlane.xlu1 %1211  ;;  %v1609_v10 = vpop.xlane.xlu2 %1608 }
 0x4fd   : > { %v1213_v46 = vrot.slane %v1212_v51, 4  ;;  %vm1640_vm0 = vcmp.lt.f32.partialorder %v1609_v10, %v5942_v47  ;;  %v4401_v10 = vld [vmem:[%s4712_s24 + $0x78] sm:$0xff] }
 0x4fe   : > { %vm5950_vm2 = vmand %vm1640_vm0, %vm8603_vm8 }
 0x4ff   : > { %v1214_v7 = vadd.f32 %v1213_v46, %v1212_v51  ;;  %3988 = vmatpush.msk.msrb.mxu0 %vm5950_vm2, %v4533_v27  ;;  %v4391_v27 = vld [vmem:[%s4712_s24 + $0x28] sm:$0xff]  ;;  %v4400_v51 = vld [vmem:[%s4712_s24 + $0x70] sm:$0xff] }
 0x500   : > { %2188 = vmatmul.f32.vlgmr.msrb.gmra.mxu0 %v4386_v39 }
 0x501   : > { %v1215_v45 = vrot.slane %v1214_v7, 2 }
 0x503   : > { %v1216_v18 = vadd.f32 %v1215_v45, %v1214_v7 }
 0x505   : > { %v1217_v61 = vrot.slane %v1216_v18, 1 }
 0x507   : > { %v1218_v50 = vadd.f32 %v1217_v61, %v1216_v18 }
 0x508   : > { %2191 = vmatmul.f32.gmra.mxu0 %v4387_v60 }
 0x509   : > { %4031 = vpush %v1218_v50 }
 0x510   : > { %2194 = vmatmul.f32.gmra.mxu0 %v4388_v35 }
 0x518   : > { %2197 = vmatmul.f32.gmra.mxu0 %v4389_v13 }
 0x520   : > { %2200 = vmatmul.f32.gmra.mxu0 %v4390_v44 }
 0x528   : > { %2203 = vmatmul.f32.gmra.mxu0 %v4391_v27 }
 0x530   : > { %2206 = vmatmul.f32.gmra.mxu0 %v4392_v4 }
 0x538   : > { %2209 = vmatmul.f32.gmra.mxu0 %v4393_v20 }
 0x53a   : > { %s4032_s21 = spop %4031 }
 0x53b   : > { %v1220_v56 = vstv %s4032_s21 }
 0x53c   : > { %4202 = vrsqrt.f32 %v1220_v56  ;;  %vm1227_vm14 = vweird.f32 %v1220_v56 }
 0x540   : > { %2212 = vmatmul.f32.gmra.mxu0 %v4394_v0 }
 0x542   : > { %v4203_v5 = vpop.eup %4202 }
 0x543   : > { %v1222_v28 = vmul.f32 %v4203_v5, %v1220_v56  ;;  %vm1228_vm13 = vweird.f32 %v4203_v5 }
 0x544   : > { %vm1229_vm5 = vmor %vm1227_vm14, %vm1228_vm13 }
 0x545   : > { %v1223_v3 = vmul.f32 %v4203_v5, %v1222_v28 }
 0x547   : > { %v1224_v38 = vmul.f32 0.5, %v1223_v3 }
 0x548   : > { %2215 = vmatmul.f32.gmra.mxu0 %v4395_v12 }
 0x549   : > { %v1225_v25 = vsub.f32 1.5, %v1224_v38 }
 0x54b   : > { %v1226_v55 = vmul.f32 %v4203_v5, %v1225_v25 }
 0x54d   : > { %v1230_v32 = vsel %vm1229_vm5, %v4203_v5, %v1226_v55 }
 0x54e   : > { %4033 = vpush %v1230_v32 }
 0x550   : > { %2218 = vmatmul.f32.gmra.mxu0 %v4396_v8 }
 0x558   : > { %2221 = vmatmul.f32.gmra.mxu0 %v4397_v37 }
 0x560   : > { %2224 = vmatmul.f32.gmra.mxu0 %v4398_v63 }
 0x568   : > { %2227 = vmatmul.f32.gmra.mxu0 %v4399_v36 }
 0x570   : > { %2230 = vmatmul.f32.gmra.mxu0 %v4400_v51 }
 0x578   : > { %2233 = vmatmul.f32.gmra.mxu0 %v4401_v10 }
 0x57d   : > { %v5973_v46 = vpop.f32.mrf.mxu0 }
 0x57f   : > { %s4034_s26 = spop %4033 }
 0x585   : > { %v5975_v40 = vpop.f32.mrf.mxu0 }
 0x58d   : > { %v5977_v7 = vpop.f32.mrf.mxu0 }
 0x595   : > { %v5979_v39 = vpop.f32.mrf.mxu0 }
 0x59d   : > { %v2201_v45 = vpop.f32.mrf.mxu0 }
 0x5a5   : > { %v5981_v18 = vpop.f32.mrf.mxu0 }
 0x5ad   : > { %v2207_v61 = vpop.f32.mrf.mxu0 }
 0x5ae   : > { %v5989_v51 = vadd.f32 %v2207_v61, %v5884_v15  ;;  %v5999_v61 = vsel %vm5901_vm12, 1.0, %v8364_v59 }
 0x5af   : > { %8606 = vst [vmem:[#allocation28_spill] sm:$0xff] %v5999_v61 }
 0x5b5   : > { %v5983_v50 = vpop.f32.mrf.mxu0 }
 0x5bd   : > { %v2213_v60 = vpop.f32.mrf.mxu0 }
 0x5be   : > { %v2214_v35 = vadd.f32 %v2213_v60, %v5851_v9 }
 0x5c0   : > { %4204 = vrsqrt.f32 %v2214_v35  ;;  %vm2339_vm11 = vweird.f32 %v2214_v35  ;;  %vm2245_vm1 = vcmp.gt.f32.partialorder %v2214_v35, 0.0 }
 0x5c5   : > { %v2216_v13 = vpop.f32.mrf.mxu0 }
 0x5c6   : > { %v4205_v44 = vpop.eup %4204  ;;  %v2217_v27 = vadd.f32 %v2216_v13, %v5844_v42 }
 0x5c7   : > { %v2334_v4 = vmul.f32 %v4205_v44, %v2214_v35  ;;  %vm2340_vm6 = vweird.f32 %v4205_v44 }
 0x5c8   : > { %4206 = vrsqrt.f32 %v2217_v27  ;;  %vm2341_vm7 = vmor %vm2339_vm11, %vm2340_vm6  ;;  %vm2349_vm8 = vweird.f32 %v2217_v27  ;;  %vm2246_vm13 = vcmp.gt.f32.partialorder %v2217_v27, 0.0 }
 0x5c9   : > { %v2335_v20 = vmul.f32 %v4205_v44, %v2334_v4 }
 0x5cb   : > { %v2336_v56 = vmul.f32 0.5, %v2335_v20 }
 0x5cd   : > { %v2219_v0 = vpop.f32.mrf.mxu0  ;;  %v2337_v5 = vsub.f32 1.5, %v2336_v56  ;;  %v6002_v56 = vadd.f32 %v2201_v45, %v5999_v61  ;;  %v6017_v45 = vmax.f32 %v5906_v17, 1.0 }
 0x5ce   : > { %v4207_v28 = vpop.eup %4206  ;;  %v2220_v3 = vadd.f32 %v2219_v0, %v5824_v2 }
 0x5cf   : > { %v2344_v38 = vmul.f32 %v4207_v28, %v2217_v27  ;;  %v2338_v12 = vmul.f32 %v4205_v44, %v2337_v5  ;;  %vm2350_vm0 = vweird.f32 %v4207_v28  ;;  %v6005_v27 = vmax.f32 %v5942_v47, 1.0  ;;  %8607 = vst [vmem:[#allocation24_spill] sm:$0xff] %v6017_v45 }
 0x5d0   : > { %4208 = vrsqrt.f32 %v2220_v3  ;;  %vm2351_vm14 = vmor %vm2349_vm8, %vm2350_vm0  ;;  %vm2359_vm12 = vweird.f32 %v2220_v3  ;;  %vm2247_vm11 = vcmp.gt.f32.partialorder %v2220_v3, 0.0 }
 0x5d1   : > { %v2342_v25 = vsel %vm2341_vm7, %v4205_v44, %v2338_v12  ;;  %v2345_v55 = vmul.f32 %v4207_v28, %v2344_v38  ;;  %v6011_v12 = vmax.f32 %v5913_v23, 1.0 }
 0x5d2   : > { %v2421_v32 = vsel %vm2245_vm1, %v2342_v25, 0.0 }
 0x5d3   : > { %2471 = vperm.xlu1 %4082, %v2421_v32   ;;  %v2346_v8 = vmul.f32 0.5, %v2345_v55  ;;  %v6020_v32 = vmax.f32 %v5908_v62, 1.0 }
 0x5d5   : > { %v2222_v37 = vpop.f32.mrf.mxu0  ;;  %v2347_v63 = vsub.f32 1.5, %v2346_v8 }
 0x5d6   : > { %v4209_v36 = vpop.eup %4208  ;;  %v5992_v10 = vadd.f32 %v2222_v37, %v5817_v58 }
 0x5d7   : > { %v2354_v60 = vmul.f32 %v4209_v36, %v2220_v3  ;;  %v2348_v13 = vmul.f32 %v4207_v28, %v2347_v63  ;;  %vm2360_vm5 = vweird.f32 %v4209_v36  ;;  %v6026_v63 = vmax.f32 %v5872_v1, 1.0 }
 0x5d8   : > { %4210 = vrsqrt.f32 %v5992_v10  ;;  %vm2361_vm6 = vmor %vm2359_vm12, %vm2360_vm5  ;;  %v6036_v3 = vsel %vm5929_vm10, 1.0, %v8364_v59  ;;  %vm2369_vm10 = vweird.f32 %v5992_v10  ;;  %vm2248_vm0 = vcmp.gt.f32.partialorder %v5992_v10, 0.0 }
 0x5d9   : > { %v2352_v35 = vsel %vm2351_vm14, %v4207_v28, %v2348_v13  ;;  %v2355_v44 = vmul.f32 %v4209_v36, %v2354_v60  ;;  %4212 = vrsqrt.f32 %v5989_v51  ;;  %8608 = vst [vmem:[#allocation22_spill] sm:$0xff] %v6036_v3 }
 0x5da   : > { %v2422_v4 = vsel %vm2246_vm13, %v2352_v35, 0.0 }
 0x5db   : > { %2476 = vperm.xlu2 %4081, %v2422_v4   ;;  %v2356_v20 = vmul.f32 0.5, %v2355_v44 }
 0x5dd   : > { %v2225_v0 = vpop.f32.mrf.mxu0  ;;  %v2357_v5 = vsub.f32 1.5, %v2356_v20  ;;  %v6040_v20 = vmax.f32 %v5763_v26, 1.0 }
 0x5de   : > { %v4211_v38 = vpop.eup %4210  ;;  %v6008_v28 = vadd.f32 %v2225_v0, %v5810_v31  ;;  %v6044_v0 = vadd.f32 %v5977_v7, %v6036_v3  ;;  %v6106_v31 = vmax.f32 %v5792_v41, 1.0 }
 0x5df   : > { %v2364_v11 = vmul.f32 %v4211_v38, %v5992_v10  ;;  %v2358_v25 = vmul.f32 %v4209_v36, %v2357_v5  ;;  %v6014_v55 = vpop.eup %4212  ;;  %vm2370_vm7 = vweird.f32 %v4211_v38 }
 0x5e0   : > { %4214 = vrsqrt.f32 %v6008_v28  ;;  %v2314_v13 = vmul.f32 %v6014_v55, %v5989_v51  ;;  %vm2371_vm1 = vmor %vm2369_vm10, %vm2370_vm7  ;;  %vm2379_vm14 = vweird.f32 %v6008_v28  ;;  %vm2249_vm5 = vcmp.gt.f32.partialorder %v6008_v28, 0.0 }
 0x5e1   : > { %4216 = vrsqrt.f32 %v6002_v56  ;;  %v2362_v8 = vsel %vm2361_vm6, %v4209_v36, %v2358_v25  ;;  %v2365_v37 = vmul.f32 %v4211_v38, %v2364_v11  ;;  %vm2320_vm12 = vweird.f32 %v6014_v55 }
 0x5e2   : > { %4218 = vrcp.f32 %v6005_v27  ;;  %v2423_v60 = vsel %vm2247_vm11, %v2362_v8, 0.0  ;;  %v2315_v8 = vmul.f32 %v6014_v55, %v2314_v13  ;;  %v6069_v13 = vmax.f32 %v5837_v52, 1.0 }
 0x5e3   : > { %4220 = vrcp.f32 %v6011_v12  ;;  %2481 = vperm.xlu1 %4082, %v2423_v60   ;;  %v2366_v35 = vmul.f32 0.5, %v2365_v37  ;;  %v6057_v60 = vmax.f32 %v5864_v33, 1.0  ;;  %vm2319_vm11 = vweird.f32 %v5989_v51 }
 0x5e4   : > { %4222 = vrcp.f32 %v6020_v32  ;;  %v2316_v10 = vmul.f32 0.5, %v2315_v8  ;;  %v6094_v8 = vadd.f32 %v5983_v50, %v5881_v19 }
 0x5e5   : > { %4224 = vrcp.f32 %v6017_v45  ;;  %v2228_v36 = vpop.f32.mrf.mxu0  ;;  %v2367_v44 = vsub.f32 1.5, %v2366_v35  ;;  %v6063_v35 = vmax.f32 %v5866_v54, 1.0  ;;  %v6235_v45 = vmax.f32 %v5798_v34, 1.0 }
 0x5e6   : > { %v4215_v4 = vpop.eup %4214  ;;  %4226 = vrcp.f32 %v6026_v63  ;;  %v6047_v5 = vadd.f32 %v2228_v36, %v5807_v49  ;;  %v2317_v54 = vsub.f32 1.5, %v2316_v10 }
 0x5e7   : > { %v6049_v11 = vpop.eup %4216  ;;  %v2374_v22 = vmul.f32 %v4215_v4, %v6008_v28  ;;  %v2368_v25 = vmul.f32 %v4211_v38, %v2367_v44  ;;  %vm2380_vm8 = vweird.f32 %v4215_v4 }
 0x5e8   : > { %v6054_v37 = vpop.eup %4218  ;;  %4228 = vrsqrt.f32 %v6047_v5  ;;  %v2294_v47 = vmul.f32 %v6049_v11, %v6002_v56  ;;  %vm2381_vm13 = vmor %vm2379_vm14, %vm2380_vm8  ;;  %v2318_v19 = vmul.f32 %v6014_v55, %v2317_v54  ;;  %vm2300_vm10 = vweird.f32 %v6049_v11 }
 0x5e9   : > { %v6060_v7 = vpop.eup %4220  ;;  %v2372_v36 = vsel %vm2371_vm1, %v4211_v38, %v2368_v25  ;;  %v2375_v44 = vmul.f32 %v4215_v4, %v2374_v22  ;;  %4230 = vrcp.f32 %v6040_v20  ;;  %v6082_v22 = vmul.f32 %v6054_v37, %v6005_v27 }
 0x5ea   : > { %v6066_v59 = vpop.eup %4222  ;;  %v2424_v23 = vsel %vm2248_vm0, %v2372_v36, 0.0  ;;  %4232 = vrsqrt.f32 %v6044_v0  ;;  %v2295_v33 = vmul.f32 %v6049_v11, %v2294_v47  ;;  %vm2250_vm1 = vcmp.gt.f32.partialorder %v6047_v5, 0.0 }
 0x5eb   : > { %v6074_v17 = vpop.eup %4224  ;;  %2486 = vperm.xlu2 %4081, %v2424_v23   ;;  %v2376_v62 = vmul.f32 0.5, %v2375_v44  ;;  %4234 = vrcp.f32 %v6057_v60  ;;  %v6087_v36 = vmul.f32 %v6066_v59, %v6020_v32  ;;  %v1818_v50 = vsub.f32 1.0, %v6082_v22 }
 0x5ec   : > { %8609 = vst [vmem:[#allocation62_spill] sm:$0xff] %v6074_v17  ;;  %v6077_v38 = vpop.eup %4226  ;;  %4236 = vrcp.f32 %v6063_v35  ;;  %v2296_v2 = vmul.f32 0.5, %v2295_v33  ;;  %vm2243_vm0 = vcmp.gt.f32.partialorder %v5989_v51, 0.0  ;;  %vm2299_vm8 = vweird.f32 %v6002_v56 }
 0x5ed   : > { %v2231_v25 = vpop.f32.mrf.mxu0  ;;  %v2377_v1 = vsub.f32 1.5, %v2376_v62  ;;  %4238 = vrcp.f32 %v6069_v13  ;;  %vm6205_vm14 = vmor %vm2299_vm8, %vm2300_vm10 }
 0x5ee   : > { %v6089_v23 = vpop.eup %4228  ;;  %v6097_v44 = vadd.f32 %v2231_v25, %v5779_v29  ;;  %v1863_v29 = vsub.f32 1.0, %v6087_v36  ;;  %v8610_v36 = vmov 0.0   ;;  %v2297_v42 = vsub.f32 1.5, %v2296_v2 }
 0x5ef   : > { %v2384_v62 = vmul.f32 %v6089_v23, %v6047_v5  ;;  %v2378_v52 = vmul.f32 %v4215_v4, %v2377_v1  ;;  %v6103_v49 = vpop.eup %4230  ;;  %v6137_v54 = vsel %vm5890_vm4, 1.0, %v8610_v36  ;;  %vm2390_vm6 = vweird.f32 %v6089_v23  ;;  %vm6155_vm4 = vmor %vm2319_vm11, %vm2320_vm12 }
 0x5f0   : > { %4240 = vrsqrt.f32 %v6097_v44  ;;  %v6110_v25 = vpop.eup %4232  ;;  %v6131_v33 = vmul.f32 %v6103_v49, %v6040_v20  ;;  %8611 = vst [vmem:[#allocation63_spill] sm:$0xff] %v6137_v54  ;;  %v6186_v17 = vsel %vm5919_vm9, 1.0, %v8610_v36  ;;  %vm2251_vm12 = vcmp.gt.f32.partialorder %v6097_v44, 0.0 }
 0x5f1   : > { %v2382_v47 = vsel %vm2381_vm13, %v4215_v4, %v2378_v52  ;;  %v2385_v1 = vmul.f32 %v6089_v23, %v2384_v62  ;;  %v6115_v10 = vpop.eup %4234  ;;  %4242 = vrsqrt.f32 %v6094_v8  ;;  %v2274_v4 = vmul.f32 %v6110_v25, %v6044_v0  ;;  %8615 = vst [vmem:[#allocation65_spill] sm:$0xff] %v6186_v17 }
 0x5f2   : > { %v2425_v58 = vsel %vm2249_vm5, %v2382_v47, 0.0  ;;  %v6119_v9 = vpop.eup %4236  ;;  %4244 = vrcp.f32 %v6106_v31  ;;  %v6144_v52 = vsel %vm5950_vm2, 1.0, %v8610_v36  ;;  %vm2389_vm2 = vweird.f32 %v6047_v5 }
 0x5f3   : > { %2491 = vperm.xlu1 %4082, %v2425_v58   ;;  %v2386_v22 = vmul.f32 0.5, %v2385_v1  ;;  %v6124_v28 = vpop.eup %4238  ;;  %8612 = vst [vmem:[#allocation64_spill] sm:$0xff] %v6144_v52  ;;  %v6148_v58 = vadd.f32 %v5981_v18, %v6137_v54  ;;  %v2322_v18 = vsel %vm6155_vm4, %v6014_v55, %v2318_v19  ;;  %vm2391_vm7 = vmor %vm2389_vm2, %vm2390_vm6  ;;  %v2275_v2 = vmul.f32 %v6110_v25, %v2274_v4 }
 0x5f4   : > { %v1907_v24 = vmul.f32 %v6119_v9, %v6063_v35  ;;  %v6201_v4 = vmax.f32 %v5831_v43, 1.0  ;;  %vm2399_vm13 = vweird.f32 %v6097_v44  ;;  %vm2241_vm6 = vcmp.gt.f32.partialorder %v6002_v56, 0.0 }
 0x5f5   : > { %v2234_v62 = vpop.f32.mrf.mxu0  ;;  %v2387_v47 = vsub.f32 1.5, %v2386_v22  ;;  %v2419_v22 = vsel %vm2243_vm0, %v2322_v18, 0.0  ;;  %v6242_v56 = vmax.f32 %v5765_v53, 1.0  ;;  %vm2280_vm11 = vweird.f32 %v6110_v25 }
 0x5f6   : > { %v4241_v1 = vpop.eup %4240  ;;  %v6151_v14 = vadd.f32 %v2234_v62, %v5772_v48  ;;  %v6169_v62 = vadd.f32 %v5973_v46, %v6144_v52  ;;  %v2298_v48 = vmul.f32 %v6049_v11, %v2297_v42  ;;  %v2276_v42 = vmul.f32 0.5, %v2275_v2 }
 0x5f7   : > { %v2394_v15 = vmul.f32 %v4241_v1, %v6097_v44  ;;  %v2388_v16 = vmul.f32 %v6089_v23, %v2387_v47  ;;  %v6165_v41 = vpop.eup %4242  ;;  %vm2400_vm9 = vweird.f32 %v4241_v1  ;;  %v6213_v2 = vmax.f32 %v5833_v21, 1.0 }
 0x5f8   : > { %4246 = vrsqrt.f32 %v6151_v14  ;;  %v6179_v55 = vpop.eup %4244  ;;  %v2324_v5 = vmul.f32 %v6165_v41, %v6094_v8  ;;  %vm2401_vm5 = vmor %vm2399_vm13, %vm2400_vm9  ;;  %v2277_v43 = vsub.f32 1.5, %v2276_v42  ;;  %vm2279_vm2 = vweird.f32 %v6044_v0 }
 0x5f9   : > { %v2392_v47 = vsel %vm2391_vm7, %v6089_v23, %v2388_v16  ;;  %v2395_v19 = vmul.f32 %v4241_v1, %v2394_v15  ;;  %4248 = vrsqrt.f32 %v6148_v58  ;;  %v6191_v15 = vmul.f32 %v6054_v37, %v1818_v50  ;;  %vm6263_vm7 = vmor %vm2279_vm2, %vm2280_vm11 }
 0x5fa   : > { %v2426_v46 = vsel %vm2250_vm1, %v2392_v47, 0.0  ;;  %v6195_v23 = vadd.f32 %v5979_v39, %v6186_v17  ;;  %v6210_v39 = vmul.f32 %v6066_v59, %v1863_v29  ;;  %4250 = vrsqrt.f32 %v6169_v62 }
 0x5fb   : > { %2496 = vperm.xlu2 %4081, %v2426_v46   ;;  %2461 = vperm.xlu1 %4082, %v2419_v22   ;;  %v2396_v51 = vmul.f32 0.5, %v2395_v19  ;;  %v2302_v47 = vsel %vm6205_vm14, %v6049_v11, %v2298_v48  ;;  %v2043_v19 = vsub.f32 1.0, %v6131_v33  ;;  %v2325_v29 = vmul.f32 %v6165_v41, %v2324_v5 }
 0x5fc   : > { %4252 = vrsqrt.f32 %v6195_v23  ;;  %v6228_v21 = vmul.f32 %v6179_v55, %v6106_v31  ;;  %v1908_v48 = vsub.f32 1.0, %v1907_v24  ;;  %vm2046_vm1 = vweird.f32 %v6040_v20 }
 0x5fd   : > { %v2397_v16 = vsub.f32 1.5, %v2396_v51  ;;  %4254 = vrcp.f32 %v6213_v2  ;;  %v2044_v50 = vmul.f32 %v6103_v49, %v2043_v19  ;;  %v2326_v44 = vmul.f32 0.5, %v2325_v29 }
 0x5fe   : > { %v4247_v18 = vpop.eup %4246  ;;  %v6250_v19 = vsel %vm5938_vm15, 1.0, %v8610_v36  ;;  %v1998_v29 = vsub.f32 1.0, %v6228_v21  ;;  %vm2409_vm15 = vweird.f32 %v6151_v14  ;;  %vm2047_vm0 = vweird.f32 %v6103_v49 }
 0x5ff   : > { %v2404_v46 = vmul.f32 %v4247_v18, %v6151_v14  ;;  %v2398_v22 = vmul.f32 %v4241_v1, %v2397_v16  ;;  %v6223_v51 = vpop.eup %4248  ;;  %v2417_v16 = vsel %vm2241_vm6, %v2302_v47, 0.0  ;;  %v1909_v47 = vmul.f32 %v6119_v9, %v1908_v48  ;;  %8618 = vst [vmem:[#allocation66_spill] sm:$0xff] %v6250_v19  ;;  %vm6291_vm13 = vmor %vm2046_vm1, %vm2047_vm0 }
 0x600   : > { %v2304_v42 = vmul.f32 %v6223_v51, %v6148_v58  ;;  %vm2410_vm4 = vweird.f32 %v4247_v18  ;;  %v2052_v48 = vand.u32 2147483648, %v6040_v20  ;;  %v2327_v21 = vsub.f32 1.5, %v2326_v44 }
 0x601   : > { %v2402_v11 = vsel %vm2401_vm5, %v4241_v1, %v2398_v22  ;;  %v2405_v33 = vmul.f32 %v4247_v18, %v2404_v46  ;;  %v6239_v1 = vpop.eup %4250  ;;  %v2278_v46 = vmul.f32 %v6110_v25, %v2277_v43  ;;  %v2045_v43 = vadd.f32 %v6103_v49, %v2044_v50  ;;  %vm2411_vm10 = vmor %vm2409_vm15, %vm2410_vm4 }
 0x602   : > { %v2427_v5 = vsel %vm2251_vm12, %v2402_v11, 0.0  ;;  %v6253_v11 = vpop.eup %4252  ;;  %v2050_v50 = vand.u32 2147483647, %v6040_v20  ;;  %v4109_v44 = vpack.i.bf16 %v5999_v61, %v6137_v54  ;;  %vm2252_vm8 = vcmp.gt.f32.partialorder %v6151_v14, 0.0 }
 0x603   : > { %2501 = vperm.xlu0 %4083, %v2427_v5   ;;  %2451 = vperm.xlu1 %4082, %v2417_v16   ;;  %v2406_v24 = vmul.f32 0.5, %v2405_v33  ;;  %v6257_v33 = vadd.f32 %v5975_v40, %v6250_v19  ;;  %v2305_v16 = vmul.f32 %v6223_v51, %v2304_v42  ;;  %v2282_v40 = vsel %vm6263_vm7, %v6110_v25, %v2278_v46 }
 0x604   : > { %v2284_v25 = vmul.f32 %v6253_v11, %v6195_v23  ;;  %vm2239_vm9 = vcmp.gt.f32.partialorder %v6044_v0, 0.0  ;;  %v2328_v36 = vmul.f32 %v6165_v41, %v2327_v21  ;;  %vm2330_vm14 = vweird.f32 %v6165_v41 }
 0x605   : > { %v2407_v22 = vsub.f32 1.5, %v2406_v24  ;;  %v6268_v24 = vpop.eup %4254  ;;  %4256 = vrsqrt.f32 %v6257_v33  ;;  %v2415_v57 = vsel %vm2239_vm9, %v2282_v40, 0.0  ;;  %v6304_v40 = vadd.f32 %v6054_v37, %v6191_v15 }
 0x606   : > { %4258 = vrcp.f32 %v6235_v45  ;;  %v1952_v0 = vmul.f32 %v6268_v24, %v6213_v2  ;;  %vm2329_vm5 = vweird.f32 %v6094_v8  ;;  %v1999_v20 = vmul.f32 %v6179_v55, %v1998_v29 }
 0x607   : > { %v2408_v5 = vmul.f32 %v4247_v18, %v2407_v22  ;;  %v2254_v22 = vmul.f32 %v6239_v1, %v6169_v62  ;;  %4260 = vrcp.f32 %v6242_v56  ;;  %vm6310_vm12 = vmor %vm2329_vm5, %vm2330_vm14  ;;  %vm2051_vm6 = vcmp.eq.f32.partialorder %v2050_v50, 8.507059e+37 }
 0x608   : > { %v2332_v29 = vsel %vm6310_vm12, %v6165_v41, %v2328_v36  ;;  %v6328_v54 = vmax.f32 %v5761_v30, 1.0  ;;  %vm2001_vm11 = vweird.f32 %v6106_v31  ;;  %vm2002_vm4 = vweird.f32 %v6179_v55 }
 0x609   : > { %v2412_v42 = vsel %vm2411_vm10, %v4247_v18, %v2408_v5  ;;  %v2306_v18 = vmul.f32 0.5, %v2305_v16  ;;  %v8623_v5 = vand.u32 2147483648, %v6020_v32  ;;  %v2255_v15 = vmul.f32 %v6239_v1, %v2254_v22  ;;  %vm6350_vm7 = vmor %vm2001_vm11, %vm2002_vm4 }
 0x60a   : > { %v2428_v46 = vsel %vm2252_vm8, %v2412_v42, 0.0  ;;  %v2049_v42 = vsel %vm6291_vm13, %v6103_v49, %v2045_v43  ;;  %v2285_v16 = vmul.f32 %v6253_v11, %v2284_v25  ;;  %v1953_v49 = vsub.f32 1.0, %v1952_v0 }
 0x60b   : > { %4110 = vperm.xlu0 %4083, %v4109_v44   ;;  %2506 = vperm.xlu2 %4081, %v2428_v46   ;;  %v6300_v21 = vor.u32 1.1754944e-38, %v8623_v5  ;;  %v2053_v46 = vor.u32 1.1754944e-38, %v2052_v48  ;;  %v2307_v5 = vsub.f32 1.5, %v2306_v18  ;;  %v6325_v34 = vpop.eup %4256  ;;  %vm2244_vm2 = vcmp.gt.f32.partialorder %v6094_v8, 0.0 }
 0x60c   : > { %2441 = vperm.xlu1 %4082, %v2415_v57   ;;  %v6319_v57 = vadd.f32 %v6119_v9, %v1909_v47  ;;  %v4114_v47 = vpack.i.bf16 %v6036_v3, %v6186_v17  ;;  %v2000_v41 = vadd.f32 %v6179_v55, %v1999_v20  ;;  %v2007_v36 = vand.u32 2147483648, %v6106_v31  ;;  %v6337_v43 = vpop.eup %4258  ;;  %v8740_v17 = vld [vmem:[#allocation8_spill] sm:$0xff] }
 0x60d   : > { %v2420_v48 = vsel %vm2244_vm2, %v2332_v29, 0.0  ;;  %v2054_v50 = vsel %vm2051_vm6, %v2053_v46, %v2049_v42  ;;  %v2005_v22 = vand.u32 2147483647, %v6106_v31  ;;  %v2256_v25 = vmul.f32 0.5, %v2255_v15  ;;  %v6340_v14 = vpop.eup %4260 }
 0x60e   : > { %v2264_v18 = vmul.f32 %v6325_v34, %v6257_v33  ;;  %v2308_v8 = vmul.f32 %v6223_v51, %v2307_v5  ;;  %vm2310_vm15 = vweird.f32 %v6223_v51  ;;  %v2286_v20 = vmul.f32 0.5, %v2285_v16 }
 0x60f   : > { %v3037_v44 = vmul.f32 0.8, %v5763_v26  ;;  %v1954_v42 = vmul.f32 %v6268_v24, %v1953_v49  ;;  %vm1911_vm10 = vweird.f32 %v6063_v35  ;;  %vm1912_vm1 = vweird.f32 %v6119_v9 }
 0x610   : > { %4262 = vrcp.f32 %v6328_v54  ;;  %vm2309_vm0 = vweird.f32 %v6148_v58  ;;  %vm1956_vm8 = vweird.f32 %v6213_v2  ;;  %vm1957_vm9 = vweird.f32 %v6268_v24  ;;  %vm6411_vm4 = vmor %vm1911_vm10, %vm1912_vm1 }
 0x611   : > { %vm6362_vm14 = vmor %vm2309_vm0, %vm2310_vm15  ;;  %v2004_v26 = vsel %vm6350_vm7, %v6179_v55, %v2000_v41  ;;  %vm6369_vm13 = vcmp.eq.f32.partialorder %v2005_v22, 8.507059e+37  ;;  %v2008_v46 = vor.u32 1.1754944e-38, %v2007_v36  ;;  %v2012_v15 = vmul.f32 %v6340_v14, %v6242_v56 }
 0x612   : > { %v2312_v29 = vsel %vm6362_vm14, %v6223_v51, %v2308_v8  ;;  %v2287_v5 = vsub.f32 1.5, %v2286_v20  ;;  %v2257_v49 = vsub.f32 1.5, %v2256_v25  ;;  %v6382_v55 = vadd.f32 -0.0001, %v3037_v44  ;;  %vm6397_vm12 = vmor %vm1956_vm8, %vm1957_vm9 }
 0x613   : > { %4115 = vperm.xlu0 %4083, %v4114_v47   ;;  %2466 = vperm.xlu2 %4081, %v2420_v48   ;;  %v2265_v47 = vmul.f32 %v6325_v34, %v2264_v18  ;;  %v6380_v48 = vmax.f32 %v5790_v6, 1.0  ;;  %v1962_v41 = vand.u32 2147483648, %v6213_v2  ;;  %v1915_v36 = vand.u32 2147483647, %v6063_v35 }
 0x614   : > { %2133 = vperm.xlu1 %4082, %v2054_v50   ;;  %8632 = vst [vmem:[#allocation67_spill] sm:$0xff] %v6382_v55  ;;  %vm2242_vm5 = vcmp.gt.f32.partialorder %v6148_v58, 0.0  ;;  %v4119_v50 = vpack.i.bf16 %v6144_v52, %v6250_v19  ;;  %v1955_v51 = vadd.f32 %v6268_v24, %v1954_v42  ;;  %v1960_v22 = vand.u32 2147483647, %v6213_v2  ;;  %v8742_v52 = vld [vmem:[#allocation21_spill] sm:$0xff] }
 0x615   : > { %v2418_v25 = vsel %vm2242_vm5, %v2312_v29, 0.0  ;;  %v2009_v18 = vsel %vm6369_vm13, %v2008_v46, %v2004_v26  ;;  %vm2260_vm6 = vweird.f32 %v6239_v1  ;;  %v2013_v58 = vsub.f32 1.0, %v2012_v15 }
 0x616   : > { %v6402_v0 = vpop.eup %4262  ;;  %v2288_v20 = vmul.f32 %v6253_v11, %v2287_v5  ;;  %vm2290_vm11 = vweird.f32 %v6253_v11  ;;  %v2258_v44 = vmul.f32 %v6239_v1, %v2257_v49  ;;  %v2266_v42 = vmul.f32 0.5, %v2265_v47 }
 0x617   : > { %v8408_v31 = vceil.f32 %v6382_v55  ;;  %v1963_v26 = vor.u32 1.1754944e-38, %v1962_v41  ;;  %vm2259_vm2 = vweird.f32 %v6169_v62  ;;  %v1967_v16 = vmul.f32 %v6337_v43, %v6235_v45 }
 0x618   : > { %4264 = vrcp.f32 %v6380_v48  ;;  %vm2289_vm15 = vweird.f32 %v6195_v23  ;;  %v1959_v46 = vsel %vm6397_vm12, %v6268_v24, %v1955_v51  ;;  %vm6424_vm7 = vcmp.eq.f32.partialorder %v1960_v22, 8.507059e+37  ;;  %vm6430_vm10 = vmor %vm2259_vm2, %vm2260_vm6 }
 0x619   : > { %vm1821_vm1 = vweird.f32 %v6005_v27  ;;  %vm1822_vm0 = vweird.f32 %v6054_v37  ;;  %vm6438_vm8 = vmor %vm2289_vm15, %vm2290_vm11  ;;  %v1914_v24 = vsel %vm6411_vm4, %v6119_v9, %v6319_v57  ;;  %v8643_v49 = vand.u32 2147483648, %v6063_v35 }
 0x61a   : > { %v2014_v41 = vmul.f32 %v6340_v14, %v2013_v58  ;;  %vm1866_vm9 = vweird.f32 %v6020_v32  ;;  %vm1867_vm14 = vweird.f32 %v6066_v59  ;;  %v2292_v51 = vsel %vm6438_vm8, %v6253_v11, %v2288_v20 }
 0x61b   : > { %2456 = vperm.xlu2 %4081, %v2418_v25   ;;  %4120 = vperm.xlu0 %4083, %v4119_v50   ;;  %v1918_v47 = vor.u32 1.1754944e-38, %v8643_v49  ;;  %v1827_v50 = vand.u32 2147483648, %v6005_v27  ;;  %v2262_v22 = vsel %vm6430_vm10, %v6239_v1, %v2258_v44  ;;  %v2267_v9 = vsub.f32 1.5, %v2266_v42 }
 0x61c   : > { %2118 = vperm.xlu1 %4082, %v2009_v18   ;;  %v2027_v35 = vmul.f32 %v6402_v0, %v6328_v54  ;;  %v6462_v57 = vmax.f32 %v8408_v31, 1.0  ;;  %v1964_v25 = vsel %vm6424_vm7, %v1963_v26, %v1959_v46  ;;  %vm6466_vm13 = vcmp.eq.f32.partialorder %v1915_v36, 8.507059e+37 }
 0x61d   : > { %v1968_v11 = vsub.f32 1.0, %v1967_v16  ;;  %vm2240_vm5 = vcmp.gt.f32.partialorder %v6195_v23, 0.0  ;;  %vm2237_vm12 = vcmp.gt.f32.partialorder %v6169_v62, 0.0  ;;  %vm2016_vm6 = vweird.f32 %v6242_v56 }
 0x61e   : > { %vm2017_vm11 = vweird.f32 %v6340_v14  ;;  %v2416_v1 = vsel %vm2240_vm5, %v2292_v51, 0.0  ;;  %v2413_v8 = vsel %vm2237_vm12, %v2262_v22, 0.0  ;;  %v2015_v58 = vadd.f32 %v6340_v14, %v2014_v41  ;;  %v6476_v44 = vpop.eup %4264  ;;  %vm6534_vm12 = vmor %vm1821_vm1, %vm1822_vm0 }
 0x61f   : > { %v2022_v20 = vand.u32 2147483648, %v6242_v56  ;;  %v2268_v36 = vmul.f32 %v6325_v34, %v2267_v9  ;;  %vm2270_vm4 = vweird.f32 %v6325_v34  ;;  %v2020_v62 = vand.u32 2147483647, %v6242_v56  ;;  %vm6487_vm2 = vmor %vm2016_vm6, %vm2017_vm11 }
 0x620   : > { %v2028_v23 = vsub.f32 1.0, %v2027_v35  ;;  %4266 = vrcp.f32 %v6201_v4  ;;  %v3035_v2 = vmul.f32 0.8, %v5765_v53  ;;  %v6493_v26 = vadd.f32 %v6066_v59, %v6210_v39  ;;  %vm6543_vm11 = vmor %vm1866_vm9, %vm1867_vm14 }
 0x621   : > { %v1922_v16 = vmul.f32 %v6124_v28, %v6069_v13  ;;  %v3033_v46 = vmul.f32 0.8, %v5790_v6  ;;  %v1919_v53 = vsel %vm6466_vm13, %v1918_v47, %v1914_v24  ;;  %vm2269_vm15 = vweird.f32 %v6257_v33 }
 0x622   : > { %v6503_v56 = vmul.f32 %v6077_v38, %v6026_v63  ;;  %4268 = vrcp.f32 %v6462_v57  ;;  %vm6506_vm7 = vmor %vm2269_vm15, %vm2270_vm4  ;;  %v2023_v39 = vor.u32 1.1754944e-38, %v2022_v20  ;;  %v1969_v29 = vmul.f32 %v6337_v43, %v1968_v11 }
 0x623   : > { %2446 = vperm.xlu2 %4081, %v2416_v1   ;;  %2431 = vperm.xlu0 %4083, %v2413_v8   ;;  %v1982_v6 = vmul.f32 %v6476_v44, %v6380_v48  ;;  %v2272_v5 = vsel %vm6506_vm7, %v6325_v34, %v2268_v36  ;;  %v2019_v24 = vsel %vm6487_vm2, %v6340_v14, %v2015_v58  ;;  %vm2021_vm10 = vcmp.eq.f32.partialorder %v2020_v62, 8.507059e+37 }
 0x624   : > { %2103 = vperm.xlu1 %4082, %v1964_v25   ;;  %v2029_v49 = vmul.f32 %v6402_v0, %v2028_v23  ;;  %v6520_v47 = vadd.f32 -0.0001, %v3035_v2  ;;  %v8651_v41 = vand.u32 2147483647, %v6020_v32  ;;  %vm1971_vm13 = vweird.f32 %v6235_v45 }
 0x625   : > { %vm1972_vm5 = vweird.f32 %v6337_v43  ;;  %v1923_v14 = vsub.f32 1.0, %v1922_v16  ;;  %vm2238_vm6 = vcmp.gt.f32.partialorder %v6257_v33, 0.0  ;;  %vm2031_vm4 = vweird.f32 %v6328_v54 }
 0x626   : > { %8650 = vst [vmem:[#allocation68_spill] sm:$0xff] %v6520_v47  ;;  %vm6524_vm8 = vcmp.eq.f32.partialorder %v8651_v41, 8.507059e+37  ;;  %vm2032_vm2 = vweird.f32 %v6402_v0  ;;  %v1977_v9 = vand.u32 2147483648, %v6235_v45  ;;  %v6550_v35 = vpop.eup %4266  ;;  %v2414_v25 = vsel %vm2238_vm6, %v2272_v5, 0.0  ;;  %vm6560_vm1 = vmor %vm1971_vm13, %vm1972_vm5 }
 0x627   : > { %v2024_v18 = vsel %vm2021_vm10, %v2023_v39, %v2019_v24  ;;  %v2037_v33 = vand.u32 2147483648, %v6328_v54  ;;  %v1970_v11 = vadd.f32 %v6337_v43, %v1969_v29  ;;  %v2030_v32 = vadd.f32 %v6402_v0, %v2029_v49  ;;  %vm6575_vm0 = vmor %vm2031_vm4, %vm2032_vm2 }
 0x628   : > { %v2035_v1 = vand.u32 2147483647, %v6328_v54  ;;  %v1975_v58 = vand.u32 2147483647, %v6235_v45  ;;  %v1983_v20 = vsub.f32 1.0, %v1982_v6  ;;  %v6565_v36 = vpop.eup %4268  ;;  %v1869_v62 = vsel %vm6543_vm11, %v6066_v59, %v6493_v26 }
 0x629   : > { %v1824_v45 = vsel %vm6534_vm12, %v6054_v37, %v6304_v40  ;;  %v6585_v2 = vor.u32 1.1754944e-38, %v1827_v50  ;;  %v6589_v59 = vmul.f32 %v6060_v7, %v6011_v12  ;;  %v6591_v42 = vadd.f32 -0.0001, %v3033_v46  ;;  %v6786_v37 = vpop.permute.xlu0 %4085 }
 0x62a   : > { %v1924_v54 = vmul.f32 %v6124_v28, %v1923_v14  ;;  %v1937_v26 = vmul.f32 %v6550_v35, %v6201_v4  ;;  %v1878_v16 = vsub.f32 1.0, %v6503_v56  ;;  %v2038_v15 = vor.u32 1.1754944e-38, %v2037_v33 }
 0x62b   : > { %2436 = vperm.xlu2 %4081, %v2414_v25   ;;  %2123 = vperm.xlu0 %4083, %v2024_v18   ;;  %8662 = vst [vmem:[#allocation69_spill] sm:$0xff] %v6591_v42  ;;  %v1974_v50 = vsel %vm6560_vm1, %v6337_v43, %v1970_v11  ;;  %v1978_v39 = vor.u32 1.1754944e-38, %v1977_v9  ;;  %v2034_v46 = vsel %vm6575_vm0, %v6402_v0, %v2030_v32  ;;  %vm2036_vm9 = vcmp.eq.f32.partialorder %v2035_v1, 8.507059e+37 }
 0x62c   : > { %2088 = vperm.xlu1 %4082, %v1919_v53   ;;  %v8407_v53 = vceil.f32 %v6520_v47  ;;  %vm1976_vm14 = vcmp.eq.f32.partialorder %v1975_v58, 8.507059e+37  ;;  %v1984_v29 = vmul.f32 %v6476_v44, %v1983_v20  ;;  %v8663_v6 = vand.u32 2147483647, %v6005_v27 }
 0x62d   : > { %vm1926_vm7 = vweird.f32 %v6069_v13  ;;  %vm1927_vm10 = vweird.f32 %v6124_v28  ;;  %v1932_v43 = vand.u32 2147483648, %v6069_v13  ;;  %v3584_v5 = vmul.f32 %v6565_v36, %v6462_v57 }
 0x62e   : > { %vm6607_vm15 = vcmp.eq.f32.partialorder %v8663_v6, 8.507059e+37  ;;  %vm1986_vm13 = vweird.f32 %v6380_v48  ;;  %vm1987_vm5 = vweird.f32 %v6476_v44  ;;  %v1925_v0 = vadd.f32 %v6124_v28, %v1924_v54  ;;  %vm6634_vm6 = vmor %vm1926_vm7, %vm1927_vm10 }
 0x62f   : > { %v1930_v27 = vand.u32 2147483647, %v6069_v13  ;;  %v6622_v24 = vmax.f32 %v8407_v53, 1.0  ;;  %v2039_v49 = vsel %vm2036_vm9, %v2038_v15, %v2034_v46  ;;  %v1979_v41 = vsel %vm1976_vm14, %v1978_v39, %v1974_v50 }
 0x630   : > { %v1992_v14 = vand.u32 2147483648, %v6380_v48  ;;  %v1874_v22 = vsel %vm6524_vm8, %v6300_v21, %v1869_v62  ;;  %v1985_v9 = vadd.f32 %v6476_v44, %v1984_v29  ;;  %v1990_v25 = vand.u32 2147483647, %v6380_v48  ;;  %vm6642_vm8 = vmor %vm1986_vm13, %vm1987_vm5 }
 0x631   : > { %v1938_v33 = vsub.f32 1.0, %v1937_v26  ;;  %v3585_v51 = vsub.f32 1.0, %v3584_v5  ;;  %v1879_v11 = vmul.f32 %v6077_v38, %v1878_v16  ;;  %v1892_v13 = vmul.f32 %v6115_v10, %v6057_v60 }
 0x632   : > { %v1833_v32 = vsub.f32 1.0, %v6589_v59  ;;  %v8404_v1 = vceil.f32 %v6591_v42  ;;  %v1933_v8 = vor.u32 1.1754944e-38, %v1932_v43  ;;  %vm1881_vm11 = vweird.f32 %v6026_v63 }
 0x633   : > { %2128 = vperm.xlu2 %4081, %v2039_v49   ;;  %2108 = vperm.xlu0 %4083, %v1979_v41   ;;  %v1887_v58 = vand.u32 2147483648, %v6026_v63  ;;  %4270 = vrcp.f32 %v6622_v24  ;;  %v1993_v48 = vor.u32 1.1754944e-38, %v1992_v14  ;;  %v1929_v20 = vsel %vm6634_vm6, %v6124_v28, %v1925_v0  ;;  %v8679_v49 = vld [vmem:[#allocation62_spill] sm:$0xff] }
 0x634   : > { %2073 = vperm.xlu1 %4082, %v1874_v22   ;;  %vm1931_vm4 = vcmp.eq.f32.partialorder %v1930_v27, 8.507059e+37  ;;  %v1989_v62 = vsel %vm6642_vm8, %v6476_v44, %v1985_v9  ;;  %vm1991_vm2 = vcmp.eq.f32.partialorder %v1990_v25, 8.507059e+37  ;;  %v1939_v23 = vmul.f32 %v6550_v35, %v1938_v33  ;;  %v8678_v27 = vld [vmem:[#allocation24_spill] sm:$0xff] }
 0x635   : > { %vm1882_vm1 = vweird.f32 %v6077_v38  ;;  %v3586_v59 = vmul.f32 %v6565_v36, %v3585_v51  ;;  %v1880_v54 = vadd.f32 %v6077_v38, %v1879_v11  ;;  %v1885_v26 = vand.u32 2147483647, %v6026_v63  ;;  %8688 = vst [vmem:[#allocation24_spill] sm:$0xff] %v6786_v37 }
 0x636   : > { %v1893_v16 = vsub.f32 1.0, %v1892_v13  ;;  %v6667_v28 = vmax.f32 %v8404_v1, 1.0  ;;  %v1934_v15 = vsel %vm1931_vm4, %v1933_v8, %v1929_v20  ;;  %vm1941_vm0 = vweird.f32 %v6201_v4  ;;  %vm6676_vm10 = vmor %vm1881_vm11, %vm1882_vm1  ;;  %v8725_v1 = vld [vmem:[#allocation27_spill] sm:$0xff] }
 0x637   : > { %vm1942_vm9 = vweird.f32 %v6550_v35  ;;  %v1994_v44 = vsel %vm1991_vm2, %v1993_v48, %v1989_v62  ;;  %vm3588_vm14 = vweird.f32 %v6462_v57  ;;  %vm3589_vm7 = vweird.f32 %v6565_v36 }
 0x638   : > { %v1947_v50 = vand.u32 2147483648, %v6201_v4  ;;  %v1829_v46 = vsel %vm6607_vm15, %v6585_v2, %v1824_v45  ;;  %v3594_v29 = vand.u32 2147483648, %v6462_v57  ;;  %v1940_v6 = vadd.f32 %v6550_v35, %v1939_v23  ;;  %vm6699_vm12 = vmor %vm1941_vm0, %vm1942_vm9 }
 0x639   : > { %v1945_v63 = vand.u32 2147483647, %v6201_v4  ;;  %v6691_v43 = vpop.eup %4270  ;;  %v3587_v34 = vadd.f32 %v6565_v36, %v3586_v59  ;;  %v3592_v5 = vand.u32 2147483647, %v6462_v57  ;;  %vm1836_vm15 = vweird.f32 %v6011_v12  ;;  %vm6709_vm5 = vmor %vm3588_vm14, %vm3589_vm7 }
 0x63a   : > { %vm1837_vm13 = vweird.f32 %v6060_v7  ;;  %v1884_v4 = vsel %vm6676_vm10, %v6077_v38, %v1880_v54  ;;  %vm6716_vm6 = vcmp.eq.f32.partialorder %v1885_v26, 8.507059e+37  ;;  %v1888_v2 = vor.u32 1.1754944e-38, %v1887_v58 }
 0x63b   : > { %2113 = vperm.xlu2 %4081, %v1994_v44   ;;  %2093 = vperm.xlu0 %4083, %v1934_v15   ;;  %v1834_v56 = vmul.f32 %v6060_v7, %v1833_v32  ;;  %4272 = vrcp.f32 %v6667_v28  ;;  %v1948_v0 = vor.u32 1.1754944e-38, %v1947_v50  ;;  %v1894_v57 = vmul.f32 %v6115_v10, %v1893_v16  ;;  %vm6746_vm1 = vmor %vm1836_vm15, %vm1837_vm13 }
 0x63c   : > { %2058 = vperm.xlu1 %4082, %v1829_v46   ;;  %v1847_v41 = vmul.f32 %v8679_v49, %v8678_v27  ;;  %v3595_v14 = vor.u32 1.1754944e-38, %v3594_v29  ;;  %v1944_v38 = vsel %vm6699_vm12, %v6550_v35, %v1940_v6  ;;  %vm1946_vm8 = vcmp.eq.f32.partialorder %v1945_v63, 8.507059e+37 }
 0x63d   : > { %v3554_v22 = vmul.f32 %v6691_v43, %v6622_v24  ;;  %v3591_v9 = vsel %vm6709_vm5, %v6565_v36, %v3587_v34  ;;  %vm3593_vm11 = vcmp.eq.f32.partialorder %v3592_v5, 8.507059e+37  ;;  %vm1896_vm4 = vweird.f32 %v6057_v60  ;;  %v6782_v34 = vpop.permute.xlu1 %4090  ;;  %v6784_v5 = vpop.permute.xlu2 %2476 }
 0x63e   : > { %vm1897_vm2 = vweird.f32 %v6115_v10  ;;  %v1835_v25 = vadd.f32 %v6060_v7, %v1834_v56  ;;  %v1840_v18 = vand.u32 2147483647, %v6011_v12  ;;  %v1842_v33 = vand.u32 2147483648, %v6011_v12 }
 0x63f   : > { %v1949_v35 = vsel %vm1946_vm8, %v1948_v0, %v1944_v38  ;;  %v1889_v21 = vsel %vm6716_vm6, %v1888_v2, %v1884_v4  ;;  %v1895_v51 = vadd.f32 %v6115_v10, %v1894_v57  ;;  %v1902_v11 = vand.u32 2147483648, %v6057_v60  ;;  %vm6750_vm0 = vmor %vm1896_vm4, %vm1897_vm2 }
 0x640   : > { %v3596_v13 = vsel %vm3593_vm11, %v3595_v14, %v3591_v9  ;;  %v1900_v8 = vand.u32 2147483647, %v6057_v60  ;;  %v1848_v58 = vsub.f32 1.0, %v1847_v41  ;;  %v3555_v48 = vsub.f32 1.0, %v3554_v22  ;;  %v8689_v14 = vld [vmem:[#allocation41_spill] sm:$0xff] }
 0x641   : > { %v4273_v20 = vpop.eup %4272  ;;  %v1843_v62 = vor.u32 1.1754944e-38, %v1842_v33  ;;  %v1899_v12 = vsel %vm6750_vm0, %v6115_v10, %v1895_v51  ;;  %v1903_v23 = vor.u32 1.1754944e-38, %v1902_v11  ;;  %v1839_v59 = vsel %vm6746_vm1, %v6060_v7, %v1835_v25  ;;  %v8691_v51 = vld [vmem:[#allocation20_spill] sm:$0xff] }
 0x642   : > { %vm1841_vm9 = vcmp.eq.f32.partialorder %v1840_v18, 8.507059e+37  ;;  %vm1901_vm14 = vcmp.eq.f32.partialorder %v1900_v8, 8.507059e+37  ;;  %v1849_v54 = vmul.f32 %v8679_v49, %v1848_v58  ;;  %v3556_v60 = vmul.f32 %v6691_v43, %v3555_v48  ;;  %v6805_v18 = vpop.permute.xlu0 %4095  ;;  %v8693_v58 = vld [vmem:[#allocation40_spill] sm:$0xff] }
 0x643   : > { %2098 = vperm.xlu2 %4081, %v1949_v35   ;;  %2078 = vperm.xlu0 %4083, %v1889_v21   ;;  %v3524_v26 = vmul.f32 %v4273_v20, %v6667_v28  ;;  %vm1851_vm7 = vweird.f32 %v8678_v27  ;;  %vm1852_vm10 = vweird.f32 %v8679_v49  ;;  %v1844_v16 = vsel %vm1841_vm9, %v1843_v62, %v1839_v59  ;;  %v8696_v59 = vld [vmem:[#allocation39_spill] sm:$0xff] }
 0x644   : > { %3675 = vperm.xlu1 %4082, %v3596_v13   ;;  %vm3558_vm12 = vweird.f32 %v6622_v24  ;;  %vm3559_vm15 = vweird.f32 %v6691_v43  ;;  %v1904_v10 = vsel %vm1901_vm14, %v1903_v23, %v1899_v12  ;;  %v1855_v7 = vand.u32 2147483647, %v8678_v27  ;;  %vm6772_vm13 = vmor %vm1851_vm7, %vm1852_vm10 }
 0x645   : > { %v1857_v15 = vand.u32 2147483648, %v8678_v27  ;;  %v3564_v44 = vand.u32 2147483648, %v6622_v24  ;;  %v1850_v50 = vadd.f32 %v8679_v49, %v1849_v54  ;;  %v3557_v46 = vadd.f32 %v6691_v43, %v3556_v60  ;;  %vm6778_vm5 = vmor %vm3558_vm12, %vm3559_vm15  ;;  %v6803_v22 = vpop.permute.xlu1 %2471  ;;  %v8698_v60 = vld [vmem:[#allocation38_spill] sm:$0xff] }
 0x646   : > { %v3562_v29 = vand.u32 2147483647, %v6622_v24  ;;  %v3525_v6 = vsub.f32 1.0, %v3524_v26  ;;  %vm1856_vm6 = vcmp.eq.f32.partialorder %v1855_v7, 8.507059e+37  ;;  %v6794_v56 = vstv %s4034_s26 }
 0x647   : > { %v1858_v40 = vor.u32 1.1754944e-38, %v1857_v15  ;;  %v3565_v4 = vor.u32 1.1754944e-38, %v3564_v44  ;;  %v1854_v45 = vsel %vm6772_vm13, %v8679_v49, %v1850_v50  ;;  %v3561_v24 = vsel %vm6778_vm5, %v6691_v43, %v3557_v46  ;;  %v6801_v43 = vpop.permute.xlu2 %2486  ;;  %v8700_v15 = vld [vmem:[#allocation45_spill] sm:$0xff]  ;;  %v8701_v50 = vld [vmem:[#allocation36_spill] sm:$0xff] }
 0x648   : > { %vm3563_vm8 = vcmp.eq.f32.partialorder %v3562_v29, 8.507059e+37  ;;  %v3526_v2 = vmul.f32 %v4273_v20, %v3525_v6  ;;  %vm3528_vm11 = vweird.f32 %v6667_v28  ;;  %vm3529_vm4 = vweird.f32 %v4273_v20  ;;  %v8702_v29 = vld [vmem:[#allocation35_spill] sm:$0xff] }
 0x649   : > { %v1859_v0 = vsel %vm1856_vm6, %v1858_v40, %v1854_v45  ;;  %v3566_v57 = vsel %vm3563_vm8, %v3565_v4, %v3561_v24  ;;  %v3534_v27 = vand.u32 2147483648, %v6667_v28  ;;  %v3532_v49 = vand.u32 2147483647, %v6667_v28  ;;  %vm3530_vm2 = vmor %vm3528_vm11, %vm3529_vm4  ;;  %v8703_v24 = vld [vmem:[#allocation34_spill] sm:$0xff] }
 0x64a   : > { %v3527_v41 = vadd.f32 %v4273_v20, %v3526_v2  ;;  %v1314_v38 = vmul.f32 %v6794_v56, %v8689_v14  ;;  %v8692_v11 = vmax.f32 %v8691_v51, 0.0  ;;  %v3036_v13 = vmul.f32 0.8, %v5761_v30  ;;  %v6815_v8 = vpop.permute.xlu0 %4100 }
 0x64b   : > { %2083 = vperm.xlu2 %4081, %v1904_v10   ;;  %2063 = vperm.xlu0 %4083, %v1844_v16   ;;  %v3535_v9 = vor.u32 1.1754944e-38, %v3534_v27  ;;  %vm3533_vm1 = vcmp.eq.f32.partialorder %v3532_v49, 8.507059e+37  ;;  %v8409_v32 = vunpack.i.l.bf16 %v6786_v37  ;;  %v1313_v48 = vmul.f32 %v6794_v56, %v8693_v58  ;;  %v8699_v10 = vld [vmem:[#allocation37_spill] sm:$0xff]  ;;  %v8706_v49 = vld [vmem:[#allocation19_spill] sm:$0xff] }
 0x64c   : > { %v3531_v25 = vsel %vm3530_vm2, %v4273_v20, %v3527_v41  ;;  %4274 = vtanh.f32 %v1314_v38  ;;  %v6823_v62 = vadd.f32 -0.0001, %v3036_v13  ;;  %v1312_v30 = vmul.f32 %v6794_v56, %v8696_v59  ;;  %v8705_v27 = vld [vmem:[#allocation33_spill] sm:$0xff] }
 0x64d   : > { %v3536_v33 = vsel %vm3533_vm1, %v3535_v9, %v3531_v25  ;;  %4276 = vtanh.f32 %v1313_v48  ;;  %v1311_v26 = vmul.f32 %v6794_v56, %v8698_v60  ;;  %v1310_v7 = vmul.f32 %v6794_v56, %v8699_v10  ;;  %v8708_v9 = vld [vmem:[#allocation31_spill] sm:$0xff]  ;;  %v8712_v60 = vld [vmem:[#allocation32_spill] sm:$0xff] }
 0x64e   : > { %8694 = vst [vmem:[#allocation41_spill] sm:$0xff] %v6823_v62  ;;  %v8405_v16 = vceil.f32 %v6823_v62  ;;  %4278 = vtanh.f32 %v1312_v30  ;;  %v3034_v44 = vmul.f32 0.8, %v8700_v15  ;;  %v1309_v39 = vmul.f32 %v6794_v56, %v8701_v50  ;;  %v471_v48 = vld [vmem:[%s8296_s6 + $0x3] sm:$0x1]  ;;  %v8713_v15 = vld [vmem:[#allocation17_spill] sm:$0xff] }
 0x64f   : > { %4280 = vtanh.f32 %v1311_v26  ;;  %v1308_v6 = vmul.f32 %v6794_v56, %v8702_v29  ;;  %v1307_v2 = vmul.f32 %v6794_v56, %v8703_v24  ;;  %v1306_v41 = vmul.f32 %v6794_v56, %v8705_v27 }
 0x650   : > { %v6850_v40 = vmax.f32 %v8405_v16, 1.0  ;;  %4282 = vtanh.f32 %v1310_v7  ;;  %v8707_v14 = vmax.f32 %v8706_v49, 0.0  ;;  %v1304_v25 = vmul.f32 %v6794_v56, %v8708_v9  ;;  %v8717_v49 = vld [vmem:[#allocation16_spill] sm:$0xff] }
 0x651   : > { %4284 = vtanh.f32 %v1309_v39  ;;  %v1305_v26 = vmul.f32 %v6794_v56, %v8712_v60  ;;  %v8411_v10 = vunpack.i.l.bf16 %v6782_v34  ;;  %v1301_v16 = vmul.f32 %v6794_v56, %v8725_v1 }
 0x652   : > { %v4275_v35 = vpop.eup %4274  ;;  %v6844_v46 = vpop.permute.xlu0 %4105  ;;  %4286 = vtanh.f32 %v1308_v6  ;;  %v8414_v53 = vunpack.i.h.bf16 %v6805_v18  ;;  %v8741_v3 = vmax.f32 %v8740_v17, 0.0  ;;  %v1299_v19 = vmul.f32 %v6794_v56, %v8742_v52 }
 0x653   : > { %2068 = vperm.xlu2 %4081, %v1859_v0   ;;  %3665 = vperm.xlu0 %4083, %v3566_v57   ;;  %v1703_v36 = vmul.f32 %v4275_v35, %v8692_v11  ;;  %v4277_v63 = vpop.eup %4276  ;;  %v6858_v57 = vadd.f32 -0.0001, %v3034_v44  ;;  %4288 = vrcp.f32 %v6850_v40  ;;  %v8709_v35 = vld [vmem:[#allocation30_spill] sm:$0xff]  ;;  %v8410_v11 = vunpack.i.h.bf16 %v6786_v37 }
 0x654   : > { %v4279_v0 = vpop.eup %4278  ;;  %v1702_v38 = vmul.f32 %v4277_v63, %v8707_v14  ;;  %v1303_v51 = vmul.f32 %v6794_v56, %v8709_v35  ;;  %4290 = vtanh.f32 %v1307_v2  ;;  %v8714_v44 = vmax.f32 %v8713_v15, 0.0 }
 0x655   : > { %v6807_v21 = vpop.permute.xlu2 %2496  ;;  %v6809_v28 = vpop.permute.xlu1 %2481  ;;  %v6821_v20 = vmul.f32 %v8409_v32, %v1703_v36  ;;  %8704 = vst [vmem:[#allocation39_spill] sm:$0xff] %v6858_v57  ;;  %v8710_v36 = vld [vmem:[#allocation18_spill] sm:$0xff]  ;;  %v8406_v30 = vceil.f32 %v6858_v57  ;;  %4292 = vtanh.f32 %v1306_v41  ;;  %v2752_v63 = vmul.f32 %v471_v48, %v471_v48 }
 0x656   : > { %8690 = vst [vmem:[#allocation62_spill] sm:$0xff] %v6807_v21  ;;  %v8711_v13 = vmax.f32 %v8710_v36, 0.0  ;;  %v6881_v7 = vmul.f32 %v8410_v11, %v1702_v38  ;;  %4294 = vtanh.f32 %v1304_v25  ;;  %v8412_v2 = vunpack.i.h.bf16 %v6782_v34  ;;  %v8730_v11 = vld [vmem:[#allocation10_spill] sm:$0xff] }
 0x657   : > { %4296 = vtanh.f32 %v1303_v51  ;;  %v8718_v14 = vmax.f32 %v8717_v49, 0.0  ;;  %v6906_v25 = vmax.f32 %v8406_v30, 1.0  ;;  %v8739_v57 = vunpack.i.h.bf16 %v6844_v46 }
 0x658   : > { %v1701_v58 = vmul.f32 %v4279_v0, %v8711_v13  ;;  %4298 = vtanh.f32 %v1305_v26  ;;  %v8720_v13 = vld [vmem:[#allocation15_spill] sm:$0xff]  ;;  %v2753_v26 = vsel %vm1209_vm3, %v2752_v63, 0.0  ;;  %vm3573_vm3 = vweird.f32 %v6850_v40 }
 0x659   : > { %4300 = vrcp.f32 %v6906_v25  ;;  %vm3543_vm7 = vweird.f32 %v6906_v25  ;;  %vm8751_vm13 = vcmask 523264  }
 0x65a   : > { %v6898_v41 = vmul.f32 %v8411_v10, %v1701_v58  ;;  %v8721_v58 = vmax.f32 %v8720_v13, 0.0  ;;  %v8726_v13 = vld [vmem:[#allocation13_spill] sm:$0xff]  ;;  %v8731_v10 = vmax.f32 %v8730_v11, 0.0  ;;  %vm8752_vm5 = vmmov %vm8751_vm13 }
 0x65b   : > { %3655 = vperm.xlu0 %4083, %v3536_v33   ;;  %v4281_v33 = vpop.eup %4280  ;;  %v8727_v1 = vmax.f32 %v8726_v13, 0.0  ;;  %v8728_v13 = vld [vmem:[#allocation12_spill] sm:$0xff]  ;;  %vm8753_vm6 = vmmov %vm8752_vm5 }
 0x65c   : > { %v4283_v59 = vpop.eup %4282  ;;  %v1700_v50 = vmul.f32 %v4281_v33, %v8714_v44  ;;  %v8413_v33 = vunpack.i.l.bf16 %v6805_v18  ;;  %v6912_v51 = vmul.f32 %v6807_v21, %v6898_v41  ;;  %v8723_v44 = vld [vmem:[#allocation14_spill] sm:$0xff]  ;;  %vm8754_vm8 = vmmov %vm8752_vm5 }
 0x65d   : > { %v4285_v39 = vpop.eup %4284  ;;  %v1699_v38 = vmul.f32 %v4283_v59, %v8718_v14  ;;  %v8722_v59 = vld [vmem:[#allocation26_spill] sm:$0xff]  ;;  %v8724_v49 = vmax.f32 %v8723_v44, 0.0  ;;  %vm8755_vm11 = vmmov %vm8752_vm5 }
 0x65e   : > { %v4287_v24 = vpop.eup %4286  ;;  %8719 = vst [vmem:[#allocation45_spill] sm:$0xff] %v6912_v51  ;;  %v6916_v36 = vmul.f32 %v8412_v2, %v1700_v50  ;;  %v1698_v48 = vmul.f32 %v4285_v39, %v8721_v58  ;;  %v1302_v60 = vmul.f32 %v6794_v56, %v8722_v59  ;;  %vm8756_vm4 = vmmov %vm8752_vm5 }
 0x65f   : > { %v6902_v9 = vpop.eup %4288  ;;  %v1697_v14 = vmul.f32 %v4287_v24, %v8724_v49  ;;  %v6935_v39 = vmul.f32 %v8413_v33, %v1699_v38  ;;  %v8415_v24 = vunpack.i.l.bf16 %v6815_v8  ;;  %vm8758_vm2 = vmmov %vm8756_vm4 }
 0x660   : > { %v4291_v35 = vpop.eup %4290  ;;  %v6949_v38 = vmul.f32 %v8414_v53, %v1698_v48  ;;  %4302 = vtanh.f32 %v1302_v60  ;;  %v8732_v53 = vld [vmem:[#allocation9_spill] sm:$0xff]  ;;  %vm3574_vm0 = vweird.f32 %v6902_v9  ;;  %vm8760_vm1 = vmmov %vm8758_vm2 }
 0x661   : > { %v4293_v15 = vpop.eup %4292  ;;  %v1696_v58 = vmul.f32 %v4291_v35, %v8727_v1  ;;  %v6945_v44 = vmul.f32 %v6801_v43, %v6935_v39  ;;  %v6955_v35 = vmul.f32 %v8415_v24, %v1697_v14  ;;  %v8729_v1 = vmax.f32 %v8728_v13, 0.0  ;;  %vm7054_vm9 = vmor %vm3573_vm3, %vm3574_vm0 }
 0x662   : > { %v4295_v30 = vpop.eup %4294  ;;  %4304 = vtanh.f32 %v1301_v16  ;;  %v6966_v60 = vmul.f32 %v6809_v28, %v6949_v38  ;;  %v8733_v14 = vmax.f32 %v8732_v53, 0.0  ;;  %vm8762_vm3 = vmmov %vm8760_vm1 }
 0x663   : > { %v4297_v63 = vpop.eup %4296  ;;  %v1693_v2 = vmul.f32 %v4295_v30, %v8731_v10  ;;  %v6980_v16 = vmul.f32 %v6784_v5, %v6955_v35  ;;  %v8735_v30 = vld [vmem:[#allocation11_spill] sm:$0xff]  ;;  %vm8764_vm0 = vmmov %vm8760_vm1 }
 0x664   : > { %v4299_v49 = vpop.eup %4298  ;;  %v1692_v24 = vmul.f32 %v4297_v63, %v8733_v14  ;;  %v8736_v10 = vmax.f32 %v8735_v30, 0.0 }
 0x665   : > { %v6825_v12 = vpop.permute.xlu2 %2506  ;;  %v6827_v23 = vpop.permute.xlu1 %2491 }
 0x666   : > { %8695 = vst [vmem:[#allocation20_spill] sm:$0xff] %v6825_v12  ;;  %v6833_v54 = vmul.f32 %v6825_v12, %v6821_v20  ;;  %v6931_v50 = vmul.f32 %v6827_v23, %v6916_v36  ;;  %v6988_v14 = vpop.eup %4300 }
 0x667   : > { %v4303_v42 = vpop.eup %4302  ;;  %v3539_v17 = vmul.f32 %v6988_v14, %v6906_v25  ;;  %vm3544_vm10 = vweird.f32 %v6988_v14 }
 0x668   : > { %8697 = vst [vmem:[#allocation40_spill] sm:$0xff] %v6833_v54  ;;  %2541 = vmatpush.msrb.mxu1 %v6833_v54  ;;  %vm3545_vm12 = vmor %vm3543_vm7, %vm3544_vm10 }
 0x669   : > { %vm8770_vm7 = vmmov %vm8764_vm0 }
 0x66a   : > { %vm8774_vm10 = vmmov %vm8764_vm0 }
 0x66d   : > { %v6852_v4 = vpop.permute.xlu2 %2466  ;;  %v6854_v45 = vpop.permute.xlu1 %2461 }
 0x675   : > { %v6885_v29 = vpop.permute.xlu0 %2501  ;;  %v6887_v6 = vpop.permute.xlu2 %2456 }
 0x676   : > { %8715 = vst [vmem:[#allocation38_spill] sm:$0xff] %v6885_v29  ;;  %v6890_v0 = vpop.permute.xlu1 %2451  ;;  %v6894_v27 = vmul.f32 %v6885_v29, %v6881_v7 }
 0x678   : > { %8716 = vst [vmem:[#allocation37_spill] sm:$0xff] %v6894_v27  ;;  %2542 = vmatpush.msrb.mxu1 %v6894_v27 }
 0x67a   : > { %2543 = vmatpush.msrb.mxu1 %v6912_v51 }
 0x67c   : > { %2544 = vmatpush.msrb.mxu1 %v6931_v50  ;;  %2754 = vadd.xlane.f32.xlu2 %v2753_v26  ;;  %v1695_v26 = vmul.f32 %v4293_v15, %v8729_v1  ;;  %v8734_v15 = vunpack.i.h.bf16 %v6815_v8  ;;  %v1694_v1 = vmul.f32 %v4299_v49, %v8736_v10  ;;  %v8738_v49 = vunpack.i.l.bf16 %v6844_v46  ;;  %v4305_v10 = vpop.eup %4304 }
 0x67d   : > { %v4111_v31 = vpop.permute.xlu0 %4110  ;;  %v6951_v32 = vpop.permute.xlu2 %2446 }
 0x67e   : > { %v4113_v33 = vunpack.i.h.bf16 %v4111_v31  ;;  %v4112_v59 = vunpack.i.l.bf16 %v4111_v31  ;;  %v6961_v48 = vpop.permute.xlu1 %2441  ;;  %2545 = vmatpush.msrb.mxu1 %v6945_v44  ;;  %v6973_v11 = vmul.f32 %v8734_v15, %v1696_v58  ;;  %v3569_v31 = vmul.f32 %v6902_v9, %v6850_v40  ;;  %v8737_v15 = vld [vmem:[#allocation23_spill] sm:$0xff] }
 0x67f   : > { %v1300_v13 = vmul.f32 %v6794_v56, %v8737_v15  ;;  %v7013_v47 = vmul.f32 %v8739_v57, %v1694_v1 }
 0x680   : > { %2546 = vmatpush.msrb.mxu1 %v6966_v60  ;;  %v6984_v53 = vmul.f32 %v4112_v59, %v1693_v2  ;;  %v6986_v63 = vmul.f32 %v4113_v33, %v1692_v24  ;;  %v6996_v62 = vmul.f32 %v6803_v22, %v6973_v11  ;;  %v7000_v2 = vmul.f32 %v8738_v49, %v1695_v26 }
 0x681   : > { %v3570_v58 = vsub.f32 1.0, %v3569_v31  ;;  %v1691_v31 = vmul.f32 %v4303_v42, %v8741_v3  ;;  %4306 = vtanh.f32 %v1300_v13  ;;  %v7028_v57 = vmul.f32 %v6854_v45, %v7013_v47 }
 0x682   : > { %2547 = vmatpush.msrb.mxu1 %v6980_v16  ;;  %v2514_v24 = vmul.f32 %v6887_v6, %v6984_v53  ;;  %v2513_v30 = vmul.f32 %v6890_v0, %v6986_v63  ;;  %v7009_v15 = vmul.f32 %v6852_v4, %v7000_v2  ;;  %4308 = vtanh.f32 %v1299_v19 }
 0x683   : > { %v3540_v13 = vsub.f32 1.0, %v3539_v17  ;;  %v3577_v19 = vand.u32 2147483647, %v6850_v40  ;;  %v8747_v17 = vld [vmem:[#allocation6_spill] sm:$0xff] }
 0x684   : > { %2548 = vmatpush.msrb.mxu1 %v6996_v62  ;;  %v7015_v26 = vmul.f32 %v4113_v33, %v2513_v30  ;;  %v7017_v49 = vmul.f32 %v4112_v59, %v2514_v24  ;;  %v8743_v33 = vld [vmem:[#allocation7_spill] sm:$0xff] }
 0x685   : > { %v4116_v55 = vpop.permute.xlu0 %4115  ;;  %v7019_v61 = vpop.permute.xlu2 %2436  ;;  %v8744_v59 = vmax.f32 %v8743_v33, 0.0  ;;  %vm3578_vm14 = vcmp.eq.f32.partialorder %v3577_v19, 8.507059e+37 }
 0x686   : > { %v4118_v12 = vunpack.i.h.bf16 %v4116_v55  ;;  %v4117_v54 = vunpack.i.l.bf16 %v4116_v55  ;;  %v2134_v29 = vpop.permute.xlu1 %2133  ;;  %2549 = vmatpush.msrb.mxu1 %v7009_v15  ;;  %v3571_v55 = vmul.f32 %v6902_v9, %v3570_v58 }
 0x687   : > { %v1690_v1 = vmul.f32 %v4305_v10, %v8744_v59  ;;  %v2151_v37 = vmul.f32 %v2134_v29, %v6821_v20  ;;  %v4307_v20 = vpop.eup %4306  ;;  %v3579_v29 = vand.u32 2147483648, %v6850_v40 }
 0x688   : > { %2550 = vmatpush.msrb.mxu1 %v7028_v57  ;;  %v7036_v3 = vmul.f32 %v4117_v54, %v1691_v31  ;;  %v3572_v58 = vadd.f32 %v6902_v9, %v3571_v55  ;;  %v4309_v55 = vpop.eup %4308 }
 0x689   : > { %v7038_v52 = vmul.f32 %v4118_v12, %v1690_v1  ;;  %2152 = vmatpush.msrb.mxu3 %v2151_v37  ;;  %v3580_v21 = vor.u32 1.1754944e-38, %v3579_v29 }
 0x68a   : > { %2551 = vmatpush.msrb.mxu1 %v2514_v24  ;;  %v2512_v42 = vmul.f32 %v6951_v32, %v7036_v3 }
 0x68b   : > { %v2511_v56 = vmul.f32 %v6961_v48, %v7038_v52 }
 0x68c   : > { %2552 = vmatpush.msrb.mxu1 %v2513_v30  ;;  %v7052_v24 = vmul.f32 %v4117_v54, %v2512_v42  ;;  %v8748_v30 = vmax.f32 %v8747_v17, 0.0  ;;  %v3576_v54 = vsel %vm7054_vm9, %v6902_v9, %v3572_v58  ;;  %vm8766_vm9 = vmmov %vm8764_vm0 }
 0x68d   : > { %v7050_v37 = vmul.f32 %v4118_v12, %v2511_v56  ;;  %v2129_v10 = vpop.permute.xlu2 %2128  ;;  %v4121_v31 = vpop.permute.xlu0 %4120  ;;  %v3541_v12 = vmul.f32 %v6988_v14, %v3540_v13  ;;  %v3581_v29 = vsel %vm3578_vm14, %v3580_v21, %v3576_v54  ;;  %v3547_v13 = vand.u32 2147483647, %v6906_v25  ;;  %vm8768_vm14 = vmmov %vm8764_vm0 }
 0x68e   : > { %v2150_v59 = vmul.f32 %v2129_v10, %v6881_v7  ;;  %v4122_v1 = vunpack.i.l.bf16 %v4121_v31  ;;  %2553 = vmatpush.msrb.mxu1 %v2512_v42  ;;  %v1689_v27 = vmul.f32 %v4307_v20, %v8748_v30  ;;  %v4123_v40 = vunpack.i.h.bf16 %v4121_v31  ;;  %v8749_v42 = vld [vmem:[#allocation5_spill] sm:$0xff]  ;;  %v2119_v19 = vpop.permute.xlu1 %2118 }
 0x68f   : > { %v8750_v10 = vmax.f32 %v8749_v42, 0.0  ;;  %vm3548_vm15 = vcmp.eq.f32.partialorder %v3547_v13, 8.507059e+37  ;;  %v4403_v42 = vld [vmem:[%s4712_s24 + $0x8] sm:$0xff] }
 0x690   : > { %2153 = vmatpush.msrb.mxu3 %v2150_v59  ;;  %2554 = vmatpush.msrb.mxu1 %v2511_v56  ;;  %v7065_v51 = vmul.f32 %v4122_v1, %v1689_v27  ;;  %v3549_v56 = vand.u32 2147483648, %v6906_v25  ;;  %v3542_v27 = vadd.f32 %v6988_v14, %v3541_v12 }
 0x691   : > { %v1688_v20 = vmul.f32 %v4309_v55, %v8750_v10  ;;  %v4402_v55 = vld [vmem:[%s4712_s24] sm:$0xff] }
 0x692   : > { %v2510_v7 = vmul.f32 %v7019_v61, %v7065_v51  ;;  %v3550_v33 = vor.u32 1.1754944e-38, %v3549_v56  ;;  %v3546_v59 = vsel %vm3545_vm12, %v6988_v14, %v3542_v27  ;;  %vm8779_vm12 = vmmov %vm8764_vm0 }
 0x693   : > { %v7074_v9 = vmul.f32 %v4123_v40, %v1688_v20 }
 0x694   : > { %3670 = vperm.xlu2 %4081, %v3581_v29   ;;  %2555 = vmatpush.msrb.mxu1 %v2510_v7  ;;  %v7078_v58 = vmul.f32 %v4122_v1, %v2510_v7  ;;  %v3551_v25 = vsel %vm3548_vm15, %v3550_v33, %v3546_v59  ;;  %v2148_v7 = vmul.f32 %v2119_v19, %v6916_v36  ;;  %vm8783_vm15 = vmmov %vm8764_vm0 }
 0x695   : > { %v7080_v31 = vpop.permute.xlu0 %2431  ;;  %v2114_v30 = vpop.permute.xlu2 %2113 }
 0x696   : > { %v2509_v21 = vmul.f32 %v7080_v31, %v7074_v9  ;;  %v2104_v54 = vpop.permute.xlu1 %2103  ;;  %v2147_v14 = vmul.f32 %v2114_v30, %v6935_v39 }
 0x697   : > { %v2145_v29 = vmul.f32 %v2104_v54, %v6955_v35  ;;  %v4411_v54 = vld [vmem:[%s4712_s24 + $0x48] sm:$0xff] }
 0x698   : > { %2556 = vmatpush.msrb.mxu1 %v2509_v21  ;;  %v7085_v17 = vmul.f32 %v4123_v40, %v2509_v21  ;;  %v4405_v21 = vld [vmem:[%s4712_s24 + $0x18] sm:$0xff] }
 0x699   : > { %2557 = vmatmul.f32.vlgmr.msrb.gmra.mxu1 %v4402_v55 }
 0x69c   : > { %3660 = vperm.xlu2 %4081, %v3551_v25  }
 0x69d   : > { %v2124_v1 = vpop.permute.xlu0 %2123  ;;  %v2099_v40 = vpop.permute.xlu2 %2098 }
 0x69e   : > { %v2149_v12 = vmul.f32 %v2124_v1, %v6898_v41  ;;  %v2089_v56 = vpop.permute.xlu1 %2088  ;;  %v4404_v41 = vld [vmem:[%s4712_s24 + $0x10] sm:$0xff]  ;;  %v2144_v36 = vmul.f32 %v2099_v40, %v6973_v11  ;;  %v4407_v1 = vld [vmem:[%s4712_s24 + $0x28] sm:$0xff] }
 0x69f   : > { %v2142_v19 = vmul.f32 %v2089_v56, %v7013_v47  ;;  %v448_v40 = vld [vmem:[%s8295_s5 + $0x28] sm:$0xff]  ;;  %v446_v56 = vld [vmem:[%s8295_s5 + $0x18] sm:$0xff] }
 0x6a0   : > { %2154 = vmatpush.msrb.mxu3 %v2149_v12  ;;  %v4409_v12 = vld [vmem:[%s4712_s24 + $0x38] sm:$0xff] }
 0x6a1   : > { %2560 = vmatmul.f32.gmra.mxu1 %v4403_v42  ;;  %v449_v42 = vld [vmem:[%s8295_s5 + $0x30] sm:$0xff] }
 0x6a2   : > { %2155 = vmatpush.msrb.mxu3 %v2148_v7  ;;  %v4412_v7 = vld [vmem:[%s4712_s24 + $0x50] sm:$0xff] }
 0x6a4   : > { %2156 = vmatpush.msrb.mxu3 %v2147_v14  ;;  %v4413_v14 = vld [vmem:[%s4712_s24 + $0x58] sm:$0xff] }
 0x6a5   : > { %v2109_v10 = vpop.permute.xlu0 %2108  ;;  %v2084_v27 = vpop.permute.xlu2 %2083 }
 0x6a6   : > { %v2146_v20 = vmul.f32 %v2109_v10, %v6949_v38  ;;  %v2141_v38 = vmul.f32 %v2084_v27, %v6984_v53  ;;  %v2074_v35 = vpop.permute.xlu1 %2073  ;;  %v442_v10 = vld [vmem:[%s8294_s4] sm:$0xff]  ;;  %v4415_v27 = vld [vmem:[%s4712_s24 + $0x68] sm:$0xff] }
 0x6a7   : > { %v2139_v30 = vmul.f32 %v2074_v35, %v7036_v3  ;;  %v4408_v3 = vld [vmem:[%s4712_s24 + $0x30] sm:$0xff] }
 0x6a8   : > { %2157 = vmatpush.msrb.mxu3 %v2146_v20  ;;  %v447_v20 = vld [vmem:[%s8295_s5 + $0x20] sm:$0xff] }
 0x6a9   : > { %2563 = vmatmul.f32.gmra.mxu1 %v4404_v41  ;;  %v445_v41 = vld [vmem:[%s8295_s5 + $0x10] sm:$0xff] }
 0x6aa   : > { %2158 = vmatpush.msrb.mxu3 %v2145_v29  ;;  %v4414_v29 = vld [vmem:[%s4712_s24 + $0x60] sm:$0xff] }
 0x6ac   : > { %2159 = vmatpush.msrb.mxu3 %v2144_v36  ;;  %v444_v36 = vld [vmem:[%s8295_s5 + $0x8] sm:$0xff] }
 0x6ad   : > { %v2094_v39 = vpop.permute.xlu0 %2093  ;;  %v2069_v59 = vpop.permute.xlu2 %2068 }
 0x6ae   : > { %v2143_v13 = vmul.f32 %v2094_v39, %v7000_v2  ;;  %v4406_v2 = vld [vmem:[%s4712_s24 + $0x20] sm:$0xff]  ;;  %v2138_v47 = vmul.f32 %v2069_v59, %v7038_v52  ;;  %v2059_v53 = vpop.permute.xlu1 %2058  ;;  %v4416_v39 = vld [vmem:[%s4712_s24 + $0x70] sm:$0xff] }
 0x6af   : > { %v4410_v52 = vld [vmem:[%s4712_s24 + $0x40] sm:$0xff] }
 0x6b0   : > { %2160 = vmatpush.msrb.mxu3 %v2143_v13  ;;  %v4417_v13 = vld [vmem:[%s4712_s24 + $0x78] sm:$0xff]  ;;  %s326_s24 = sand.u32 1, %s4521_s28  }
 0x6b1   : > { %2566 = vmatmul.f32.gmra.mxu1 %v4405_v21  ;;  %s3902_s23 = sshll.u32 %s326_s24, 3  ;;  %s3800_s18 = scalar_lea.sflag [#allocation3], %s326_s24 }
 0x6b2   : > { %2161 = vmatpush.msrb.mxu3 %v2142_v19  ;;  %s328_s12 = scalar_lea.vmem [#allocation2], %s3902_s23 }
 0x6b3   : > { %s3812_s13 = sshll.u32 %s328_s12, 4  ;;  %s3813_s13 = int_to_ptr.vmem [resolvable:$true] %s3812_s13 }
 0x6b4   : > { %2162 = vmatpush.msrb.mxu3 %v2141_v38 }
 0x6b5   : > { %v2079_v33 = vpop.permute.xlu0 %2078 }
 0x6b6   : > { %v2140_v11 = vmul.f32 %v2079_v33, %v6986_v63  ;;  %v2136_v63 = vmul.f32 %v2059_v53, %v7074_v9  ;;  %v450_v9 = vld [vmem:[%s8295_s5 + $0x38] sm:$0xff] }
 0x6b8   : > { %2163 = vmatpush.msrb.mxu3 %v2140_v11 }
 0x6b9   : > { %2569 = vmatmul.f32.gmra.mxu1 %v4406_v2 }
 0x6ba   : > { %2164 = vmatpush.msrb.mxu3 %v2139_v30 }
 0x6bc   : > { %2165 = vmatpush.msrb.mxu3 %v2138_v47 }
 0x6bd   : > { %v2064_v55 = vpop.permute.xlu0 %2063 }
 0x6be   : > { %v2137_v25 = vmul.f32 %v2064_v55, %v7065_v51  ;;  %v451_v51 = vld [vmem:[%s8295_s5 + $0x40] sm:$0xff] }
 0x6c0   : > { %2166 = vmatpush.msrb.mxu3 %v2137_v25 }
 0x6c1   : > { %2572 = vmatmul.f32.gmra.mxu1 %v4407_v1 }
 0x6c2   : > { %2167 = vmatpush.msrb.mxu3 %v2136_v63 }
 0x6c3   : > { %2168 = vmatmul.f32.vlgmr.msrb.gmra.mxu3 %v442_v10 }
 0x6c4   : > { %2679 = vmatpush.msra.mxu3 %v451_v51 }
 0x6c6   : > { %2680 = vmatpush.msra.mxu3 %v450_v9  ;;  %v8765_v9 = vunpack.i.h.bf16 %v6805_v18 }
 0x6c8   : > { %2681 = vmatpush.msra.mxu3 %v449_v42 }
 0x6c9   : > { %2575 = vmatmul.f32.gmra.mxu1 %v4408_v3 }
 0x6ca   : > { %2682 = vmatpush.msra.mxu3 %v448_v40 }
 0x6cc   : > { %2683 = vmatpush.msra.mxu3 %v447_v20 }
 0x6ce   : > { %2684 = vmatpush.msra.mxu3 %v446_v56 }
 0x6d0   : > { %2685 = vmatpush.msra.mxu3 %v445_v41 }
 0x6d1   : > { %2578 = vmatmul.f32.gmra.mxu1 %v4409_v12  ;;  %v8761_v12 = vunpack.i.h.bf16 %v6815_v8 }
 0x6d2   : > { %2686 = vmatpush.msra.mxu3 %v444_v36 }
 0x6d9   : > { %2581 = vmatmul.f32.gmra.mxu1 %v4410_v52 }
 0x6e1   : > { %2584 = vmatmul.f32.gmra.mxu1 %v4411_v54 }
 0x6e9   : > { %2587 = vmatmul.f32.gmra.mxu1 %v4412_v7 }
 0x6ef   : > { %v2755_v20 = vpop.xlane.xlu2 %2754 }
 0x6f1   : > { %2590 = vmatmul.f32.gmra.mxu1 %v4413_v14 }
 0x6f9   : > { %2593 = vmatmul.f32.gmra.mxu1 %v4414_v29  ;;  %v2756_v29 = vrot.slane %v2755_v20, 4 }
 0x6fb   : > { %v2757_v36 = vadd.f32 %v2756_v29, %v2755_v20 }
 0x701   : > { %2596 = vmatmul.f32.gmra.mxu1 %v4415_v27 }
 0x709   : > { %2599 = vmatmul.f32.gmra.mxu1 %v4416_v39  ;;  %v8772_v39 = vunpack.i.l.bf16 %v6782_v34 }
 0x711   : > { %2602 = vmatmul.f32.gmra.mxu1 %v4417_v13 }
 0x716   : > { %v2558_v19 = vpop.f32.mrf.mxu1 }
 0x717   : > { %v2559_v21 = vadd.f32 %v2558_v19, %v7085_v17 }
 0x719   : > { %v2606_v38 = vmul.f32 %v2559_v21, %v7080_v31  ;;  %v8773_v21 = vld [vmem:[#allocation62_spill] sm:$0xff] }
 0x71b   : > { %3989 = vmatmul.msk.f32.vlgmr.msra.gmra.mxu3 %vm8751_vm13, %v2606_v38  ;;  %vm8786_vm13 = vmmov %vm8764_vm0 }
 0x71e   : > { %v2561_v35 = vpop.f32.mrf.mxu1 }
 0x71f   : > { %v2562_v33 = vadd.f32 %v2561_v35, %v7078_v58 }
 0x721   : > { %v2607_v11 = vmul.f32 %v2562_v33, %v7019_v61  ;;  %v8775_v33 = vld [vmem:[#allocation37_spill] sm:$0xff] }
 0x723   : > { %3990 = vmatmul.msk.f32.gmra.mxu3 %vm8752_vm5, %v2607_v11  ;;  %v8776_v11 = vld [vmem:[#allocation24_spill] sm:$0xff]  ;;  %vm8788_vm5 = vmmov %vm8764_vm0 }
 0x726   : > { %v2564_v59 = vpop.f32.mrf.mxu1 }
 0x727   : > { %v2565_v30 = vadd.f32 %v2564_v59, %v7050_v37  ;;  %v8777_v59 = vunpack.i.h.bf16 %v8776_v11 }
 0x729   : > { %v2608_v2 = vmul.f32 %v2565_v30, %v6961_v48  ;;  %v2539_v30 = vmul.f32 %v8777_v59, %v8775_v33 }
 0x72b   : > { %3991 = vmatmul.msk.f32.gmra.mxu3 %vm8753_vm6, %v2608_v2  ;;  %vm8790_vm6 = vmmov %vm8764_vm0 }
 0x72e   : > { %v2567_v47 = vpop.f32.mrf.mxu1 }
 0x72f   : > { %v2568_v17 = vadd.f32 %v2567_v47, %v7052_v24  ;;  %v8757_v24 = vunpack.i.h.bf16 %v6844_v46 }
 0x731   : > { %v2609_v31 = vmul.f32 %v2568_v17, %v6951_v32  ;;  %v2531_v32 = vmul.f32 %v8757_v24, %v7028_v57  ;;  %v2533_v57 = vmul.f32 %v8761_v12, %v6996_v62  ;;  %v2535_v62 = vmul.f32 %v8765_v9, %v6966_v60  ;;  %v8778_v17 = vld [vmem:[#allocation38_spill] sm:$0xff] }
 0x732   : > { %v8769_v60 = vunpack.i.h.bf16 %v6782_v34  ;;  %v8780_v34 = vld [vmem:[#allocation40_spill] sm:$0xff] }
 0x733   : > { %3992 = vmatmul.msk.f32.gmra.mxu3 %vm8754_vm8, %v2609_v31  ;;  %vm8792_vm8 = vmmov %vm8764_vm0 }
 0x734   : > { %v2537_v56 = vmul.f32 %v8769_v60, %v6931_v50 }
 0x736   : > { %v2570_v53 = vpop.f32.mrf.mxu1 }
 0x737   : > { %v2571_v58 = vadd.f32 %v2570_v53, %v7015_v26  ;;  %v8781_v53 = vunpack.i.l.bf16 %v8776_v11 }
 0x739   : > { %v2610_v61 = vmul.f32 %v2571_v58, %v6890_v0  ;;  %v8759_v0 = vunpack.i.l.bf16 %v6844_v46  ;;  %v8763_v46 = vunpack.i.l.bf16 %v6815_v8  ;;  %v8767_v8 = vunpack.i.l.bf16 %v6805_v18 }
 0x73a   : > { %v2758_v18 = vrot.slane %v2757_v36, 2  ;;  %v2540_v58 = vmul.f32 %v8781_v53, %v8780_v34 }
 0x73b   : > { %3993 = vmatmul.msk.f32.gmra.mxu3 %vm8755_vm11, %v2610_v61  ;;  %v2532_v26 = vmul.f32 %v8759_v0, %v7009_v15  ;;  %v2534_v15 = vmul.f32 %v8763_v46, %v6980_v16  ;;  %v2536_v16 = vmul.f32 %v8767_v8, %v6945_v44  ;;  %v8771_v44 = vld [vmem:[#allocation45_spill] sm:$0xff]  ;;  %vm8794_vm11 = vmmov %vm8764_vm0 }
 0x73c   : > { %v2759_v35 = vadd.f32 %v2758_v18, %v2757_v36 }
 0x73e   : > { %v2573_v55 = vpop.f32.mrf.mxu1  ;;  %v2760_v50 = vrot.slane %v2759_v35, 1 }
 0x73f   : > { %v2574_v37 = vadd.f32 %v2573_v55, %v7017_v49 }
 0x741   : > { %v2611_v48 = vmul.f32 %v2574_v37, %v6887_v6  ;;  %v8782_v37 = vld [vmem:[#allocation20_spill] sm:$0xff] }
 0x743   : > { %3994 = vmatmul.msk.f32.gmra.mxu3 %vm8756_vm4, %v2611_v48 }
 0x746   : > { %v2576_v25 = vpop.f32.mrf.mxu1  ;;  %v7212_v24 = vpop.f32.mrf.mxu3 }
 0x747   : > { %v2577_v63 = vadd.f32 %v2576_v25, %v2531_v32  ;;  %8784 = vst [vmem:[#allocation36_spill] sm:$0xff] %v7212_v24  ;;  %v7217_v32 = vld [vmem:[%s8296_s6 + $0x2] ss:$0 sm:$0xff] }
 0x749   : > { %v2612_v1 = vmul.f32 %v2577_v63, %v6854_v45  ;;  %v7222_v63 = vld [vmem:[%s8296_s6 + $0x3] ss:$0 sm:$0xff] }
 0x74b   : > { %3995 = vmatmul.msk.f32.gmra.mxu3 %vm8758_vm2, %v2612_v1 }
 0x74e   : > { %v2579_v3 = vpop.f32.mrf.mxu1 }
 0x74f   : > { %v2580_v49 = vadd.f32 %v2579_v3, %v2532_v26 }
 0x751   : > { %v2613_v6 = vmul.f32 %v2580_v49, %v6852_v4 }
 0x753   : > { %3996 = vmatmul.msk.f32.gmra.mxu3 %vm8760_vm1, %v2613_v6 }
 0x756   : > { %v2582_v52 = vpop.f32.mrf.mxu1 }
 0x757   : > { %v2583_v54 = vadd.f32 %v2582_v52, %v2533_v57 }
 0x759   : > { %v2614_v45 = vmul.f32 %v2583_v54, %v6803_v22 }
 0x75b   : > { %3997 = vmatmul.msk.f32.gmra.mxu3 %vm8762_vm3, %v2614_v45  ;;  %vm8796_vm3 = vmmov %vm8764_vm0 }
 0x75e   : > { %v2585_v7 = vpop.f32.mrf.mxu1 }
 0x75f   : > { %v2586_v51 = vadd.f32 %v2585_v7, %v2534_v15 }
 0x761   : > { %v2615_v4 = vmul.f32 %v2586_v51, %v6784_v5 }
 0x763   : > { %3998 = vmatmul.msk.f32.gmra.mxu3 %vm8764_vm0, %v2615_v4 }
 0x766   : > { %v2588_v42 = vpop.f32.mrf.mxu1 }
 0x767   : > { %v2589_v14 = vadd.f32 %v2588_v42, %v2535_v62 }
 0x769   : > { %v2616_v22 = vmul.f32 %v2589_v14, %v6809_v28 }
 0x76b   : > { %3999 = vmatmul.msk.f32.gmra.mxu3 %vm8766_vm9, %v2616_v22  ;;  %vm8799_vm9 = vmmov %vm8764_vm0 }
 0x76e   : > { %v2591_v40 = vpop.f32.mrf.mxu1 }
 0x76f   : > { %v2592_v10 = vadd.f32 %v2591_v40, %v2536_v16 }
 0x771   : > { %v2617_v5 = vmul.f32 %v2592_v10, %v6801_v43  ;;  %v2538_v43 = vmul.f32 %v8772_v39, %v8771_v44 }
 0x773   : > { %4000 = vmatmul.msk.f32.gmra.mxu3 %vm8768_vm14, %v2617_v5  ;;  %vm8801_vm14 = vmmov %vm8764_vm0 }
 0x776   : > { %v2594_v41 = vpop.f32.mrf.mxu1 }
 0x777   : > { %v2595_v28 = vadd.f32 %v2594_v41, %v2537_v56 }
 0x779   : > { %v2618_v27 = vmul.f32 %v2595_v28, %v6827_v23  ;;  %v2761_v23 = vadd.f32 %v2760_v50, %v2759_v35 }
 0x77b   : > { %4001 = vmatmul.msk.f32.gmra.mxu3 %vm8770_vm7, %v2618_v27  ;;  %4035 = vpush %v2761_v23  ;;  %vm8803_vm7 = vmmov %vm8764_vm0 }
 0x77e   : > { %v2597_v13 = vpop.f32.mrf.mxu1 }
 0x77f   : > { %v2598_v19 = vadd.f32 %v2597_v13, %v2538_v43 }
 0x781   : > { %v2619_v38 = vmul.f32 %v2598_v19, %v8773_v21 }
 0x783   : > { %4002 = vmatmul.msk.f32.gmra.mxu3 %vm8774_vm10, %v2619_v38  ;;  %vm8805_vm10 = vmmov %vm8764_vm0 }
 0x786   : > { %v2600_v2 = vpop.f32.mrf.mxu1 }
 0x787   : > { %v2601_v47 = vadd.f32 %v2600_v2, %v2539_v30 }
 0x789   : > { %v2620_v31 = vmul.f32 %v2601_v47, %v8778_v17 }
 0x78b   : > { %4003 = vmatmul.msk.f32.gmra.mxu3 %vm8779_vm12, %v2620_v31  ;;  %vm8807_vm12 = vmmov %vm8764_vm0 }
 0x78e   : > { %v2603_v61 = vpop.f32.mrf.mxu1 }
 0x78f   : > { %v2604_v55 = vadd.f32 %v2603_v61, %v2540_v58 }
 0x791   : > { %v2621_v48 = vmul.f32 %v2604_v55, %v8782_v37 }
 0x793   : > { %4004 = vmatmul.msk.f32.gmra.mxu3 %vm8783_vm15, %v2621_v48  ;;  %vm8809_vm15 = vmmov %vm8764_vm0 }
 0x79e   : > { %v2688_v25 = vpop.f32.mrf.mxu3 }
 0x79f   : > { %v7225_v1 = vadd.f32 %v7217_v32, %v2688_v25 }
 0x7a1   : > { %8785 = vst [vmem:[#allocation35_spill] sm:$0xff] %v7225_v1  ;;  %v8439_v0 = vmax.f32 %v7225_v1, 0.0 }
 0x7a3   : > { %v2776_v26 = vmul.f32 %v7222_v63, %v8439_v0  ;;  %v8838_v0 = vld [vmem:[#allocation46_spill] sm:$0xff] }
 0x7a5   : > { %v2792_v3 = vsel %vm8786_vm13, %v2776_v26, 0.0  ;;  %vm8811_vm13 = vmmov %vm8764_vm0 }
 0x7a6   : > { %v2691_v49 = vpop.f32.mrf.mxu3  ;;  %2793 = vadd.xlane.f32.xlu2 %v2792_v3 }
 0x7a7   : > { %v7233_v6 = vadd.f32 %v7217_v32, %v2691_v49 }
 0x7a9   : > { %8787 = vst [vmem:[#allocation34_spill] sm:$0xff] %v7233_v6  ;;  %v8440_v12 = vmax.f32 %v7233_v6, 0.0  ;;  %v8844_v6 = vld [vmem:[#allocation44_spill] sm:$0xff] }
 0x7ab   : > { %v2777_v57 = vmul.f32 %v7222_v63, %v8440_v12  ;;  %v3032_v12 = vmul.f32 0.8, %v8838_v0 }
 0x7ac   : > { %s4036_s26 = spop %4035 }
 0x7ad   : > { %v2795_v52 = vsel %vm8788_vm5, %v2777_v57, 0.0  ;;  %v2763_v62 = vstv %s4036_s26  ;;  %vm8813_vm5 = vmmov %vm8764_vm0 }
 0x7ae   : > { %v2694_v54 = vpop.f32.mrf.mxu3  ;;  %2796 = vadd.xlane.f32.xlu0 %v2795_v52  ;;  %4310 = vrsqrt.f32 %v2763_v62  ;;  %vm2770_vm4 = vweird.f32 %v2763_v62 }
 0x7af   : > { %v7241_v45 = vadd.f32 %v7217_v32, %v2694_v54 }
 0x7b1   : > { %8789 = vst [vmem:[#allocation33_spill] sm:$0xff] %v7241_v45  ;;  %v8441_v46 = vmax.f32 %v7241_v45, 0.0 }
 0x7b3   : > { %v2778_v15 = vmul.f32 %v7222_v63, %v8441_v46  ;;  %v8839_v46 = vld [vmem:[#allocation50_spill] sm:$0xff] }
 0x7b4   : > { %v4311_v16 = vpop.eup %4310 }
 0x7b5   : > { %v2798_v7 = vsel %vm8790_vm6, %v2778_v15, 0.0  ;;  %v2765_v10 = vmul.f32 %v4311_v16, %v2763_v62  ;;  %vm2771_vm2 = vweird.f32 %v4311_v16  ;;  %vm8815_vm6 = vmmov %vm8764_vm0 }
 0x7b6   : > { %v2697_v51 = vpop.f32.mrf.mxu3  ;;  %2799 = vadd.xlane.f32.xlu1 %v2798_v7  ;;  %vm2772_vm1 = vmor %vm2770_vm4, %vm2771_vm2 }
 0x7b7   : > { %v7249_v4 = vadd.f32 %v7217_v32, %v2697_v51  ;;  %v2766_v20 = vmul.f32 %v4311_v16, %v2765_v10 }
 0x7b9   : > { %8791 = vst [vmem:[#allocation19_spill] sm:$0xff] %v7249_v4  ;;  %v8442_v9 = vmax.f32 %v7249_v4, 0.0  ;;  %v2767_v60 = vmul.f32 0.5, %v2766_v20 }
 0x7bb   : > { %v2779_v42 = vmul.f32 %v7222_v63, %v8442_v9  ;;  %v2768_v28 = vsub.f32 1.5, %v2767_v60  ;;  %v7432_v9 = vadd.f32 -0.0001, %v3032_v12 }
 0x7bd   : > { %v2801_v14 = vsel %vm8792_vm8, %v2779_v42, 0.0  ;;  %v2769_v27 = vmul.f32 %v4311_v16, %v2768_v28 }
 0x7be   : > { %v2700_v22 = vpop.f32.mrf.mxu3  ;;  %2802 = vadd.xlane.f32.xlu2 %v2801_v14 }
 0x7bf   : > { %v7257_v8 = vadd.f32 %v7217_v32, %v2700_v22  ;;  %v2773_v44 = vsel %vm2772_vm1, %v4311_v16, %v2769_v27 }
 0x7c0   : > { %4037 = vpush %v2773_v44 }
 0x7c1   : > { %8793 = vst [vmem:[#allocation31_spill] sm:$0xff] %v7257_v8  ;;  %v8443_v40 = vmax.f32 %v7257_v8, 0.0 }
 0x7c3   : > { %v2780_v5 = vmul.f32 %v7222_v63, %v8443_v40  ;;  %v8840_v40 = vld [vmem:[#allocation49_spill] sm:$0xff] }
 0x7c5   : > { %v2804_v29 = vsel %vm8794_vm11, %v2780_v5, 0.0 }
 0x7c6   : > { %v2703_v56 = vpop.f32.mrf.mxu3  ;;  %2805 = vadd.xlane.f32.xlu0 %v2804_v29  ;;  %v7336_v29 = vpop.permute.xlu0 %3665 }
 0x7c7   : > { %v7265_v41 = vadd.f32 %v7217_v32, %v2703_v56  ;;  %8812 = vst [vmem:[#allocation13_spill] sm:$0xff] %v7336_v29 }
 0x7c9   : > { %8795 = vst [vmem:[#allocation30_spill] sm:$0xff] %v7265_v41  ;;  %v8444_v36 = vmax.f32 %v7265_v41, 0.0 }
 0x7cb   : > { %v2781_v18 = vmul.f32 %v7222_v63, %v8444_v36 }
 0x7cd   : > { %v2807_v39 = vsel %vm8796_vm3, %v2781_v18, 0.0 }
 0x7ce   : > { %v2706_v43 = vpop.f32.mrf.mxu3  ;;  %2808 = vadd.xlane.f32.xlu1 %v2807_v39  ;;  %v7349_v39 = vpop.permute.xlu0 %3655 }
 0x7cf   : > { %v7273_v13 = vadd.f32 %v7217_v32, %v2706_v43  ;;  %8814 = vst [vmem:[#allocation12_spill] sm:$0xff] %v7349_v39  ;;  %v7351_v43 = vpop.permute.xlu2 %3670  ;;  %v4432_v39 = vld [vmem:[%s8293_s3 + $0x170] sm:$0xff] }
 0x7d1   : > { %8797 = vst [vmem:[#allocation18_spill] sm:$0xff] %v7273_v13  ;;  %v8445_v19 = vmax.f32 %v7273_v13, 0.0 }
 0x7d3   : > { %v2782_v21 = vmul.f32 %v7222_v63, %v8445_v19 }
 0x7d5   : > { %v2810_v38 = vsel %vm8764_vm0, %v2782_v21, 0.0 }
 0x7d6   : > { %v2709_v35 = vpop.f32.mrf.mxu3  ;;  %2811 = vadd.xlane.f32.xlu2 %v2810_v38 }
 0x7d7   : > { %v7281_v50 = vadd.f32 %v7217_v32, %v2709_v35 }
 0x7d9   : > { %8798 = vst [vmem:[#allocation32_spill] sm:$0xff] %v7281_v50  ;;  %v8446_v33 = vmax.f32 %v7281_v50, 0.0  ;;  %v4426_v50 = vld [vmem:[%s8293_s3 + $0x140] sm:$0xff] }
 0x7db   : > { %v2783_v11 = vmul.f32 %v7222_v63, %v8446_v33 }
 0x7dd   : > { %v2813_v59 = vsel %vm8799_vm9, %v2783_v11, 0.0 }
 0x7de   : > { %v2712_v30 = vpop.f32.mrf.mxu3  ;;  %2814 = vadd.xlane.f32.xlu0 %v2813_v59  ;;  %v8817_v59 = vld [vmem:[#allocation66_spill] sm:$0xff] }
 0x7df   : > { %v7289_v23 = vadd.f32 %v7217_v32, %v2712_v30  ;;  %vm8458_vm8 = vcmp.gt.f32.partialorder %v8817_v59, 0.0  ;;  %v7364_v30 = vpop.permute.xlu2 %3660 }
 0x7e0   : > { %8818 = vst [vmem:[#allocation9_spill] sm:$0xff] %v7364_v30 }
 0x7e1   : > { %8800 = vst [vmem:[#allocation17_spill] sm:$0xff] %v7289_v23  ;;  %v8447_v2 = vmax.f32 %v7289_v23, 0.0 }
 0x7e3   : > { %v2784_v47 = vmul.f32 %v7222_v63, %v8447_v2  ;;  %v8842_v2 = vld [vmem:[#allocation48_spill] sm:$0xff] }
 0x7e5   : > { %v2816_v17 = vsel %vm8801_vm14, %v2784_v47, 0.0  ;;  %v7366_v47 = vpop.permute.xlu1 %3675 }
 0x7e6   : > { %v2715_v31 = vpop.f32.mrf.mxu3  ;;  %2817 = vadd.xlane.f32.xlu1 %v2816_v17 }
 0x7e7   : > { %v7297_v34 = vadd.f32 %v7217_v32, %v2715_v31  ;;  %v8820_v31 = vld [vmem:[#allocation64_spill] sm:$0xff] }
 0x7e8   : > { %vm8459_vm11 = vcmp.gt.f32.partialorder %v8820_v31, 0.0 }
 0x7e9   : > { %8802 = vst [vmem:[#allocation16_spill] sm:$0xff] %v7297_v34  ;;  %v8448_v53 = vmax.f32 %v7297_v34, 0.0 }
 0x7eb   : > { %v2785_v58 = vmul.f32 %v7222_v63, %v8448_v53 }
 0x7ed   : > { %v2819_v61 = vsel %vm8803_vm7, %v2785_v58, 0.0 }
 0x7ee   : > { %v2718_v55 = vpop.f32.mrf.mxu3  ;;  %2820 = vadd.xlane.f32.xlu2 %v2819_v61  ;;  %v8822_v61 = vld [vmem:[#allocation22_spill] sm:$0xff] }
 0x7ef   : > { %v7305_v37 = vadd.f32 %v7217_v32, %v2718_v55  ;;  %vm8461_vm4 = vcmp.gt.f32.partialorder %v8822_v61, 0.0 }
 0x7f1   : > { %8804 = vst [vmem:[#allocation15_spill] sm:$0xff] %v7305_v37  ;;  %v8449_v48 = vmax.f32 %v7305_v37, 0.0  ;;  %s4038_s19 = spop %4037 }
 0x7f3   : > { %v2786_v25 = vmul.f32 %v7222_v63, %v8449_v48 }
 0x7f5   : > { %v2822_v26 = vsel %vm8805_vm10, %v2786_v25, 0.0  ;;  %vm2883_vm10 = vcmp.gt.f32.partialorder %v8839_v46, 0.0 }
 0x7f6   : > { %v2721_v3 = vpop.f32.mrf.mxu3  ;;  %2823 = vadd.xlane.f32.xlu0 %v2822_v26  ;;  %v8824_v26 = vld [vmem:[#allocation65_spill] sm:$0xff] }
 0x7f7   : > { %v7313_v49 = vadd.f32 %v7217_v32, %v2721_v3  ;;  %vm8463_vm2 = vcmp.gt.f32.partialorder %v8824_v26, 0.0 }
 0x7f9   : > { %8806 = vst [vmem:[#allocation26_spill] sm:$0xff] %v7313_v49  ;;  %v8450_v57 = vmax.f32 %v7313_v49, 0.0 }
 0x7fb   : > { %v2787_v52 = vmul.f32 %v7222_v63, %v8450_v57 }
 0x7fd   : > { %v2825_v54 = vsel %vm8807_vm12, %v2787_v52, 0.0  ;;  %v8825_v52 = vld [vmem:[#allocation28_spill] sm:$0xff]  ;;  %vm2884_vm12 = vcmp.gt.f32.partialorder %v8840_v40, 0.0 }
 0x7fe   : > { %v2724_v15 = vpop.f32.mrf.mxu3  ;;  %2826 = vadd.xlane.f32.xlu1 %v2825_v54  ;;  %vm8482_vm1 = vcmp.gt.f32.partialorder %v8825_v52, 0.0 }
 0x7ff   : > { %v7321_v7 = vadd.f32 %v7217_v32, %v2724_v15 }
 0x801   : > { %8808 = vst [vmem:[#allocation14_spill] sm:$0xff] %v7321_v7  ;;  %v8451_v51 = vmax.f32 %v7321_v7, 0.0 }
 0x803   : > { %v2788_v62 = vmul.f32 %v7222_v63, %v8451_v51 }
 0x805   : > { %v2828_v42 = vsel %vm8809_vm15, %v2788_v62, 0.0  ;;  %v8827_v62 = vld [vmem:[#allocation63_spill] sm:$0xff]  ;;  %vm2885_vm15 = vcmp.gt.f32.partialorder %v8842_v2, 0.0 }
 0x806   : > { %v2727_v14 = vpop.f32.mrf.mxu3  ;;  %2829 = vadd.xlane.f32.xlu2 %v2828_v42  ;;  %vm8464_vm3 = vcmp.gt.f32.partialorder %v8827_v62, 0.0 }
 0x807   : > { %v7329_v22 = vadd.f32 %v7217_v32, %v2727_v14 }
 0x809   : > { %8810 = vst [vmem:[#allocation27_spill] sm:$0xff] %v7329_v22  ;;  %v8452_v16 = vmax.f32 %v7329_v22, 0.0 }
 0x80b   : > { %v2789_v10 = vmul.f32 %v7222_v63, %v8452_v16 }
 0x80d   : > { %v2831_v5 = vsel %vm8811_vm13, %v2789_v10, 0.0 }
 0x80e   : > { %v2730_v20 = vpop.f32.mrf.mxu3  ;;  %2832 = vadd.xlane.f32.xlu0 %v2831_v5  ;;  %v8830_v5 = vld [vmem:[#allocation60_spill] sm:$0xff] }
 0x80f   : > { %v7339_v60 = vadd.f32 %v7217_v32, %v2730_v20  ;;  %vm8484_vm0 = vcmp.gt.f32.partialorder %v8830_v5, 0.0 }
 0x811   : > { %v8453_v56 = vmax.f32 %v7339_v60, 0.0 }
 0x813   : > { %v2790_v28 = vmul.f32 %v7222_v63, %v8453_v56  ;;  %v8843_v56 = vld [vmem:[#allocation47_spill] sm:$0xff] }
 0x814   : > { %vm2886_vm13 = vcmp.gt.f32.partialorder %v8843_v56, 0.0 }
 0x815   : > { %v2834_v27 = vsel %vm8813_vm5, %v2790_v28, 0.0  ;;  %v8831_v28 = vld [vmem:[#allocation59_spill] sm:$0xff] }
 0x816   : > { %v2733_v18 = vpop.f32.mrf.mxu3  ;;  %2835 = vadd.xlane.f32.xlu1 %v2834_v27  ;;  %vm8483_vm9 = vcmp.gt.f32.partialorder %v8831_v28, 0.0 }
 0x817   : > { %v7347_v44 = vadd.f32 %v7217_v32, %v2733_v18 }
 0x819   : > { %v8454_v21 = vmax.f32 %v7347_v44, 0.0  ;;  %v7368_v17 = vpop.xlane.xlu2 %2793 }
 0x81a   : > { %8819 = vst [vmem:[#allocation11_spill] sm:$0xff] %v7368_v17  ;;  %v2889_v58 = vsel %vm8459_vm11, %v7368_v17, -1e+30 }
 0x81b   : > { %v2791_v38 = vmul.f32 %v7222_v63, %v8454_v21 }
 0x81d   : > { %v2837_v35 = vsel %vm8815_vm6, %v2791_v38, 0.0  ;;  %v8833_v38 = vld [vmem:[#allocation55_spill] sm:$0xff] }
 0x81e   : > { %2838 = vadd.xlane.f32.xlu0 %v2837_v35  ;;  %vm2881_vm14 = vcmp.gt.f32.partialorder %v8833_v38, 0.0 }
 0x821   : > { %v7358_v11 = vpop.xlane.xlu0 %2796 }
 0x822   : > { %8816 = vst [vmem:[#allocation10_spill] sm:$0xff] %v7358_v11  ;;  %v2890_v32 = vsel %vm8458_vm8, %v7358_v11, -1e+30 }
 0x823   : > { %2912 = vperm.xlu2 %4081, %v2890_v32  }
 0x829   : > { %v7371_v63 = vpop.xlane.xlu1 %2799 }
 0x82a   : > { %8821 = vst [vmem:[#allocation23_spill] sm:$0xff] %v7371_v63  ;;  %v2891_v55 = vsel %vm8461_vm4, %v7371_v63, -1e+30  ;;  %vm2887_vm4 = vcmp.gt.f32.partialorder %v8844_v6, 0.0 }
 0x82f   : > { %2907 = vperm.xlu1 %4082, %v2889_v58   ;;  %v8835_v58 = vld [vmem:[#allocation52_spill] sm:$0xff] }
 0x831   : > { %v7380_v25 = vpop.xlane.xlu2 %2802 }
 0x832   : > { %2917 = vperm.xlu0 %4083, %v2891_v55   ;;  %8823 = vst [vmem:[#allocation8_spill] sm:$0xff] %v7380_v25  ;;  %v2892_v3 = vsel %vm8463_vm2, %v7380_v25, -1e+30  ;;  %v3031_v55 = vmul.f32 0.8, %v8835_v58  ;;  %v4423_v25 = vld [vmem:[%s8293_s3 + $0x128] sm:$0xff] }
 0x837   : > { %2922 = vperm.xlu1 %4082, %v2892_v3   ;;  %v8836_v3 = vld [vmem:[#allocation54_spill] sm:$0xff] }
 0x838   : > { %vm2882_vm7 = vcmp.gt.f32.partialorder %v8836_v3, 0.0 }
 0x839   : > { %v7387_v54 = vpop.xlane.xlu0 %2805 }
 0x83a   : > { %8826 = vst [vmem:[#allocation21_spill] sm:$0xff] %v7387_v54  ;;  %v2893_v15 = vsel %vm8482_vm1, %v7387_v54, -1e+30 }
 0x83b   : > { %2927 = vperm.xlu0 %4083, %v2893_v15  }
 0x841   : > { %v7393_v42 = vpop.xlane.xlu1 %2808 }
 0x842   : > { %8828 = vst [vmem:[#allocation7_spill] sm:$0xff] %v7393_v42  ;;  %v2894_v14 = vsel %vm8464_vm3, %v7393_v42, -1e+30 }
 0x843   : > { %2932 = vperm.xlu2 %4081, %v2894_v14   ;;  %v7420_v14 = vadd.f32 -0.0001, %v3031_v55 }
 0x849   : > { %v7398_v10 = vpop.xlane.xlu2 %2811 }
 0x84a   : > { %8829 = vst [vmem:[#allocation6_spill] sm:$0xff] %v7398_v10  ;;  %v2895_v20 = vsel %vm8484_vm0, %v7398_v10, -1e+30  ;;  %v4433_v10 = vld [vmem:[%s8293_s3 + $0x178] sm:$0xff] }
 0x84b   : > { %2937 = vperm.xlu1 %4082, %v2895_v20  }
 0x851   : > { %v7405_v27 = vpop.xlane.xlu0 %2814 }
 0x852   : > { %8832 = vst [vmem:[#allocation5_spill] sm:$0xff] %v7405_v27  ;;  %v2896_v18 = vsel %vm8483_vm9, %v7405_v27, -1e+30 }
 0x853   : > { %2942 = vperm.xlu0 %4083, %v2896_v18   ;;  %v8455_v18 = vceil.f32 %v7420_v14 }
 0x855   : > { %v3351_v58 = vmax.f32 %v8455_v18, 1.0 }
 0x857   : > { %4312 = vrcp.f32 %v3351_v58  ;;  %vm3498_vm5 = vweird.f32 %v3351_v58  ;;  %v3504_v18 = vand.u32 2147483648, %v3351_v58  ;;  %v3502_v24 = vand.u32 2147483647, %v3351_v58 }
 0x859   : > { %v7411_v35 = vpop.xlane.xlu1 %2817  ;;  %vm3503_vm11 = vcmp.eq.f32.partialorder %v3502_v24, 8.507059e+37 }
 0x85a   : > { %8834 = vst [vmem:[#allocation45_spill] sm:$0xff] %v7411_v35  ;;  %v2897_v32 = vsel %vm2881_vm14, %v7411_v35, -1e+30 }
 0x85b   : > { %2947 = vperm.xlu2 %4081, %v2897_v32  }
 0x85d   : > { %v4313_v19 = vpop.eup %4312 }
 0x85e   : > { %v3494_v33 = vmul.f32 %v4313_v19, %v3351_v58  ;;  %vm3499_vm6 = vweird.f32 %v4313_v19 }
 0x85f   : > { %vm3500_vm8 = vmor %vm3498_vm5, %vm3499_vm6 }
 0x860   : > { %v3495_v48 = vsub.f32 1.0, %v3494_v33  ;;  %v3505_v33 = vor.u32 1.1754944e-38, %v3504_v18 }
 0x861   : > { %v7418_v15 = vpop.xlane.xlu2 %2820 }
 0x862   : > { %8837 = vst [vmem:[#allocation62_spill] sm:$0xff] %v7418_v15  ;;  %v2898_v20 = vsel %vm2882_vm7, %v7418_v15, -1e+30  ;;  %v3496_v51 = vmul.f32 %v4313_v19, %v3495_v48 }
 0x863   : > { %2952 = vperm.xlu1 %4082, %v2898_v20   ;;  %v8456_v20 = vceil.f32 %v7432_v9 }
 0x865   : > { %v3352_v36 = vmax.f32 %v8456_v20, 1.0  ;;  %v3497_v20 = vadd.f32 %v4313_v19, %v3496_v51 }
 0x867   : > { %4314 = vrcp.f32 %v3352_v36  ;;  %vm3513_vm2 = vweird.f32 %v3352_v36 }
 0x869   : > { %v7428_v32 = vpop.xlane.xlu0 %2823 }
 0x86a   : > { %v2899_v55 = vsel %vm2883_vm10, %v7428_v32, -1e+30 }
 0x86b   : > { %2957 = vperm.xlu0 %4083, %v2899_v55  }
 0x86d   : > { %v4315_v57 = vpop.eup %4314 }
 0x86e   : > { %v3509_v16 = vmul.f32 %v4315_v57, %v3352_v36  ;;  %vm3514_vm3 = vweird.f32 %v4315_v57 }
 0x86f   : > { %vm3515_vm5 = vmor %vm3513_vm2, %vm3514_vm3 }
 0x870   : > { %v3510_v1 = vsub.f32 1.0, %v3509_v16  ;;  %v3517_v16 = vand.u32 2147483647, %v3352_v36 }
 0x871   : > { %v7439_v0 = vpop.xlane.xlu1 %2826 }
 0x872   : > { %8841 = vst [vmem:[#allocation37_spill] sm:$0xff] %v7439_v0  ;;  %v2900_v12 = vsel %vm2884_vm12, %v7439_v0, -1e+30  ;;  %v3511_v48 = vmul.f32 %v4315_v57, %v3510_v1  ;;  %v8845_v1 = vld [vmem:[#allocation43_spill] sm:$0xff]  ;;  %v8874_v0 = vld [vmem:[#allocation69_spill] sm:$0xff] }
 0x873   : > { %2962 = vperm.xlu2 %4081, %v2900_v12   ;;  %vm2888_vm6 = vcmp.gt.f32.partialorder %v8845_v1, 0.0 }
 0x874   : > { %v3512_v51 = vadd.f32 %v4315_v57, %v3511_v48 }
 0x876   : > { %v3516_v24 = vsel %vm3515_vm5, %v4315_v57, %v3512_v51  ;;  %v4418_v57 = vld [vmem:[%s8293_s3 + $0x100] sm:$0xff] }
 0x879   : > { %v7447_v55 = vpop.xlane.xlu2 %2829 }
 0x87a   : > { %v2901_v53 = vsel %vm2885_vm15, %v7447_v55, -1e+30 }
 0x87b   : > { %2967 = vperm.xlu1 %4082, %v2901_v53   ;;  %v3501_v53 = vsel %vm3500_vm8, %v4313_v19, %v3497_v20  ;;  %vm3518_vm8 = vcmp.eq.f32.partialorder %v3517_v16, 8.507059e+37  ;;  %v4420_v16 = vld [vmem:[%s8293_s3 + $0x110] sm:$0xff] }
 0x87c   : > { %v3506_v17 = vsel %vm3503_vm11, %v3505_v33, %v3501_v53  ;;  %v4419_v53 = vld [vmem:[%s8293_s3 + $0x108] sm:$0xff] }
 0x881   : > { %v7453_v21 = vpop.xlane.xlu0 %2832 }
 0x882   : > { %v2902_v12 = vsel %vm2886_vm13, %v7453_v21, -1e+30 }
 0x883   : > { %2972 = vperm.xlu0 %4083, %v2902_v12   ;;  %v3519_v12 = vand.u32 2147483648, %v3352_v36  ;;  %v7474_v36 = vpop.permute.xlu2 %2912 }
 0x884   : > { %v2986_v48 = vmul.f32 %v4419_v53, %v7474_v36  ;;  %v4422_v53 = vld [vmem:[%s8293_s3 + $0x120] sm:$0xff] }
 0x885   : > { %v3520_v19 = vor.u32 1.1754944e-38, %v3519_v12 }
 0x887   : > { %v3521_v20 = vsel %vm3518_vm8, %v3520_v19, %v3516_v24 }
 0x889   : > { %v7459_v45 = vpop.xlane.xlu1 %2835 }
 0x88a   : > { %v2903_v4 = vsel %vm2887_vm4, %v7459_v45, -1e+30 }
 0x88b   : > { %2977 = vperm.xlu2 %4081, %v2903_v4   ;;  %3645 = vperm.xlu0 %4083, %v3506_v17  }
 0x891   : > { %v7465_v18 = vpop.xlane.xlu0 %2838 }
 0x892   : > { %v2904_v58 = vsel %vm2888_vm6, %v7465_v18, -1e+30 }
 0x893   : > { %3650 = vperm.xlu2 %4081, %v3521_v20   ;;  %2982 = vperm.xlu1 %4082, %v2904_v58   ;;  %v4421_v58 = vld [vmem:[%s8293_s3 + $0x118] sm:$0xff] }
 0x89d   : > { %v7500_v11 = vpop.permute.xlu2 %2932 }
 0x8a1   : > { %v7470_v33 = vpop.permute.xlu1 %2907 }
 0x8a2   : > { %v2985_v17 = vmul.f32 %v4418_v57, %v7470_v33 }
 0x8a4   : > { %v7472_v4 = vpop.permute.xlu0 %2917  ;;  %v3001_v51 = vadd.f32 %v2986_v48, %v2985_v17 }
 0x8a5   : > { %v2987_v19 = vmul.f32 %v4420_v16, %v7472_v4 }
 0x8a7   : > { %v3002_v57 = vadd.f32 %v3001_v51, %v2987_v19  ;;  %v2990_v51 = vmul.f32 %v4423_v25, %v7500_v11  ;;  %v4424_v19 = vld [vmem:[%s8293_s3 + $0x130] sm:$0xff] }
 0x8a9   : > { %v7484_v12 = vpop.permute.xlu1 %2922 }
 0x8aa   : > { %v2988_v20 = vmul.f32 %v4421_v58, %v7484_v12 }
 0x8ac   : > { %v3003_v48 = vadd.f32 %v3002_v57, %v2988_v20  ;;  %v4425_v57 = vld [vmem:[%s8293_s3 + $0x138] sm:$0xff] }
 0x8ad   : > { %v7490_v24 = vpop.permute.xlu0 %2927 }
 0x8ae   : > { %v2989_v17 = vmul.f32 %v4422_v53, %v7490_v24 }
 0x8b0   : > { %v3004_v16 = vadd.f32 %v3003_v48, %v2989_v17 }
 0x8b2   : > { %v3005_v20 = vadd.f32 %v3004_v16, %v2990_v51  ;;  %v4427_v51 = vld [vmem:[%s8293_s3 + $0x148] sm:$0xff] }
 0x8b5   : > { %v7518_v48 = vpop.permute.xlu2 %2947 }
 0x8b6   : > { %v2993_v16 = vmul.f32 %v4426_v50, %v7518_v48  ;;  %v4429_v50 = vld [vmem:[%s8293_s3 + $0x158] sm:$0xff] }
 0x8bd   : > { %v7502_v8 = vpop.permute.xlu1 %2937 }
 0x8be   : > { %v2991_v58 = vmul.f32 %v4424_v19, %v7502_v8 }
 0x8c0   : > { %v3006_v17 = vadd.f32 %v3005_v20, %v2991_v58  ;;  %v4428_v20 = vld [vmem:[%s8293_s3 + $0x150] sm:$0xff] }
 0x8c5   : > { %v7504_v41 = vpop.permute.xlu0 %2942 }
 0x8c6   : > { %v2992_v53 = vmul.f32 %v4425_v57, %v7504_v41 }
 0x8c8   : > { %v3007_v13 = vadd.f32 %v3006_v17, %v2992_v53 }
 0x8ca   : > { %v3008_v58 = vadd.f32 %v3007_v13, %v2993_v16  ;;  %v4430_v13 = vld [vmem:[%s8293_s3 + $0x160] sm:$0xff] }
 0x8cd   : > { %v7536_v17 = vpop.permute.xlu2 %2962 }
 0x8ce   : > { %v2996_v34 = vmul.f32 %v4429_v50, %v7536_v17 }
 0x8d5   : > { %v7520_v63 = vpop.permute.xlu1 %2952 }
 0x8d6   : > { %v2994_v19 = vmul.f32 %v4427_v51, %v7520_v63 }
 0x8d8   : > { %v3009_v53 = vadd.f32 %v3008_v58, %v2994_v19  ;;  %v4431_v19 = vld [vmem:[%s8293_s3 + $0x168] sm:$0xff] }
 0x8dd   : > { %v7522_v25 = vpop.permute.xlu0 %2957 }
 0x8de   : > { %v2995_v57 = vmul.f32 %v4428_v20, %v7522_v25 }
 0x8e0   : > { %v3010_v54 = vadd.f32 %v3009_v53, %v2995_v57 }
 0x8e2   : > { %v3011_v51 = vadd.f32 %v3010_v54, %v2996_v34 }
 0x8e5   : > { %v2978_v57 = vpop.permute.xlu2 %2977 }
 0x8e6   : > { %v2999_v27 = vmul.f32 %v4432_v39, %v2978_v57  ;;  %v4434_v39 = vld [vmem:[%s8293_s3 + $0x78] sm:$0xff] }
 0x8ed   : > { %v2968_v42 = vpop.permute.xlu1 %2967 }
 0x8ee   : > { %v2997_v16 = vmul.f32 %v4430_v13, %v2968_v42 }
 0x8f0   : > { %v3012_v20 = vadd.f32 %v3011_v51, %v2997_v16 }
 0x8f5   : > { %v2973_v23 = vpop.permute.xlu0 %2972 }
 0x8f6   : > { %v2998_v58 = vmul.f32 %v4431_v19, %v2973_v23 }
 0x8f8   : > { %v3013_v53 = vadd.f32 %v3012_v20, %v2998_v58  ;;  %v4437_v20 = vld [vmem:[%s8293_s3 + $0x68] sm:$0xff] }
 0x8fa   : > { %v3014_v34 = vadd.f32 %v3013_v53, %v2999_v27 }
 0x905   : > { %v2983_v50 = vpop.permute.xlu1 %2982 }
 0x906   : > { %v3000_v13 = vmul.f32 %v4433_v10, %v2983_v50  ;;  %v4435_v10 = vld [vmem:[%s8293_s3 + $0xf8] sm:$0xff] }
 0x908   : > { %v3015_v54 = vadd.f32 %v3014_v34, %v3000_v13 }
 0x90a   : > { %v3016_v37 = vrot.slane %v3015_v54, 4 }
 0x90c   : > { %v3017_v49 = vadd.f32 %v3016_v37, %v3015_v54  ;;  %v4441_v54 = vld [vmem:[%s8293_s3 + $0xf0] sm:$0xff] }
 0x90e   : > { %v3018_v30 = vrot.slane %v3017_v49, 2 }
 0x910   : > { %v3019_v19 = vadd.f32 %v3018_v30, %v3017_v49  ;;  %v4436_v49 = vld [vmem:[%s8293_s3 + $0x60] sm:$0xff] }
 0x912   : > { %v3020_v16 = vrot.slane %v3019_v19, 1 }
 0x914   : > { %v7554_v51 = vadd.f32 %v3020_v16, %v3019_v19 }
 0x916   : > { %vm3085_vm11 = vcmp.gt.f32.partialorder %v7554_v51, %v2983_v50  ;;  %vm3117_vm2 = vcmp.eq.f32.partialorder %v7554_v51, %v2983_v50  ;;  %vm3082_vm3 = vcmp.gt.f32.partialorder %v7554_v51, %v2968_v42  ;;  %vm3083_vm5 = vcmp.gt.f32.partialorder %v7554_v51, %v2973_v23  ;;  %v4438_v50 = vld [vmem:[%s8293_s3 + $0x70] sm:$0xff] }
 0x917   : > { %v3101_v58 = vsel %vm3085_vm11, %v4434_v39, 0.0  ;;  %v3133_v27 = vsel %vm3117_vm2, %v4435_v10, 0.0  ;;  %vm3084_vm8 = vcmp.gt.f32.partialorder %v7554_v51, %v2978_v57  ;;  %vm3114_vm1 = vcmp.eq.f32.partialorder %v7554_v51, %v2968_v42  ;;  %v4442_v10 = vld [vmem:[%s8293_s3 + $0x48] sm:$0xff] }
 0x918   : > { %v3149_v37 = vadd.f32 %v3133_v27, %v3101_v58  ;;  %vm3115_vm9 = vcmp.eq.f32.partialorder %v7554_v51, %v2973_v23  ;;  %vm3116_vm0 = vcmp.eq.f32.partialorder %v7554_v51, %v2978_v57  ;;  %v3098_v30 = vsel %vm3082_vm3, %v4436_v49, 0.0  ;;  %v4439_v23 = vld [vmem:[%s8293_s3 + $0xe0] sm:$0xff]  ;;  %v4440_v57 = vld [vmem:[%s8293_s3 + $0xe8] sm:$0xff] }
 0x919   : > { %v3099_v53 = vsel %vm3083_vm5, %v4437_v20, 0.0  ;;  %v3100_v13 = vsel %vm3084_vm8, %v4438_v50, 0.0  ;;  %v3130_v42 = vsel %vm3114_vm1, %v4439_v23, 0.0  ;;  %v3131_v34 = vsel %vm3115_vm9, %v4440_v57, 0.0  ;;  %v4446_v20 = vld [vmem:[%s8293_s3 + $0x58] sm:$0xff] }
 0x91a   : > { %3180 = vadd.xlane.f32.xlu0 %v3149_v37  ;;  %v3132_v19 = vsel %vm3116_vm0, %v4441_v54, 0.0  ;;  %v3147_v16 = vadd.f32 %v3131_v34, %v3099_v53  ;;  %v3146_v39 = vadd.f32 %v3130_v42, %v3098_v30  ;;  %vm3079_vm11 = vcmp.gt.f32.partialorder %v7554_v51, %v7520_v63  ;;  %v4447_v50 = vld [vmem:[%s8293_s3 + $0xd8] sm:$0xff]  ;;  %v4448_v34 = vld [vmem:[%s8293_s3 + $0x30] sm:$0xff] }
 0x91b   : > { %v3148_v58 = vadd.f32 %v3132_v19, %v3100_v13  ;;  %vm3080_vm2 = vcmp.gt.f32.partialorder %v7554_v51, %v7522_v25  ;;  %vm3111_vm1 = vcmp.eq.f32.partialorder %v7554_v51, %v7520_v63  ;;  %vm3112_vm9 = vcmp.eq.f32.partialorder %v7554_v51, %v7522_v25  ;;  %v4443_v63 = vld [vmem:[%s8293_s3 + $0x50] sm:$0xff]  ;;  %v4444_v25 = vld [vmem:[%s8293_s3 + $0xc8] sm:$0xff] }
 0x91c   : > { %3176 = vadd.xlane.f32.xlu1 %v3147_v16  ;;  %vm3081_vm0 = vcmp.gt.f32.partialorder %v7554_v51, %v7536_v17  ;;  %vm3113_vm3 = vcmp.eq.f32.partialorder %v7554_v51, %v7536_v17  ;;  %v3095_v27 = vsel %vm3079_vm11, %v4442_v10, 0.0  ;;  %v3096_v37 = vsel %vm3080_vm2, %v4443_v63, 0.0  ;;  %v4445_v17 = vld [vmem:[%s8293_s3 + $0xd0] sm:$0xff] }
 0x91d   : > { %3178 = vadd.xlane.f32.xlu2 %v3148_v58  ;;  %v3127_v49 = vsel %vm3111_vm1, %v4444_v25, 0.0  ;;  %v3128_v30 = vsel %vm3112_vm9, %v4445_v17, 0.0  ;;  %v3097_v53 = vsel %vm3081_vm0, %v4446_v20, 0.0  ;;  %v3129_v13 = vsel %vm3113_vm3, %v4447_v50, 0.0  ;;  %v4452_v58 = vld [vmem:[%s8293_s3 + $0x40] sm:$0xff]  ;;  %v4454_v17 = vld [vmem:[%s8293_s3 + $0x18] sm:$0xff] }
 0x91e   : > { %v3144_v23 = vadd.f32 %v3128_v30, %v3096_v37  ;;  %v3143_v42 = vadd.f32 %v3127_v49, %v3095_v27  ;;  %vm3076_vm5 = vcmp.gt.f32.partialorder %v7554_v51, %v7502_v8  ;;  %v3145_v57 = vadd.f32 %v3129_v13, %v3097_v53  ;;  %v4453_v27 = vld [vmem:[%s8293_s3 + $0xc0] sm:$0xff]  ;;  %v4458_v13 = vld [vmem:[%s8293_s3 + $0x28] sm:$0xff] }
 0x91f   : > { %vm3077_vm8 = vcmp.gt.f32.partialorder %v7554_v51, %v7504_v41  ;;  %vm3108_vm11 = vcmp.eq.f32.partialorder %v7554_v51, %v7502_v8  ;;  %vm3109_vm2 = vcmp.eq.f32.partialorder %v7554_v51, %v7504_v41  ;;  %vm3078_vm1 = vcmp.gt.f32.partialorder %v7554_v51, %v7518_v48  ;;  %v4449_v8 = vld [vmem:[%s8293_s3 + $0x38] sm:$0xff]  ;;  %v4450_v41 = vld [vmem:[%s8293_s3 + $0xb0] sm:$0xff] }
 0x920   : > { %vm3110_vm9 = vcmp.eq.f32.partialorder %v7554_v51, %v7518_v48  ;;  %v3092_v54 = vsel %vm3076_vm5, %v4448_v34, 0.0  ;;  %v3093_v19 = vsel %vm3077_vm8, %v4449_v8, 0.0  ;;  %v3124_v16 = vsel %vm3108_vm11, %v4450_v41, 0.0  ;;  %v4451_v48 = vld [vmem:[%s8293_s3 + $0xb8] sm:$0xff] }
 0x921   : > { %v3094_v10 = vsel %vm3078_vm1, %v4452_v58, 0.0  ;;  %v3126_v63 = vsel %vm3110_vm9, %v4453_v27, 0.0  ;;  %v3140_v25 = vadd.f32 %v3124_v16, %v3092_v54  ;;  %vm3073_vm0 = vcmp.gt.f32.partialorder %v7554_v51, %v7484_v12 }
 0x922   : > { %3174 = vadd.xlane.f32.xlu0 %v3146_v39  ;;  %v3125_v39 = vsel %vm3109_vm2, %v4451_v48, 0.0  ;;  %v3142_v49 = vadd.f32 %v3126_v63, %v3094_v10  ;;  %vm3074_vm3 = vcmp.gt.f32.partialorder %v7554_v51, %v7490_v24  ;;  %vm3105_vm5 = vcmp.eq.f32.partialorder %v7554_v51, %v7484_v12  ;;  %v4455_v12 = vld [vmem:[%s8293_s3 + $0x20] sm:$0xff]  ;;  %v4465_v10 = vld [vmem:[%s8293_s3 + $0x90] sm:$0xff] }
 0x923   : > { %v3141_v37 = vadd.f32 %v3125_v39, %v3093_v19  ;;  %vm3106_vm8 = vcmp.eq.f32.partialorder %v7554_v51, %v7490_v24  ;;  %vm3075_vm11 = vcmp.gt.f32.partialorder %v7554_v51, %v7500_v11  ;;  %vm3107_vm2 = vcmp.eq.f32.partialorder %v7554_v51, %v7500_v11  ;;  %v4456_v24 = vld [vmem:[%s8293_s3 + $0x98] sm:$0xff]  ;;  %v4457_v11 = vld [vmem:[%s8293_s3 + $0xa0] sm:$0xff]  ;;  %v4464_v39 = vld [vmem:[%s8293_s3 + $0x10] sm:$0xff] }
 0x924   : > { %3170 = vadd.xlane.f32.xlu1 %v3144_v23  ;;  %v3089_v30 = vsel %vm3073_vm0, %v4454_v17, 0.0  ;;  %v3090_v20 = vsel %vm3074_vm3, %v4455_v12, 0.0  ;;  %v3121_v53 = vsel %vm3105_vm5, %v4456_v24, 0.0  ;;  %v3122_v50 = vsel %vm3106_vm8, %v4457_v11, 0.0  ;;  %v4460_v19 = vld [vmem:[%s8293_s3] sm:$0xff] }
 0x925   : > { %3172 = vadd.xlane.f32.xlu2 %v3145_v57  ;;  %v3091_v23 = vsel %vm3075_vm11, %v4458_v13, 0.0  ;;  %v3138_v34 = vadd.f32 %v3122_v50, %v3090_v20  ;;  %v3137_v54 = vadd.f32 %v3121_v53, %v3089_v30  ;;  %vm3070_vm1 = vcmp.gt.f32.partialorder %v7554_v51, %v7470_v33  ;;  %v8847_v30 = vld [vmem:[#allocation51_spill] sm:$0xff]  ;;  %v8848_v53 = vld [vmem:[#allocation53_spill] sm:$0xff] }
 0x926   : > { %vm3071_vm9 = vcmp.gt.f32.partialorder %v7554_v51, %v7474_v36  ;;  %vm3102_vm0 = vcmp.eq.f32.partialorder %v7554_v51, %v7470_v33  ;;  %vm3103_vm3 = vcmp.eq.f32.partialorder %v7554_v51, %v7474_v36  ;;  %vm3072_vm5 = vcmp.gt.f32.partialorder %v7554_v51, %v7472_v4  ;;  %v4461_v33 = vld [vmem:[%s8293_s3 + $0x8] sm:$0xff]  ;;  %v4462_v36 = vld [vmem:[%s8293_s3 + $0x80] sm:$0xff] }
 0x927   : > { %vm3104_vm8 = vcmp.eq.f32.partialorder %v7554_v51, %v7472_v4  ;;  %v3086_v41 = vsel %vm3070_vm1, %v4460_v19, 0.0  ;;  %v3087_v16 = vsel %vm3071_vm9, %v4461_v33, 0.0  ;;  %v3118_v48 = vsel %vm3102_vm0, %v4462_v36, 0.0  ;;  %v4463_v4 = vld [vmem:[%s8293_s3 + $0x88] sm:$0xff]  ;;  %v7737_v33 = vpop.permute.xlu0 %3645 }
 0x928   : > { %v3119_v51 = vsel %vm3103_vm3, %v4463_v4, 0.0  ;;  %v3088_v58 = vsel %vm3072_vm5, %v4464_v39, 0.0  ;;  %v3120_v27 = vsel %vm3104_vm8, %v4465_v10, 0.0  ;;  %v3030_v12 = vmul.f32 0.8, %v8847_v30  ;;  %8850 = vst [vmem:[#allocation24_spill] sm:$0xff] %v7737_v33  ;;  %v7761_v30 = vpop.permute.xlu2 %3650 }
 0x929   : > { %v3135_v63 = vadd.f32 %v3119_v51, %v3087_v16  ;;  %v3029_v11 = vmul.f32 0.8, %v8848_v53  ;;  %v8851_v16 = vld [vmem:[#allocation58_spill] sm:$0xff]  ;;  %8853 = vst [vmem:[#allocation38_spill] sm:$0xff] %v7761_v30  ;;  %v8854_v53 = vld [vmem:[#allocation29_spill] sm:$0xff]  ;;  %v8860_v30 = vld [vmem:[#allocation68_spill] sm:$0xff] }
 0x92a   : > { %3168 = vadd.xlane.f32.xlu0 %v3143_v42  ;;  %v4459_v42 = vld [vmem:[%s8293_s3 + $0xa8] sm:$0xff]  ;;  %v7712_v24 = vadd.f32 -0.0001, %v3030_v12  ;;  %v3026_v36 = vmul.f32 0.8, %v8851_v16  ;;  %v8852_v4 = vld [vmem:[#allocation42_spill] sm:$0xff]  ;;  %v8861_v29 = vceil.f32 %v8860_v30 }
 0x92b   : > { %v3123_v57 = vsel %vm3107_vm2, %v4459_v42, 0.0  ;;  %v3025_v51 = vmul.f32 0.8, %v8852_v4 }
 0x92c   : > { %3164 = vadd.xlane.f32.xlu1 %v3141_v37  ;;  %v3139_v8 = vadd.f32 %v3123_v57, %v3091_v23  ;;  %v3134_v37 = vadd.f32 %v3118_v48, %v3086_v41  ;;  %v8488_v13 = vceil.f32 %v7712_v24  ;;  %v7717_v23 = vadd.f32 -0.0001, %v3029_v11  ;;  %v8849_v57 = vld [vmem:[#allocation56_spill] sm:$0xff] }
 0x92d   : > { %3166 = vadd.xlane.f32.xlu2 %v3142_v49  ;;  %v8846_v49 = vld [vmem:[#allocation57_spill] sm:$0xff]  ;;  %v7747_v10 = vadd.f32 -0.0001, %v3026_v36  ;;  %v3024_v11 = vmul.f32 0.8, %v8854_v53  ;;  %v8856_v36 = vld [vmem:[#allocation67_spill] sm:$0xff] }
 0x92e   : > { %v3028_v17 = vmul.f32 0.8, %v8846_v49  ;;  %v8857_v4 = vceil.f32 %v8856_v36 }
 0x92f   : > { %v8489_v12 = vceil.f32 %v7747_v10 }
 0x930   : > { %v7710_v20 = vadd.f32 -0.0001, %v3028_v17 }
 0x932   : > { %3162 = vadd.xlane.f32.xlu0 %v3140_v25  ;;  %v3136_v25 = vadd.f32 %v3120_v27, %v3088_v58  ;;  %v8487_v50 = vceil.f32 %v7710_v20 }
 0x934   : > { %3158 = vadd.xlane.f32.xlu1 %v3138_v34  ;;  %v7721_v42 = vmax.f32 %v8487_v50, 1.0  ;;  %v3027_v34 = vmul.f32 0.8, %v8849_v57  ;;  %v8855_v57 = vld [vmem:[#allocation61_spill] sm:$0xff]  ;;  %v7774_v50 = vmax.f32 %v8489_v12, 1.0 }
 0x935   : > { %3160 = vadd.xlane.f32.xlu2 %v3139_v8  ;;  %v8486_v8 = vceil.f32 %v7717_v23 }
 0x936   : > { %4316 = vrcp.f32 %v7721_v42  ;;  %v7730_v19 = vadd.f32 -0.0001, %v3027_v34  ;;  %v3023_v34 = vmul.f32 0.8, %v8855_v57  ;;  %v8883_v3 = vand.u32 2147483648, %v7721_v42 }
 0x937   : > { %v7735_v41 = vmax.f32 %v8486_v8, 1.0 }
 0x938   : > { %v8485_v48 = vceil.f32 %v7730_v19  ;;  %v7784_v57 = vadd.f32 -0.0001, %v3023_v34  ;;  %v8862_v34 = vld [vmem:[#allocation39_spill] sm:$0xff] }
 0x939   : > { %v8863_v15 = vceil.f32 %v8862_v34  ;;  %vm3468_vm9 = vweird.f32 %v7735_v41  ;;  %v3472_v2 = vand.u32 2147483647, %v7735_v41 }
 0x93a   : > { %3156 = vadd.xlane.f32.xlu0 %v3137_v54  ;;  %v7726_v54 = vmax.f32 %v8488_v13, 1.0  ;;  %v7751_v27 = vmax.f32 %v8485_v48, 1.0  ;;  %v7776_v13 = vadd.f32 -0.0001, %v3024_v11 }
 0x93c   : > { %3152 = vadd.xlane.f32.xlu1 %v3135_v63  ;;  %4318 = vrcp.f32 %v7726_v54  ;;  %v7743_v39 = vpop.eup %4316  ;;  %v7753_v63 = vadd.f32 -0.0001, %v3025_v51  ;;  %vm3483_vm5 = vweird.f32 %v7726_v54  ;;  %v3489_v30 = vand.u32 2147483648, %v7726_v54 }
 0x93d   : > { %3154 = vadd.xlane.f32.xlu2 %v3136_v25  ;;  %4320 = vrcp.f32 %v7735_v41  ;;  %v3449_v49 = vmul.f32 %v7743_v39, %v7721_v42 }
 0x93e   : > { %4322 = vrcp.f32 %v7751_v27  ;;  %v8491_v16 = vceil.f32 %v7753_v63 }
 0x93f   : > { %v3450_v48 = vsub.f32 1.0, %v3449_v49  ;;  %4324 = vrcp.f32 %v7774_v50 }
 0x941   : > { %v3451_v11 = vmul.f32 %v7743_v39, %v3450_v48  ;;  %v8866_v48 = vmov 0.0  }
 0x942   : > { %3150 = vadd.xlane.f32.xlu0 %v3134_v37  ;;  %v7745_v58 = vpop.eup %4318 }
 0x943   : > { %v3479_v25 = vmul.f32 %v7745_v58, %v7726_v54  ;;  %v7759_v17 = vpop.eup %4320  ;;  %v7847_v1 = vadd.f32 %v7743_v39, %v3451_v11  ;;  %v3490_v11 = vor.u32 1.1754944e-38, %v3489_v30 }
 0x944   : > { %v3464_v8 = vmul.f32 %v7759_v17, %v7735_v41 }
 0x945   : > { %v3480_v51 = vsub.f32 1.0, %v3479_v25  ;;  %v7790_v25 = vpop.eup %4322 }
 0x946   : > { %v3465_v12 = vsub.f32 1.0, %v3464_v8 }
 0x948   : > { %v3466_v6 = vmul.f32 %v7759_v17, %v3465_v12 }
 0x98d   : > { %v3181_v37 = vpop.xlane.xlu0 %3180 }
 0x98e   : > { %vm3197_vm11 = vcmp.lt.f32.partialorder %v3181_v37, %v8857_v4  ;;  %v7788_v37 = vmax.f32 %v8491_v16, 1.0  ;;  %v3481_v4 = vmul.f32 %v7745_v58, %v3480_v51  ;;  %v8864_v16 = vld [vmem:[#allocation41_spill] sm:$0xff] }
 0x98f   : > { %vm7780_vm2 = vmand %vm3197_vm11, %vm2888_vm6  ;;  %v3177_v49 = vpop.xlane.xlu1 %3176  ;;  %v8865_v35 = vceil.f32 %v8864_v16  ;;  %vm3484_vm11 = vweird.f32 %v7745_v58 }
 0x990   : > { %v3179_v33 = vpop.xlane.xlu2 %3178  ;;  %vm3195_vm6 = vcmp.lt.f32.partialorder %v3177_v49, %v8861_v29  ;;  %v3229_v8 = vsel %vm7780_vm2, 1.0, %v8866_v48  ;;  %v8493_v29 = vceil.f32 %v7776_v13  ;;  %4326 = vrcp.f32 %v7788_v37 }
 0x991   : > { %vm3196_vm0 = vcmp.lt.f32.partialorder %v3179_v33, %v8865_v35  ;;  %vm3211_vm3 = vmand %vm3195_vm6, %vm2886_vm13  ;;  %v8496_v35 = vceil.f32 %v7784_v57  ;;  %v3482_v33 = vadd.f32 %v7745_v58, %v3481_v4  ;;  %v3487_v49 = vand.u32 2147483647, %v7726_v54  ;;  %v7838_v4 = vpop.eup %4324 }
 0x992   : > { %vm3212_vm8 = vmand %vm3196_vm0, %vm2887_vm4  ;;  %v3227_v16 = vsel %vm3211_vm3, 1.0, %v8866_v48  ;;  %v7836_v12 = vmax.f32 %v8493_v29, 1.0  ;;  %vm3453_vm2 = vweird.f32 %v7721_v42  ;;  %vm3454_vm6 = vweird.f32 %v7743_v39 }
 0x993   : > { %v3228_v56 = vsel %vm3212_vm8, 1.0, %v8866_v48  ;;  %vm7828_vm4 = vmor %vm3483_vm5, %vm3484_vm11  ;;  %v3457_v29 = vand.u32 2147483647, %v7721_v42  ;;  %vm7859_vm0 = vcmp.eq.f32.partialorder %v3487_v49, 8.507059e+37  ;;  %vm7875_vm11 = vcmp.eq.f32.partialorder %v3472_v2, 8.507059e+37 }
 0x994   : > { %v4124_v51 = vpack.i.bf16 %v3228_v56, %v3229_v8  ;;  %v3474_v8 = vand.u32 2147483648, %v7735_v41  ;;  %v7844_v56 = vmax.f32 %v8496_v35, 1.0  ;;  %4328 = vrcp.f32 %v7836_v12 }
 0x995   : > { %v3175_v36 = vpop.xlane.xlu0 %3174 }
 0x996   : > { %vm3194_vm1 = vcmp.lt.f32.partialorder %v3175_v36, %v8863_v15  ;;  %v3434_v15 = vmul.f32 %v7790_v25, %v7751_v27  ;;  %4125 = vperm.xlu2 %4081, %v4124_v51   ;;  %v3467_v51 = vadd.f32 %v7759_v17, %v3466_v6  ;;  %v7852_v7 = vpop.eup %4326  ;;  %v3475_v30 = vor.u32 1.1754944e-38, %v3474_v8 }
 0x997   : > { %vm3210_vm13 = vmand %vm3194_vm1, %vm2885_vm15  ;;  %vm3469_vm15 = vweird.f32 %v7759_v17  ;;  %4330 = vrcp.f32 %v7844_v56  ;;  %v3404_v40 = vmul.f32 %v7852_v7, %v7788_v37 }
 0x998   : > { %v3226_v53 = vsel %vm3210_vm13, 1.0, %v8866_v48  ;;  %v3435_v54 = vsub.f32 1.0, %v3434_v15  ;;  %v3173_v22 = vpop.xlane.xlu2 %3172  ;;  %v8869_v15 = vceil.f32 %v7432_v9  ;;  %vm7867_vm3 = vmor %vm3468_vm9, %vm3469_vm15  ;;  %v8875_v9 = vceil.f32 %v8874_v0 }
 0x999   : > { %v4129_v36 = vpack.i.bf16 %v3226_v53, %v3227_v16  ;;  %v3171_v16 = vpop.xlane.xlu1 %3170  ;;  %v8878_v0 = vceil.f32 %v7420_v14  ;;  %v3471_v49 = vsel %vm7867_vm3, %v7759_v17, %v3467_v51  ;;  %vm3438_vm13 = vweird.f32 %v7751_v27 }
 0x99a   : > { %vm3192_vm1 = vcmp.lt.f32.partialorder %v3171_v16, %v8869_v15  ;;  %vm3193_vm5 = vcmp.lt.f32.partialorder %v3173_v22, %v8875_v9  ;;  %v3436_v22 = vmul.f32 %v7790_v25, %v3435_v54  ;;  %v3442_v14 = vand.u32 2147483647, %v7751_v27  ;;  %v7918_v15 = vpop.eup %4328 }
 0x99b   : > { %4130 = vperm.xlu0 %4083, %v4129_v36   ;;  %v3486_v36 = vsel %vm7828_vm4, %v7745_v58, %v3482_v33  ;;  %vm3208_vm8 = vmand %vm3192_vm1, %vm2883_vm10  ;;  %v3419_v33 = vmul.f32 %v7838_v4, %v7774_v50  ;;  %vm3439_vm4 = vweird.f32 %v7790_v25  ;;  %v3476_v16 = vsel %vm7875_vm11, %v3475_v30, %v3471_v49 }
 0x99c   : > { %vm3209_vm9 = vmand %vm3193_vm5, %vm2884_vm12  ;;  %v3224_v41 = vsel %vm3208_vm8, 1.0, %v8866_v48  ;;  %v3491_v17 = vsel %vm7859_vm0, %v3490_v11, %v3486_v36  ;;  %v3444_v51 = vand.u32 2147483648, %v7751_v27  ;;  %v3460_v11 = vor.u32 1.1754944e-38, %v8883_v3 }
 0x99d   : > { %v3169_v53 = vpop.xlane.xlu0 %3168  ;;  %v3225_v46 = vsel %vm3209_vm9, 1.0, %v8866_v48  ;;  %vm7899_vm12 = vmor %vm3453_vm2, %vm3454_vm6  ;;  %v3420_v8 = vsub.f32 1.0, %v3419_v33  ;;  %v3405_v58 = vsub.f32 1.0, %v3404_v40  ;;  %v7934_v33 = vpop.eup %4330  ;;  %vm7936_vm2 = vcmp.eq.f32.partialorder %v3457_v29, 8.507059e+37 }
 0x99e   : > { %vm3191_vm10 = vcmp.lt.f32.partialorder %v3169_v53, %v8878_v0  ;;  %v4134_v34 = vpack.i.bf16 %v3224_v41, %v3225_v46  ;;  %3640 = vperm.xlu2 %4081, %v3491_v17   ;;  %v3437_v53 = vadd.f32 %v7790_v25, %v3436_v22  ;;  %v3456_v36 = vsel %vm7899_vm12, %v7743_v39, %v7847_v1  ;;  %v8890_v39 = vld [vmem:[#allocation25_spill] sm:$0xff] }
 0x99f   : > { %vm7910_vm15 = vmand %vm3191_vm10, %vm2882_vm7  ;;  %vm3423_vm6 = vweird.f32 %v7774_v50  ;;  %vm7941_vm1 = vcmp.eq.f32.partialorder %v3442_v14, 8.507059e+37  ;;  %v3022_v27 = vmul.f32 0.8, %v8890_v39  ;;  %v8891_v1 = vceil.f32 %v7712_v24 }
 0x9a0   : > { %4135 = vperm.xlu1 %4082, %v4134_v34   ;;  %vm7930_vm7 = vmor %vm3438_vm13, %vm3439_vm4  ;;  %v3167_v41 = vpop.xlane.xlu2 %3166  ;;  %v3223_v22 = vsel %vm7910_vm15, 1.0, %v8866_v48  ;;  %v8892_v29 = vceil.f32 %v7710_v20  ;;  %v3421_v46 = vmul.f32 %v7838_v4, %v3420_v8  ;;  %vm3424_vm8 = vweird.f32 %v7838_v4 }
 0x9a1   : > { %v3165_v35 = vpop.xlane.xlu1 %3164  ;;  %vm3190_vm0 = vcmp.lt.f32.partialorder %v3167_v41, %v8891_v1  ;;  %v3441_v0 = vsel %vm7930_vm7, %v7790_v25, %v3437_v53  ;;  %v3445_v24 = vor.u32 1.1754944e-38, %v3444_v51  ;;  %v3389_v49 = vmul.f32 %v7918_v15, %v7836_v12  ;;  %vm7977_vm10 = vmor %vm3423_vm6, %vm3424_vm8 }
 0x9a2   : > { %vm3206_vm5 = vmand %vm3190_vm0, %vm2881_vm14  ;;  %v8893_v20 = vceil.f32 %v7717_v23  ;;  %v3406_v34 = vmul.f32 %v7852_v7, %v3405_v58  ;;  %v3374_v38 = vmul.f32 %v7934_v33, %v7844_v56  ;;  %v3461_v14 = vsel %vm7936_vm2, %v3460_v11, %v3456_v36 }
 0x9a3   : > { %3635 = vperm.xlu0 %4083, %v3476_v16   ;;  %v3222_v40 = vsel %vm3206_vm5, 1.0, %v8866_v48  ;;  %vm8894_vm14 = vcmp.gt.f32.partialorder %v8830_v5, 0.0  ;;  %v3427_v25 = vand.u32 2147483647, %v7774_v50  ;;  %v3429_v17 = vand.u32 2147483648, %v7774_v50 }
 0x9a4   : > { %vm3189_vm11 = vcmp.lt.f32.partialorder %v3165_v35, %v8893_v20  ;;  %v4139_v2 = vpack.i.bf16 %v3222_v40, %v3223_v22  ;;  %v3422_v8 = vadd.f32 %v7838_v4, %v3421_v46  ;;  %vm3408_vm12 = vweird.f32 %v7788_v37 }
 0x9a5   : > { %v3163_v6 = vpop.xlane.xlu0 %3162  ;;  %vm3409_vm13 = vweird.f32 %v7852_v7  ;;  %v7983_v54 = vadd.f32 -0.0001, %v3022_v27  ;;  %vm8897_vm4 = vcmp.gt.f32.partialorder %v8831_v28, 0.0  ;;  %v3446_v50 = vsel %vm7941_vm1, %v3445_v24, %v3441_v0 }
 0x9a6   : > { %vm3188_vm3 = vcmp.lt.f32.partialorder %v3163_v6, %v8892_v29  ;;  %vm7987_vm15 = vmand %vm3189_vm11, %vm8897_vm4  ;;  %3630 = vperm.xlu2 %4081, %v3461_v14   ;;  %v3390_v16 = vsub.f32 1.0, %v3389_v49  ;;  %v3414_v53 = vand.u32 2147483648, %v7788_v37  ;;  %v3407_v36 = vadd.f32 %v7852_v7, %v3406_v34  ;;  %v8926_v34 = vld [vmem:[#allocation27_spill] sm:$0xff]  ;;  %v8930_v14 = vld [vmem:[#allocation45_spill] sm:$0xff] }
 0x9a7   : > { %vm3204_vm9 = vmand %vm3188_vm3, %vm8894_vm14  ;;  %v3412_v28 = vand.u32 2147483647, %v7788_v37  ;;  %v3375_v3 = vsub.f32 1.0, %v3374_v38  ;;  %vm7997_vm7 = vcmp.eq.f32.partialorder %v3427_v25, 8.507059e+37  ;;  %v3221_v58 = vsel %vm7987_vm15, 1.0, %v8866_v48 }
 0x9a8   : > { %4140 = vperm.xlu1 %4082, %v4139_v2   ;;  %v3220_v35 = vsel %vm3204_vm9, 1.0, %v8866_v48  ;;  %v3161_v11 = vpop.xlane.xlu2 %3160  ;;  %vm8005_vm2 = vmor %vm3408_vm12, %vm3409_vm13  ;;  %v3426_v41 = vsel %vm7977_vm10, %v7838_v4, %v3422_v8  ;;  %v3430_v30 = vor.u32 1.1754944e-38, %v3429_v17  ;;  %v3054_v42 = vceil.f32 %v7983_v54 }
 0x9a9   : > { %v3159_v51 = vpop.xlane.xlu1 %3158  ;;  %v8904_v39 = vceil.f32 %v7747_v10  ;;  %v4144_v27 = vpack.i.bf16 %v3220_v35, %v3221_v58  ;;  %v3391_v37 = vmul.f32 %v7918_v15, %v3390_v16  ;;  %v3415_v1 = vor.u32 1.1754944e-38, %v3414_v53 }
 0x9aa   : > { %v8905_v22 = vceil.f32 %v7730_v19  ;;  %v3411_v29 = vsel %vm8005_vm2, %v7852_v7, %v3407_v36  ;;  %vm8024_vm0 = vcmp.eq.f32.partialorder %v3412_v28, 8.507059e+37  ;;  %v3376_v4 = vmul.f32 %v7934_v33, %v3375_v3 }
 0x9ab   : > { %3625 = vperm.xlu0 %4083, %v3446_v50   ;;  %vm3186_vm6 = vcmp.lt.f32.partialorder %v3159_v51, %v8904_v39  ;;  %vm3393_vm3 = vweird.f32 %v7836_v12  ;;  %vm3394_vm5 = vweird.f32 %v7918_v15  ;;  %v3399_v10 = vand.u32 2147483648, %v7836_v12 }
 0x9ac   : > { %vm3187_vm1 = vcmp.lt.f32.partialorder %v3161_v11, %v8905_v22  ;;  %vm8908_vm8 = vcmp.gt.f32.partialorder %v8825_v52, 0.0  ;;  %v3431_v7 = vsel %vm7997_vm7, %v3430_v30, %v3426_v41  ;;  %v8040_v0 = vmax.f32 %v3054_v42, 1.0  ;;  %vm8055_vm13 = vmor %vm3393_vm3, %vm3394_vm5 }
 0x9ad   : > { %vm8034_vm11 = vmand %vm3186_vm6, %vm8908_vm8  ;;  %vm3378_vm14 = vweird.f32 %v7844_v56  ;;  %vm3379_vm9 = vweird.f32 %v7934_v33  ;;  %vm8911_vm10 = vcmp.gt.f32.partialorder %v8827_v62, 0.0  ;;  %v3157_v24 = vpop.xlane.xlu0 %3156  ;;  %v3392_v52 = vadd.f32 %v7918_v15, %v3391_v37 }
 0x9ae   : > { %vm3203_vm12 = vmand %vm3187_vm1, %vm8911_vm10  ;;  %3620 = vperm.xlu2 %4081, %v3431_v7   ;;  %v3397_v49 = vand.u32 2147483647, %v7836_v12  ;;  %v3416_v40 = vsel %vm8024_vm0, %v3415_v1, %v3411_v29  ;;  %v3384_v20 = vand.u32 2147483648, %v7844_v56  ;;  %v3377_v62 = vadd.f32 %v7934_v33, %v3376_v4 }
 0x9af   : > { %v3382_v38 = vand.u32 2147483647, %v7844_v56  ;;  %vm8063_vm4 = vmor %vm3378_vm14, %vm3379_vm9  ;;  %v3219_v25 = vsel %vm3203_vm12, 1.0, %v8866_v48  ;;  %v3218_v12 = vsel %vm8034_vm11, 1.0, %v8866_v48  ;;  %v3400_v17 = vor.u32 1.1754944e-38, %v3399_v10 }
 0x9b0   : > { %4145 = vperm.xlu1 %4082, %v4144_v27   ;;  %v3155_v2 = vpop.xlane.xlu2 %3154  ;;  %4332 = vrcp.f32 %v8040_v0  ;;  %v8916_v8 = vceil.f32 %v7753_v63  ;;  %v3396_v56 = vsel %vm8055_vm13, %v7918_v15, %v3392_v52  ;;  %vm3398_vm7 = vcmp.eq.f32.partialorder %v3397_v49, 8.507059e+37 }
 0x9b1   : > { %v3385_v23 = vor.u32 1.1754944e-38, %v3384_v20  ;;  %v8917_v54 = vceil.f32 %v7776_v13  ;;  %v3381_v5 = vsel %vm8063_vm4, %v7934_v33, %v3377_v62  ;;  %vm3383_vm6 = vcmp.eq.f32.partialorder %v3382_v38, 8.507059e+37  ;;  %v3153_v33 = vpop.xlane.xlu1 %3152  ;;  %v8928_v38 = vld [vmem:[#allocation14_spill] sm:$0xff] }
 0x9b2   : > { %vm3185_vm15 = vcmp.lt.f32.partialorder %v3157_v24, %v8916_v8  ;;  %v4149_v50 = vpack.i.bf16 %v3218_v12, %v3219_v25  ;;  %vm8918_vm1 = vcmp.gt.f32.partialorder %v8824_v26, 0.0  ;;  %v3401_v63 = vsel %vm3398_vm7, %v3400_v17, %v3396_v56 }
 0x9b3   : > { %3615 = vperm.xlu0 %4083, %v3416_v40   ;;  %vm3184_vm2 = vcmp.lt.f32.partialorder %v3155_v2, %v8917_v54  ;;  %vm3201_vm0 = vmand %vm3185_vm15, %vm8918_vm1  ;;  %vm8919_vm3 = vcmp.gt.f32.partialorder %v8822_v61, 0.0  ;;  %v3386_v15 = vsel %vm3383_vm6, %v3385_v23, %v3381_v5  ;;  %v8920_v36 = vceil.f32 %v7784_v57  ;;  %v8932_v54 = vld [vmem:[#allocation13_spill] sm:$0xff] }
 0x9b4   : > { %vm3200_vm5 = vmand %vm3184_vm2, %vm8919_vm3  ;;  %v3217_v51 = vsel %vm3201_vm0, 1.0, %v8866_v48  ;;  %vm8921_vm14 = vcmp.gt.f32.partialorder %v8820_v31, 0.0  ;;  %vm8922_vm10 = vcmp.gt.f32.partialorder %v8817_v59, 0.0  ;;  %vm3363_vm13 = vweird.f32 %v8040_v0 }
 0x9b5   : > { %v3151_v13 = vpop.xlane.xlu0 %3150  ;;  %v3216_v53 = vsel %vm3200_vm5, 1.0, %v8866_v48  ;;  %vm3183_vm11 = vcmp.lt.f32.partialorder %v3153_v33, %v8920_v36  ;;  %v3369_v57 = vand.u32 2147483648, %v8040_v0  ;;  %v3367_v31 = vand.u32 2147483647, %v8040_v0 }
 0x9b6   : > { %3610 = vperm.xlu2 %4081, %v3401_v63   ;;  %v4333_v16 = vpop.eup %4332  ;;  %vm3182_vm8 = vcmp.lt.f32.partialorder %v3151_v13, %v3054_v42  ;;  %v4154_v26 = vpack.i.bf16 %v3216_v53, %v3217_v51  ;;  %vm3199_vm12 = vmand %vm3183_vm11, %vm8922_vm10  ;;  %v8100_v30 = vstv %s4038_s19  ;;  %v8923_v29 = vmax.f32 %v7347_v44, 0.0  ;;  %v8925_v44 = vld [vmem:[#allocation37_spill] sm:$0xff]  ;;  %v8934_v53 = vld [vmem:[#allocation26_spill] sm:$0xff]  ;;  %s4481_s19 = sshra.s32 %s3815_s17, 4  ;;  %s4482_s19 = int_to_ptr.hbm [resolvable:$true] %s4481_s19 }
 0x9b7   : > { %v3359_v35 = vmul.f32 %v4333_v16, %v8040_v0  ;;  %vm3198_vm9 = vmand %vm3182_vm8, %vm8921_vm14  ;;  %v3215_v11 = vsel %vm3199_vm12, 1.0, %v8866_v48  ;;  %vm3364_vm4 = vweird.f32 %v4333_v16  ;;  %v3370_v58 = vor.u32 1.1754944e-38, %v3369_v57  ;;  %v8933_v63 = vld [vmem:[#allocation9_spill] sm:$0xff]  ;;  %s4483_s20 = scalar_lea.hbm %s4482_s19, 8  ;;  %p4488_p0 = scmp.lt.s32.totalorder %s4482_s19, %s8298_s8 }
 0x9b8   : > { %4150 = vperm.xlu1 %4082, %v4149_v50   ;;  %v3214_v28 = vsel %vm3198_vm9, 1.0, %v8866_v48  ;;  %vm3365_vm15 = vmor %vm3363_vm13, %vm3364_vm4  ;;  %vm3368_vm7 = vcmp.eq.f32.partialorder %v3367_v31, 8.507059e+37  ;;  %v2855_v48 = vmul.f32 %v8100_v30, %v7459_v45  ;;  %v2856_v42 = vmul.f32 %v8100_v30, %v7465_v18  ;;  %v8940_v31 = vld [vmem:[#allocation12_spill] sm:$0xff]  ;;  %p4484_p11 = scmp.ne.s32.totalorder %s4482_s19, %s4483_s20  ;;  %p4489_p1 = scmp.lt.s32.totalorder %s4487_s25, %s4483_s20 }
 0x9b9   : > { %v3360_v61 = vsub.f32 1.0, %v3359_v35  ;;  %v4159_v6 = vpack.i.bf16 %v3214_v28, %v3215_v11  ;;  %v8924_v4 = vmax.f32 %v7339_v60, 0.0  ;;  %v2853_v0 = vmul.f32 %v8100_v30, %v7447_v55  ;;  %v8936_v35 = vld [vmem:[#allocation15_spill] sm:$0xff] }
 0x9ba   : > { %4334 = vtanh.f32 %v2855_v48  ;;  %v2854_v24 = vmul.f32 %v8100_v30, %v7453_v21  ;;  %v2851_v60 = vmul.f32 %v8100_v30, %v7428_v32  ;;  %v2852_v52 = vmul.f32 %v8100_v30, %v8925_v44  ;;  %v8931_v32 = vld [vmem:[#allocation62_spill] sm:$0xff]  ;;  %v8948_v44 = vld [vmem:[#allocation24_spill] sm:$0xff]  ;;  %p4485_p12 = pnand %p4484_p11, %p4617_p5  ;;  %p4490_p2 = por %p4489_p1, %p4488_p0 }
 0x9bb   : > { %3605 = vperm.xlu0 %4083, %v3386_v15   ;;  %v3361_v3 = vmul.f32 %v4333_v16, %v3360_v61  ;;  %4336 = vtanh.f32 %v2856_v42  ;;  %v8927_v55 = vmax.f32 %v8926_v34, 0.0  ;;  %v8929_v21 = vmax.f32 %v8928_v38, 0.0  ;;  %v8938_v61 = vld [vmem:[#allocation6_spill] sm:$0xff] }
 0x9bc   : > { %4338 = vtanh.f32 %v2853_v0  ;;  %v2849_v25 = vmul.f32 %v8100_v30, %v8930_v14  ;;  %v2850_v12 = vmul.f32 %v8100_v30, %v8931_v32  ;;  %v8935_v51 = vmax.f32 %v8934_v53, 0.0  ;;  %v8947_v0 = vld [vmem:[#allocation7_spill] sm:$0xff]  ;;  %p4486_p13 = pneg %p4485_p12 }
 0x9bd   : > { %v3362_v9 = vadd.f32 %v4333_v16, %v3361_v3  ;;  %4340 = vtanh.f32 %v2854_v24  ;;  %v2847_v28 = vmul.f32 %v8100_v30, %v8938_v61  ;;  %v2846_v24 = vmul.f32 %v8100_v30, %v8947_v0  ;;  %v8953_v32 = vld [vmem:[#allocation23_spill] sm:$0xff] }
 0x9be   : > { %4342 = vtanh.f32 %v2851_v60  ;;  %vm8969_vm2 = vcmask 523264   ;;  %p4491_p3 = pnand %p4490_p2, %p4486_p13 }
 0x9bf   : > { %v3366_v41 = vsel %vm3365_vm15, %v4333_v16, %v3362_v9  ;;  %4344 = vtanh.f32 %v2852_v52  ;;  %vm8971_vm6 = vmmov %vm8969_vm2 }
 0x9c0   : > { %4155 = vperm.xlu1 %4082, %v4154_v26   ;;  %v3371_v59 = vsel %vm3368_vm7, %v3370_v58, %v3366_v41  ;;  %v4335_v39 = vpop.eup %4334  ;;  %4346 = vtanh.f32 %v2849_v25  ;;  %v8937_v26 = vmax.f32 %v8936_v35, 0.0  ;;  %vm8972_vm1 = vmmov %vm8969_vm2 }
 0x9c1   : > { %v4337_v27 = vpop.eup %4336  ;;  %v3244_v10 = vmul.f32 %v4335_v39, %v8924_v4  ;;  %4348 = vtanh.f32 %v2850_v12  ;;  %v2843_v12 = vmul.f32 %v8100_v30, %v8953_v32  ;;  %v4466_v32 = vld [vmem:[%s8294_s4] sm:$0xff] }
 0x9c2   : > { %v3245_v46 = vmul.f32 %v4337_v27, %v8923_v29  ;;  %v4339_v49 = vpop.eup %4338  ;;  %4350 = vtanh.f32 %v2847_v28 }
 0x9c3   : > { %v3242_v2 = vmul.f32 %v4339_v49, %v8929_v21  ;;  %v8951_v21 = vld [vmem:[#allocation18_spill] sm:$0xff] }
 0x9c8   : > { %4160 = vperm.xlu1 %4082, %v4159_v6   ;;  %v8939_v6 = vld [vmem:[#allocation5_spill] sm:$0xff] }
 0x9c9   : > { %v2848_v57 = vmul.f32 %v8100_v30, %v8939_v6 }
 0x9cb   : > { %4352 = vtanh.f32 %v2848_v57 }
 0x9d0   : > { %3600 = vperm.xlu1 %4082, %v3371_v59   ;;  %v8941_v59 = vld [vmem:[#allocation38_spill] sm:$0xff] }
 0x9f0   : > { %v4126_v37 = vpop.permute.xlu2 %4125 }
 0x9f1   : > { %v4128_v1 = vunpack.i.h.bf16 %v4126_v37  ;;  %v4127_v22 = vunpack.i.l.bf16 %v4126_v37 }
 0x9f3   : > { %v3341_v19 = vmul.f32 %v4127_v22, %v3245_v46  ;;  %v3340_v7 = vmul.f32 %v4128_v1, %v3244_v10  ;;  %v8942_v1 = vld [vmem:[#allocation16_spill] sm:$0xff]  ;;  %v8944_v46 = vld [vmem:[#allocation17_spill] sm:$0xff] }
 0x9f4   : > { %v8943_v22 = vmax.f32 %v8942_v1, 0.0  ;;  %v8945_v4 = vmax.f32 %v8944_v46, 0.0 }
 0x9f5   : > { %v3693_v45 = vmul.f32 %v7366_v47, %v3341_v19  ;;  %v3692_v18 = vmul.f32 %v7351_v43, %v3340_v7  ;;  %v4341_v47 = vpop.eup %4340  ;;  %v8946_v19 = vld [vmem:[#allocation21_spill] sm:$0xff] }
 0x9f6   : > { %v3243_v62 = vmul.f32 %v4341_v47, %v8927_v55  ;;  %v4343_v56 = vpop.eup %4342  ;;  %v2845_v7 = vmul.f32 %v8100_v30, %v8946_v19  ;;  %v8949_v55 = vld [vmem:[#allocation32_spill] sm:$0xff] }
 0x9f7   : > { %3694 = vmatpush.msrb.mxu2 %v3693_v45  ;;  %v4345_v23 = vpop.eup %4344  ;;  %v3240_v36 = vmul.f32 %v4343_v56, %v8937_v26  ;;  %v8954_v56 = vld [vmem:[#allocation8_spill] sm:$0xff]  ;;  %v8957_v26 = vld [vmem:[#allocation31_spill] sm:$0xff] }
 0x9f8   : > { %v3241_v33 = vmul.f32 %v4345_v23, %v8935_v51  ;;  %v4347_v9 = vpop.eup %4346  ;;  %v3641_v42 = vpop.permute.xlu2 %3640  ;;  %4354 = vtanh.f32 %v2845_v7  ;;  %v2844_v23 = vmul.f32 %v8100_v30, %v8954_v56  ;;  %v8955_v51 = vld [vmem:[#allocation30_spill] sm:$0xff]  ;;  %v463_v56 = vld [vmem:[%s8295_s5 + $0xa0] sm:$0xff] }
 0x9f9   : > { %3695 = vmatpush.msrb.mxu2 %v3692_v18  ;;  %v4349_v41 = vpop.eup %4348  ;;  %v3238_v10 = vmul.f32 %v4347_v9, %v8945_v4  ;;  %4356 = vtanh.f32 %v2846_v24 }
 0x9fa   : > { %v3239_v29 = vmul.f32 %v4349_v41, %v8943_v22  ;;  %v4351_v60 = vpop.eup %4350  ;;  %4358 = vtanh.f32 %v2843_v12  ;;  %v466_v12 = vld [vmem:[%s8295_s5 + $0xb8] sm:$0xff] }
 0x9fb   : > { %v4353_v49 = vpop.eup %4352  ;;  %4360 = vtanh.f32 %v2844_v23  ;;  %v462_v23 = vld [vmem:[%s8295_s5 + $0x98] sm:$0xff] }
 0xa00   : > { %v3631_v25 = vpop.permute.xlu2 %3630 }
 0xa08   : > { %v3621_v57 = vpop.permute.xlu2 %3620 }
 0xa0d   : > { %v4131_v43 = vpop.permute.xlu0 %4130 }
 0xa0e   : > { %v4133_v40 = vunpack.i.h.bf16 %v4131_v43  ;;  %v4132_v20 = vunpack.i.l.bf16 %v4131_v43 }
 0xa10   : > { %v3339_v17 = vmul.f32 %v4132_v20, %v3243_v62  ;;  %v3338_v8 = vmul.f32 %v4133_v40, %v3242_v2  ;;  %v8950_v62 = vmax.f32 %v8949_v55, 0.0  ;;  %v8952_v2 = vmax.f32 %v8951_v21, 0.0  ;;  %v3611_v0 = vpop.permute.xlu2 %3610  ;;  %v8967_v55 = vld [vmem:[#allocation35_spill] sm:$0xff] }
 0xa12   : > { %v3691_v5 = vmul.f32 %v8932_v54, %v3339_v17  ;;  %v4136_v50 = vpop.permute.xlu1 %4135  ;;  %v3690_v15 = vmul.f32 %v8933_v63, %v3338_v8  ;;  %v3237_v38 = vmul.f32 %v4353_v49, %v8950_v62  ;;  %v3236_v14 = vmul.f32 %v4351_v60, %v8952_v2  ;;  %v4355_v54 = vpop.eup %4354 }
 0xa13   : > { %v4138_v16 = vunpack.i.h.bf16 %v4136_v50  ;;  %v4137_v13 = vunpack.i.l.bf16 %v4136_v50  ;;  %v4357_v50 = vpop.eup %4356  ;;  %v8968_v62 = vmax.f32 %v8967_v55, 0.0 }
 0xa14   : > { %3696 = vmatpush.msrb.mxu2 %v3691_v5  ;;  %v4359_v9 = vpop.eup %4358 }
 0xa15   : > { %v3337_v3 = vmul.f32 %v4137_v13, %v3241_v33  ;;  %v3336_v11 = vmul.f32 %v4138_v16, %v3240_v36  ;;  %v3636_v47 = vpop.permute.xlu0 %3635  ;;  %v8956_v33 = vmax.f32 %v8955_v51, 0.0  ;;  %v8958_v36 = vmax.f32 %v8957_v26, 0.0  ;;  %v453_v51 = vld [vmem:[%s8295_s5 + $0x50] sm:$0xff]  ;;  %v8970_v26 = vld [vmem:[#allocation36_spill] sm:$0xff] }
 0xa16   : > { %3697 = vmatpush.msrb.mxu2 %v3690_v15 }
 0xa17   : > { %v3689_v58 = vmul.f32 %v8940_v31, %v3337_v3  ;;  %v3688_v48 = vmul.f32 %v8941_v59, %v3336_v11  ;;  %v3235_v35 = vmul.f32 %v4357_v50, %v8956_v33  ;;  %v3234_v61 = vmul.f32 %v4355_v54, %v8958_v36  ;;  %v8959_v11 = vld [vmem:[#allocation10_spill] sm:$0xff]  ;;  %v8960_v59 = vld [vmem:[#allocation11_spill] sm:$0xff]  ;;  %v461_v54 = vld [vmem:[%s8295_s5 + $0x90] sm:$0xff] }
 0xa18   : > { %v2842_v6 = vmul.f32 %v8100_v30, %v8959_v11  ;;  %v459_v50 = vld [vmem:[%s8295_s5 + $0x80] sm:$0xff]  ;;  %v452_v33 = vld [vmem:[%s8295_s5 + $0x48] sm:$0xff]  ;;  %v480_v36 = vld [vmem:[%s8297_s7 + $0x38] sm:$0xff] }
 0xa19   : > { %3698 = vmatpush.msrb.mxu2 %v3689_v58  ;;  %v4361_v58 = vpop.eup %4360  ;;  %v476_v11 = vld [vmem:[%s8297_s7 + $0x18] sm:$0xff] }
 0xa1a   : > { %v4141_v39 = vpop.permute.xlu1 %4140  ;;  %4362 = vtanh.f32 %v2842_v6  ;;  %v475_v6 = vld [vmem:[%s8297_s7 + $0x10] sm:$0xff] }
 0xa1b   : > { %v4143_v27 = vunpack.i.h.bf16 %v4141_v39  ;;  %v4142_v37 = vunpack.i.l.bf16 %v4141_v39  ;;  %3699 = vmatpush.msrb.mxu2 %v3688_v48  ;;  %v2841_v48 = vmul.f32 %v8100_v30, %v8960_v59 }
 0xa1d   : > { %v3335_v45 = vmul.f32 %v4142_v37, %v3239_v29  ;;  %v3334_v18 = vmul.f32 %v4143_v27, %v3238_v10  ;;  %v3626_v15 = vpop.permute.xlu0 %3625  ;;  %v8961_v37 = vld [vmem:[#allocation19_spill] sm:$0xff]  ;;  %v8963_v29 = vld [vmem:[#allocation33_spill] sm:$0xff]  ;;  %4364 = vtanh.f32 %v2841_v48 }
 0xa1e   : > { %v8962_v1 = vmax.f32 %v8961_v37, 0.0  ;;  %v8964_v46 = vmax.f32 %v8963_v29, 0.0 }
 0xa1f   : > { %v3687_v52 = vmul.f32 %v8948_v44, %v3335_v45  ;;  %v3686_v43 = vmul.f32 %v3641_v42, %v3334_v18  ;;  %v8965_v44 = vld [vmem:[#allocation34_spill] sm:$0xff] }
 0xa20   : > { %v3233_v22 = vmul.f32 %v4361_v58, %v8962_v1  ;;  %v3232_v4 = vmul.f32 %v4359_v9, %v8964_v46  ;;  %v4363_v18 = vpop.eup %4362  ;;  %v473_v9 = vld [vmem:[%s8297_s7] sm:$0xff] }
 0xa21   : > { %3700 = vmatpush.msrb.mxu2 %v3687_v52  ;;  %v8966_v52 = vmax.f32 %v8965_v44, 0.0  ;;  %v4168_v58 = vld [vmem:[%s8296_s6 + $0x4] ss:$0 sm:$0xff] }
 0xa22   : > { %v4146_v40 = vpop.permute.xlu1 %4145 }
 0xa23   : > { %v4148_v20 = vunpack.i.h.bf16 %v4146_v40  ;;  %v4147_v34 = vunpack.i.l.bf16 %v4146_v40  ;;  %3701 = vmatpush.msrb.mxu2 %v3686_v43  ;;  %v3231_v49 = vmul.f32 %v4363_v18, %v8966_v52 }
 0xa25   : > { %v3333_v17 = vmul.f32 %v4147_v34, %v3237_v38  ;;  %v3332_v8 = vmul.f32 %v4148_v20, %v3236_v14  ;;  %v3616_v10 = vpop.permute.xlu0 %3615 }
 0xa27   : > { %v3685_v5 = vmul.f32 %v3636_v47, %v3333_v17  ;;  %v3684_v63 = vmul.f32 %v3631_v25, %v3332_v8  ;;  %v4365_v47 = vpop.eup %4364  ;;  %v467_v25 = vld [vmem:[%s8295_s5 + $0xc0] sm:$0xff]  ;;  %v465_v17 = vld [vmem:[%s8295_s5 + $0xb0] sm:$0xff]  ;;  %v464_v8 = vld [vmem:[%s8295_s5 + $0xa8] sm:$0xff] }
 0xa28   : > { %v3230_v38 = vmul.f32 %v4365_v47, %v8968_v62 }
 0xa29   : > { %3702 = vmatpush.msrb.mxu2 %v3685_v5  ;;  %v460_v5 = vld [vmem:[%s8295_s5 + $0x88] sm:$0xff] }
 0xa2a   : > { %v4151_v16 = vpop.permute.xlu1 %4150 }
 0xa2b   : > { %v4153_v13 = vunpack.i.h.bf16 %v4151_v16  ;;  %v4152_v53 = vunpack.i.l.bf16 %v4151_v16  ;;  %3703 = vmatpush.msrb.mxu2 %v3684_v63  ;;  %v458_v63 = vld [vmem:[%s8295_s5 + $0x78] sm:$0xff]  ;;  %v456_v16 = vld [vmem:[%s8295_s5 + $0x68] sm:$0xff] }
 0xa2d   : > { %v3331_v28 = vmul.f32 %v4152_v53, %v3235_v35  ;;  %v3330_v3 = vmul.f32 %v4153_v13, %v3234_v61  ;;  %v3606_v20 = vpop.permute.xlu0 %3605  ;;  %v455_v13 = vld [vmem:[%s8295_s5 + $0x60] sm:$0xff]  ;;  %v454_v53 = vld [vmem:[%s8295_s5 + $0x58] sm:$0xff]  ;;  %v479_v61 = vld [vmem:[%s8297_s7 + $0x30] sm:$0xff] }
 0xa2f   : > { %v3683_v31 = vmul.f32 %v3626_v15, %v3331_v28  ;;  %v3682_v41 = vmul.f32 %v3621_v57, %v3330_v3  ;;  %v457_v15 = vld [vmem:[%s8295_s5 + $0x70] sm:$0xff]  ;;  %v478_v28 = vld [vmem:[%s8297_s7 + $0x28] sm:$0xff]  ;;  %v477_v3 = vld [vmem:[%s8297_s7 + $0x20] sm:$0xff] }
 0xa30   : > { %v474_v57 = vld [vmem:[%s8297_s7 + $0x8] sm:$0xff] }
 0xa31   : > { %3704 = vmatpush.msrb.mxu2 %v3683_v31 }
 0xa32   : > { %v4156_v42 = vpop.permute.xlu1 %4155 }
 0xa33   : > { %v4158_v39 = vunpack.i.h.bf16 %v4156_v42  ;;  %v4157_v27 = vunpack.i.l.bf16 %v4156_v42  ;;  %3705 = vmatpush.msrb.mxu2 %v3682_v41 }
 0xa35   : > { %v3329_v19 = vmul.f32 %v4157_v27, %v3233_v22  ;;  %v3328_v7 = vmul.f32 %v4158_v39, %v3232_v4  ;;  %v4169_v39 = vld [vmem:[%s8297_s7 + $0x40] ss:$0 sm:$0xff] }
 0xa37   : > { %v3681_v45 = vmul.f32 %v3616_v10, %v3329_v19  ;;  %v3680_v30 = vmul.f32 %v3611_v0, %v3328_v7 }
 0xa39   : > { %3706 = vmatpush.msrb.mxu2 %v3681_v45 }
 0xa3a   : > { %v4161_v24 = vpop.permute.xlu1 %4160 }
 0xa3b   : > { %v4162_v60 = vunpack.i.l.bf16 %v4161_v24  ;;  %3707 = vmatpush.msrb.mxu2 %v3680_v30  ;;  %v4163_v43 = vunpack.i.h.bf16 %v4161_v24 }
 0xa3d   : > { %v3327_v40 = vmul.f32 %v4162_v60, %v3231_v49  ;;  %v3326_v21 = vmul.f32 %v4163_v43, %v3230_v38 }
 0xa3f   : > { %v3679_v34 = vmul.f32 %v3606_v20, %v3327_v40 }
 0xa41   : > { %3708 = vmatpush.msrb.mxu2 %v3679_v34 }
 0xa42   : > { %v3601_v2 = vpop.permute.xlu1 %3600 }
 0xa43   : > { %v3678_v14 = vmul.f32 %v3601_v2, %v3326_v21 }
 0xa45   : > { %3709 = vmatpush.msrb.mxu2 %v3678_v14 }
 0xa46   : > { %3710 = vmatmul.f32.vlgmr.msrb.gmra.mxu2 %v4466_v32 }
 0xa47   : > { %3725 = vmatpush.msra.mxu2 %v467_v25 }
 0xa49   : > { %3726 = vmatpush.msra.mxu2 %v466_v12 }
 0xa4b   : > { %3727 = vmatpush.msra.mxu2 %v465_v17 }
 0xa4d   : > { %3728 = vmatpush.msra.mxu2 %v464_v8 }
 0xa4f   : > { %3729 = vmatpush.msra.mxu2 %v463_v56 }
 0xa51   : > { %3730 = vmatpush.msra.mxu2 %v462_v23 }
 0xa53   : > { %3731 = vmatpush.msra.mxu2 %v461_v54 }
 0xa55   : > { %3732 = vmatpush.msra.mxu2 %v460_v5 }
 0xa57   : > { %3748 = vmatpush.msrb.mxu2 %v459_v50 }
 0xa59   : > { %3749 = vmatpush.msrb.mxu2 %v458_v63 }
 0xa5b   : > { %3750 = vmatpush.msrb.mxu2 %v457_v15 }
 0xa5d   : > { %3751 = vmatpush.msrb.mxu2 %v456_v16 }
 0xa5f   : > { %3752 = vmatpush.msrb.mxu2 %v455_v13 }
 0xa61   : > { %3753 = vmatpush.msrb.mxu2 %v454_v53 }
 0xa63   : > { %3754 = vmatpush.msrb.mxu2 %v453_v51 }
 0xa65   : > { %3755 = vmatpush.msrb.mxu2 %v452_v33 }
 0xac9   : > { %v3711_v35 = vpop.f32.mrf.mxu2 }
 0xaca   : > { %4021 = vmatmul.msk.f32.vlgmr.msra.gmra.mxu2 %vm8969_vm2, %v3711_v35 }
 0xacb   : > { %3775 = vmatpush.msra.mxu2 %v480_v36 }
 0xacd   : > { %3776 = vmatpush.msra.mxu2 %v479_v61 }
 0xacf   : > { %3777 = vmatpush.msra.mxu2 %v478_v28 }
 0xad1   : > { %3778 = vmatpush.msra.mxu2 %v477_v3 }
 0xad2   : > { %4022 = vmatmul.msk.f32.vlgmr.msrb.gmra.mxu2 %vm8971_vm6, %v8970_v26 }
 0xad3   : > { %3779 = vmatpush.msra.mxu2 %v476_v11 }
 0xad5   : > { %3780 = vmatpush.msra.mxu2 %v475_v6 }
 0xad7   : > { %3781 = vmatpush.msra.mxu2 %v474_v57 }
 0xad9   : > { %3782 = vmatpush.msra.mxu2 %v473_v9 }
 0xb4d   : > { %v3734_v31 = vpop.f32.mrf.mxu2 }
 0xb55   : > { %v3757_v41 = vpop.f32.mrf.mxu2 }
 0xb56   : > { %v3758_v59 = vadd.f32 %v3757_v41, %v3734_v31 }
 0xb58   : > { %v3761_v48 = vadd.f32 %v4168_v58, %v3758_v59 }
 0xb5a   : > { %v3762_v42 = vmax.f32 %v3761_v48, 0.0 }
 0xb5c   : > { %4023 = vmatmul.msk.f32.vlgmr.msra.gmra.mxu2 %vm8972_vm1, %v3762_v42 }
 0xbdf   : > { %v3784_v27 = vpop.f32.mrf.mxu2 }
 0xbe0   : > { %v3785_v37 = vadd.f32 %v4169_v39, %v3784_v27 }
 0xbe2   : > { %3787 = vmax.xlane.f32.xlu2 %v3785_v37 }
 0xc55   : > { %v3788_v1 = vpop.xlane.xlu2 %3787 }
 0xc56   : > { %v3789_v22 = vsub.f32 %v3785_v37, %v3788_v1 }
 0xc58   : > { %v3790_v29 = vmul.f32 1.442695, %v3789_v22 }
 0xc5a   : > { %4366 = vpow2.f32 %v3790_v29 }
 0xc60   : > { %v4367_v46 = vpop.eup %4366 }
 0xc61   : > { %3792 = vadd.xlane.f32.xlu0 %v4367_v46 }
 0xcd4   : > { %v3793_v4 = vpop.xlane.xlu0 %3792 }
 0xcd5   : > { %4368 = vlog2.f32 %v3793_v4 }
 0xcdb   : > { %v4369_v10 = vpop.eup %4368 }
 0xcdc   : > { %v3795_v19 = vmul.f32 0.6931472, %v4369_v10 }
 0xcde   : > { %v3796_v7 = vadd.f32 %v3795_v19, %v3788_v1 }
 0xce0   : > { %v3797_v45 = vsub.f32 %v3785_v37, %v3796_v7 }
 0xce2   : > { %3798 = vst [vmem:[%s328_s12] sm:$0xff] %v3797_v45 }
 0xce3   : > { %4494 = shalt.err (!%p4491_p3)
}
 0xce4   : > { %4039 = dma.vmem_to_hbm [thread:$0]  (%p4617_p5), %s3813_s13, 128, %s3815_s17, %s3800_s18  }
 0xce5 PF: > { %p4045_p4 = scmp.ge.s32.totalorder %s4529_s30, 2  ;;  %s3826_s24 = sand.u32 1, %s4517_s27  }
 0xce6   : > { %s3827_s26 = scalar_lea.sflag [#allocation3], %s3826_s24 }
 0xce7   : > { %p4042_p7 = pnand %p4045_p4, %p4621_p6 }
 0xce9   : > { %p4043_p8 = pneg %p4042_p7 }
 0xceb   : > { %4512 = dma.done.wait (%p4043_p8), %s3827_s26, 128  }
 0xcec   : > { %4514 = vsyncadd (%p4043_p8), %s3827_s26, 4294967168  ;;  %p18_p9 = scmp.ge.s32.totalorder %s4604_s11, 4   ;;  %s8973_s27 = smov %s4521_s28 }
 0xced   : > { %s8974_s28 = smov %s4525_s29  ;;  %s8975_s29 = smov %s4615_s14 }
 0xcee   : > { %s8976_s30 = smov %s4604_s11  ;;  %20 = sbr.rel (!%p18_p9) target bundleno = 3 (0x3), region = 95 }
 0xcf3   :  { %3833 = vsyncpa [#allocation3], 1 }
 0xcf4   :  { %3835 = vsyncpa [#allocation3 + $0x1], 1 }

</bundles_post_ra>
